<compile_context>
chip_gen: v7x
topology: tpu7x:2x2x1
jax: 0.10.0
libtpu: 0.0.40
codegen_flags: <defaults>
</compile_context>

<pallas_src>
import numpy as np
import jax
import jax.numpy as jnp
from jax.experimental import pallas as pl
from jax.experimental.pallas import tpu as pltpu


# ----------------------------------------------------------------------------
# 1-D bilinear interpolation matrix (PyTorch F.interpolate, align_corners=False)
# ----------------------------------------------------------------------------
def _bilinear_matrix(in_size, out_size):
    A = np.zeros((out_size, in_size), np.float32)
    if in_size == out_size:
        np.fill_diagonal(A, 1.0)
        return A
    scale = in_size / out_size
    for o in range(out_size):
        src = (o + 0.5) * scale - 0.5
        src = max(src, 0.0)                       # PyTorch clamps negative src
        x0 = min(int(np.floor(src)), in_size - 1)
        x1 = min(x0 + 1, in_size - 1)
        lam = src - x0
        A[o, x0] += 1.0 - lam
        A[o, x1] += lam
    return A


# ----------------------------------------------------------------------------
# Fused MSCC kernel: heads + KLD + separable pyramid resizes + running max.
# No grid; every operand is whole-array VMEM/SMEM resident.
# ----------------------------------------------------------------------------
def _make_mscc_kernel(N, C, H, W, ncls, pyr_sizes, training):
    P = len(pyr_sizes)
    B2 = ncls * N                      # rows of every full-res logit slab (k, n)

    def kernel(xa_ref, xr_ref, mask_ref, w_ref, *rest):
        pyr_refs = rest[:4 * P]
        out_refs = rest[4 * P:]
        kld_ref, h0_ref, h1_ref, hmax_ref = out_refs[:4]
        lp_refs = out_refs[4:]

        xa = xa_ref[...]               # (C, N, H, W) f32  -- VPU head path
        xr = xr_ref[...]               # (C*N, H, W) bf16  -- MXU resize path

        # ---- full-resolution 1x1-conv heads: C scalar MACs per tile (VPU) ----
        # weights/biases come from SMEM: w_ref[k, :C] = W^T row, w_ref[k, C] = b
        h0_tiles, h1_tiles = [], []
        for k in range(ncls):
            for n in range(N):
                t0 = w_ref[k, 0] * xa[0, n]
                t1 = w_ref[ncls + k, 0] * xa[0, n]
                for c in range(1, C):
                    t0 = t0 + w_ref[k, c] * xa[c, n]
                    t1 = t1 + w_ref[ncls + k, c] * xa[c, n]
                h0_tiles.append(t0 + w_ref[k, C])
                h1_tiles.append(t1 + w_ref[ncls + k, C])
        h0 = jnp.stack(h0_tiles)       # (ncls*N, H, W) f32, rows ordered (k, n)
        h1 = jnp.stack(h1_tiles)
        h0_ref[...] = h0
        h1_ref[...] = h1

        # ---- synthetic KLD = mean((h0 - h1)^2) * mean(mask)   (all f32) -------
        d = h0 - h1
        sq = jnp.sum(jnp.sum(jnp.sum(d * d, axis=2, keepdims=True),
                             axis=1, keepdims=True), axis=0, keepdims=True)
        msd = sq / float(B2 * H * W)                       # (1, 1, 1)
        m = mask_ref[...]                                  # (N, H, W) f32
        ms = jnp.sum(jnp.sum(jnp.sum(m, axis=2, keepdims=True),
                             axis=1, keepdims=True), axis=0, keepdims=True)
        mm = ms / float(N * H * W)                         # (1, 1, 1)
        kld_ref[...] = msd * mm
        # TODO(synk): a (1,1,1) VMEM tile pads to a vreg; an SMEM scalar output
        # would avoid the padded masked store (micro-win).

        # ---- pyramid levels: separable downsample -> head0 -> upsample -> max -
        acc = h0
        for p, (sh, sw) in enumerate(pyr_sizes):
            awd = pyr_refs[4 * p + 0][...]    # (C*N, W, sw) bf16   down, W axis
            ahd = pyr_refs[4 * p + 1][...]    # (C*N, sh, H) bf16   down, H axis
            awu = pyr_refs[4 * p + 2][...]    # (B2, sw, W)  bf16   up,   W axis
            ahu = pyr_refs[4 * p + 3][...]    # (B2, H, sh)  bf16   up,   H axis

            # downsample x (batched over the (c, n) rows), bf16 MXU / f32 acc
            t = jnp.einsum('bhw,bws->bhs', xr, awd,
                           preferred_element_type=jnp.float32)      # (C*N, H, sw)
            xd = jnp.einsum('bgh,bhs->bgs', ahd, t.astype(jnp.bfloat16),
                            preferred_element_type=jnp.float32)     # (C*N, sh, sw)

            # head 0 at this level (same VPU MAC form, f32)
            lp_tiles = []
            for k in range(ncls):
                for n in range(N):
                    tk = w_ref[k, 0] * xd[0 * N + n]
                    for c in range(1, C):
                        tk = tk + w_ref[k, c] * xd[c * N + n]
                    lp_tiles.append(tk + w_ref[k, C])
            lp = jnp.stack(lp_tiles)          # (ncls*N, sh, sw) f32, rows (k, n)
            if training:
                lp_refs[p][...] = lp          # native-res logits (training only)

            # upsample the logits back to (H, W): W axis then H axis
            u = jnp.einsum('bgs,bsw->bgw', lp.astype(jnp.bfloat16), awu,
                           preferred_element_type=jnp.float32)      # (B2, sh, W)
            up = jnp.einsum('bhg,bgw->bhw', ahu, u.astype(jnp.bfloat16),
                            preferred_element_type=jnp.float32)     # (B2, H, W)
            acc = jnp.maximum(acc, up)        # f32 running max (VPU)

        hmax_ref[...] = acc

    return kernel


# ----------------------------------------------------------------------------
# Synthetic `scale` sub-network parameters (two 1x1-conv heads + masked MSE).
# ----------------------------------------------------------------------------
class ScaleNet:
    def __init__(self, in_ch, num_classes, key):
        k0, k1, k2, k3 = jax.random.split(key, 4)
        self.w0 = 0.2 * jax.random.normal(k0, (in_ch, num_classes), jnp.float32)
        self.b0 = 0.1 * jax.random.normal(k1, (num_classes,), jnp.float32)
        self.w1 = 0.2 * jax.random.normal(k2, (in_ch, num_classes), jnp.float32)
        self.b1 = 0.1 * jax.random.normal(k3, (num_classes,), jnp.float32)
        self.in_ch = in_ch
        self.num_classes = num_classes


# ----------------------------------------------------------------------------
# MSCC forward (matches the PyTorch module's control flow) -- ONE pallas_call.
# ----------------------------------------------------------------------------
def mscc_forward(x, mask, scale, pyramids=(0.5, 0.75), training=False):
    N, C, H, W = x.shape
    ncls = scale.num_classes
    B2 = ncls * N

    # --- host/XLA-side prep (tiny constants / free views under jit) ----------
    xt = jnp.transpose(x.astype(jnp.float32), (1, 0, 2, 3))    # (C, N, H, W)
    xr = xt.reshape(C * N, H, W).astype(jnp.bfloat16)           # resize-path view
    maskf = mask.astype(jnp.float32).reshape(N, H, W)

    # fused head table in SMEM: rows 0..ncls-1 = head0 [W^T | b0], then head1
    w_s = jnp.concatenate(
        [jnp.concatenate([scale.w0.T, scale.b0[:, None]], axis=1),
         jnp.concatenate([scale.w1.T, scale.b1[:, None]], axis=1)],
        axis=0)                                                  # (2*ncls, C+1)

    pyr_sizes, pyr_mats = [], []
    for pfac in pyramids:
        sh, sw = int(H * pfac), int(W * pfac)     # matches torch: int(s * p)
        pyr_sizes.append((sh, sw))
        awd = _bilinear_matrix(W, sw).T           # (W, sw)  down, W axis
        ahd = _bilinear_matrix(H, sh)             # (sh, H)  down, H axis
        awu = _bilinear_matrix(sw, W).T           # (sw, W)  up,   W axis
        ahu = _bilinear_matrix(sh, H)             # (H, sh)  up,   H axis
        pyr_mats += [
            jnp.broadcast_to(jnp.asarray(awd, jnp.bfloat16), (C * N, W, sw)),
            jnp.broadcast_to(jnp.asarray(ahd, jnp.bfloat16), (C * N, sh, H)),
            jnp.broadcast_to(jnp.asarray(awu, jnp.bfloat16), (B2, sw, W)),
            jnp.broadcast_to(jnp.asarray(ahu, jnp.bfloat16), (B2, H, sh)),
        ]

    def vmem():
        return pl.BlockSpec(memory_space=pltpu.MemorySpace.VMEM)

    def smem():
        return pl.BlockSpec(memory_space=pltpu.MemorySpace.SMEM)

    in_arrays = [xt, xr, maskf, w_s] + pyr_mats
    in_specs = [vmem(), vmem(), vmem(), smem()] + [vmem() for _ in pyr_mats]

    out_shape = [
        jax.ShapeDtypeStruct((1, 1, 1), jnp.float32),        # KLD
        jax.ShapeDtypeStruct((B2, H, W), jnp.float32),       # h0 (rows (k, n))
        jax.ShapeDtypeStruct((B2, H, W), jnp.float32),       # h1
        jax.ShapeDtypeStruct((B2, H, W), jnp.float32),       # element-wise max
    ]
    if training:
        out_shape += [jax.ShapeDtypeStruct((B2, sh, sw), jnp.float32)
                      for (sh, sw) in pyr_sizes]
    out_specs = tuple(vmem() for _ in out_shape)

    outs = pl.pallas_call(
        _make_mscc_kernel(N, C, H, W, ncls, tuple(pyr_sizes), training),
        out_shape=tuple(out_shape),
        in_specs=in_specs,
        out_specs=out_specs,
    )(*in_arrays)

    kld = outs[0][0, 0, 0]

    def to_nchw(a):  # kernel layout (ncls*N, h, w) rows (k, n) -> (N, ncls, h, w)
        return jnp.transpose(
            a.reshape(ncls, N, a.shape[1], a.shape[2]), (1, 0, 2, 3))

    h0 = to_nchw(outs[1])
    h1 = to_nchw(outs[2])
    logits_max = to_nchw(outs[3])

    if training:
        logits_pyramid = [to_nchw(o) for o in outs[4:]]
        logits_h0 = [h0] + logits_pyramid + [logits_max]
    else:
        logits_h0 = logits_max
    return kld, logits_h0, h0, h1


if __name__ == "__main__":
    key = jax.random.PRNGKey(0)
    kx, km, kp = jax.random.split(key, 3)
    N, C, H, W = 2, 4, 16, 16
    num_classes = 5

    x = jax.random.normal(kx, (N, C, H, W), jnp.float32)
    mask = (jax.random.uniform(km, (N, 1, H, W)) > 0.3).astype(jnp.float32)

    scale = ScaleNet(C, num_classes, kp)

    fwd = jax.jit(lambda xx, mm: mscc_forward(
        xx, mm, scale, pyramids=(0.5, 0.75), training=False))

    KLD, logits_h0, h0, h1 = fwd(x, mask)
    jax.block_until_ready((KLD, logits_h0, h0, h1))

    assert h0.shape == (N, num_classes, H, W)
    assert h1.shape == (N, num_classes, H, W)
    assert logits_h0.shape == (N, num_classes, H, W)
    assert KLD.shape == ()
    assert bool(jnp.isfinite(KLD))
    assert bool(jnp.all(jnp.isfinite(logits_h0)))

    print("KERNEL_OK")
</pallas_src>

<mosaic_0001>
module attributes {stable_mosaic.version = 11 : i64} {
  func.func @kernel(%arg0: memref<4x2x16x16xf32, #tpu.memory_space<vmem>>, %arg1: memref<8x16x16xbf16, #tpu.memory_space<vmem>>, %arg2: memref<2x16x16xf32, #tpu.memory_space<vmem>>, %arg3: memref<10x5xf32, #tpu.memory_space<smem>>, %arg4: memref<8x16x8xbf16, #tpu.memory_space<vmem>>, %arg5: memref<8x8x16xbf16, #tpu.memory_space<vmem>>, %arg6: memref<10x8x16xbf16, #tpu.memory_space<vmem>>, %arg7: memref<10x16x8xbf16, #tpu.memory_space<vmem>>, %arg8: memref<8x16x12xbf16, #tpu.memory_space<vmem>>, %arg9: memref<8x12x16xbf16, #tpu.memory_space<vmem>>, %arg10: memref<10x12x16xbf16, #tpu.memory_space<vmem>>, %arg11: memref<10x16x12xbf16, #tpu.memory_space<vmem>>, %arg12: memref<1x1x1xf32, #tpu.memory_space<vmem>>, %arg13: memref<10x16x16xf32, #tpu.memory_space<vmem>>, %arg14: memref<10x16x16xf32, #tpu.memory_space<vmem>>, %arg15: memref<10x16x16xf32, #tpu.memory_space<vmem>>) attributes {dimension_semantics = [], scalar_prefetch = 0 : i64, scratch_operands = 0 : i64, tpu.core_type = #tpu.core_type<tc>} {
    %c0 = arith.constant 0 : index
    %c0_0 = arith.constant 0 : index
    %c0_1 = arith.constant 0 : index
    %c0_2 = arith.constant 0 : index
    %0 = vector.load %arg0[%c0, %c0_0, %c0_1, %c0_2] : memref<4x2x16x16xf32, #tpu.memory_space<vmem>>, vector<4x2x16x16xf32>
    %c0_3 = arith.constant 0 : index
    %c0_4 = arith.constant 0 : index
    %c0_5 = arith.constant 0 : index
    %1 = vector.load %arg1[%c0_3, %c0_4, %c0_5] : memref<8x16x16xbf16, #tpu.memory_space<vmem>>, vector<8x16x16xbf16>
    %c0_6 = arith.constant 0 : index
    %c0_7 = arith.constant 0 : index
    %2 = memref.load %arg3[%c0_6, %c0_7] : memref<10x5xf32, #tpu.memory_space<smem>>
    %3 = vector.extract_strided_slice %0 {offsets = [0, 0, 0, 0], sizes = [1, 1, 16, 16], strides = [1, 1, 1, 1]} : vector<4x2x16x16xf32> to vector<1x1x16x16xf32>
    %4 = vector.shape_cast %3 : vector<1x1x16x16xf32> to vector<16x16xf32>
    %5 = vector.broadcast %2 : f32 to vector<16x16xf32>
    %6 = arith.mulf %5, %4 : vector<16x16xf32>
    %c5 = arith.constant 5 : index
    %c0_8 = arith.constant 0 : index
    %7 = memref.load %arg3[%c5, %c0_8] : memref<10x5xf32, #tpu.memory_space<smem>>
    %8 = vector.extract_strided_slice %0 {offsets = [0, 0, 0, 0], sizes = [1, 1, 16, 16], strides = [1, 1, 1, 1]} : vector<4x2x16x16xf32> to vector<1x1x16x16xf32>
    %9 = vector.shape_cast %8 : vector<1x1x16x16xf32> to vector<16x16xf32>
    %10 = vector.broadcast %7 : f32 to vector<16x16xf32>
    %11 = arith.mulf %10, %9 : vector<16x16xf32>
    %c0_9 = arith.constant 0 : index
    %c1 = arith.constant 1 : index
    %12 = memref.load %arg3[%c0_9, %c1] : memref<10x5xf32, #tpu.memory_space<smem>>
    %13 = vector.extract_strided_slice %0 {offsets = [1, 0, 0, 0], sizes = [1, 1, 16, 16], strides = [1, 1, 1, 1]} : vector<4x2x16x16xf32> to vector<1x1x16x16xf32>
    %14 = vector.shape_cast %13 : vector<1x1x16x16xf32> to vector<16x16xf32>
    %15 = vector.broadcast %12 : f32 to vector<16x16xf32>
    %16 = arith.mulf %15, %14 : vector<16x16xf32>
    %17 = arith.addf %6, %16 : vector<16x16xf32>
    %c5_10 = arith.constant 5 : index
    %c1_11 = arith.constant 1 : index
    %18 = memref.load %arg3[%c5_10, %c1_11] : memref<10x5xf32, #tpu.memory_space<smem>>
    %19 = vector.extract_strided_slice %0 {offsets = [1, 0, 0, 0], sizes = [1, 1, 16, 16], strides = [1, 1, 1, 1]} : vector<4x2x16x16xf32> to vector<1x1x16x16xf32>
    %20 = vector.shape_cast %19 : vector<1x1x16x16xf32> to vector<16x16xf32>
    %21 = vector.broadcast %18 : f32 to vector<16x16xf32>
    %22 = arith.mulf %21, %20 : vector<16x16xf32>
    %23 = arith.addf %11, %22 : vector<16x16xf32>
    %c0_12 = arith.constant 0 : index
    %c2 = arith.constant 2 : index
    %24 = memref.load %arg3[%c0_12, %c2] : memref<10x5xf32, #tpu.memory_space<smem>>
    %25 = vector.extract_strided_slice %0 {offsets = [2, 0, 0, 0], sizes = [1, 1, 16, 16], strides = [1, 1, 1, 1]} : vector<4x2x16x16xf32> to vector<1x1x16x16xf32>
    %26 = vector.shape_cast %25 : vector<1x1x16x16xf32> to vector<16x16xf32>
    %27 = vector.broadcast %24 : f32 to vector<16x16xf32>
    %28 = arith.mulf %27, %26 : vector<16x16xf32>
    %29 = arith.addf %17, %28 : vector<16x16xf32>
    %c5_13 = arith.constant 5 : index
    %c2_14 = arith.constant 2 : index
    %30 = memref.load %arg3[%c5_13, %c2_14] : memref<10x5xf32, #tpu.memory_space<smem>>
    %31 = vector.extract_strided_slice %0 {offsets = [2, 0, 0, 0], sizes = [1, 1, 16, 16], strides = [1, 1, 1, 1]} : vector<4x2x16x16xf32> to vector<1x1x16x16xf32>
    %32 = vector.shape_cast %31 : vector<1x1x16x16xf32> to vector<16x16xf32>
    %33 = vector.broadcast %30 : f32 to vector<16x16xf32>
    %34 = arith.mulf %33, %32 : vector<16x16xf32>
    %35 = arith.addf %23, %34 : vector<16x16xf32>
    %c0_15 = arith.constant 0 : index
    %c3 = arith.constant 3 : index
    %36 = memref.load %arg3[%c0_15, %c3] : memref<10x5xf32, #tpu.memory_space<smem>>
    %37 = vector.extract_strided_slice %0 {offsets = [3, 0, 0, 0], sizes = [1, 1, 16, 16], strides = [1, 1, 1, 1]} : vector<4x2x16x16xf32> to vector<1x1x16x16xf32>
    %38 = vector.shape_cast %37 : vector<1x1x16x16xf32> to vector<16x16xf32>
    %39 = vector.broadcast %36 : f32 to vector<16x16xf32>
    %40 = arith.mulf %39, %38 : vector<16x16xf32>
    %41 = arith.addf %29, %40 : vector<16x16xf32>
    %c5_16 = arith.constant 5 : index
    %c3_17 = arith.constant 3 : index
    %42 = memref.load %arg3[%c5_16, %c3_17] : memref<10x5xf32, #tpu.memory_space<smem>>
    %43 = vector.extract_strided_slice %0 {offsets = [3, 0, 0, 0], sizes = [1, 1, 16, 16], strides = [1, 1, 1, 1]} : vector<4x2x16x16xf32> to vector<1x1x16x16xf32>
    %44 = vector.shape_cast %43 : vector<1x1x16x16xf32> to vector<16x16xf32>
    %45 = vector.broadcast %42 : f32 to vector<16x16xf32>
    %46 = arith.mulf %45, %44 : vector<16x16xf32>
    %47 = arith.addf %35, %46 : vector<16x16xf32>
    %c0_18 = arith.constant 0 : index
    %c4 = arith.constant 4 : index
    %48 = memref.load %arg3[%c0_18, %c4] : memref<10x5xf32, #tpu.memory_space<smem>>
    %49 = vector.broadcast %48 : f32 to vector<16x16xf32>
    %50 = arith.addf %41, %49 : vector<16x16xf32>
    %c5_19 = arith.constant 5 : index
    %c4_20 = arith.constant 4 : index
    %51 = memref.load %arg3[%c5_19, %c4_20] : memref<10x5xf32, #tpu.memory_space<smem>>
    %52 = vector.broadcast %51 : f32 to vector<16x16xf32>
    %53 = arith.addf %47, %52 : vector<16x16xf32>
    %c0_21 = arith.constant 0 : index
    %c0_22 = arith.constant 0 : index
    %54 = memref.load %arg3[%c0_21, %c0_22] : memref<10x5xf32, #tpu.memory_space<smem>>
    %55 = vector.extract_strided_slice %0 {offsets = [0, 1, 0, 0], sizes = [1, 1, 16, 16], strides = [1, 1, 1, 1]} : vector<4x2x16x16xf32> to vector<1x1x16x16xf32>
    %56 = vector.shape_cast %55 : vector<1x1x16x16xf32> to vector<16x16xf32>
    %57 = vector.broadcast %54 : f32 to vector<16x16xf32>
    %58 = arith.mulf %57, %56 : vector<16x16xf32>
    %c5_23 = arith.constant 5 : index
    %c0_24 = arith.constant 0 : index
    %59 = memref.load %arg3[%c5_23, %c0_24] : memref<10x5xf32, #tpu.memory_space<smem>>
    %60 = vector.extract_strided_slice %0 {offsets = [0, 1, 0, 0], sizes = [1, 1, 16, 16], strides = [1, 1, 1, 1]} : vector<4x2x16x16xf32> to vector<1x1x16x16xf32>
    %61 = vector.shape_cast %60 : vector<1x1x16x16xf32> to vector<16x16xf32>
    %62 = vector.broadcast %59 : f32 to vector<16x16xf32>
    %63 = arith.mulf %62, %61 : vector<16x16xf32>
    %c0_25 = arith.constant 0 : index
    %c1_26 = arith.constant 1 : index
    %64 = memref.load %arg3[%c0_25, %c1_26] : memref<10x5xf32, #tpu.memory_space<smem>>
    %65 = vector.extract_strided_slice %0 {offsets = [1, 1, 0, 0], sizes = [1, 1, 16, 16], strides = [1, 1, 1, 1]} : vector<4x2x16x16xf32> to vector<1x1x16x16xf32>
    %66 = vector.shape_cast %65 : vector<1x1x16x16xf32> to vector<16x16xf32>
    %67 = vector.broadcast %64 : f32 to vector<16x16xf32>
    %68 = arith.mulf %67, %66 : vector<16x16xf32>
    %69 = arith.addf %58, %68 : vector<16x16xf32>
    %c5_27 = arith.constant 5 : index
    %c1_28 = arith.constant 1 : index
    %70 = memref.load %arg3[%c5_27, %c1_28] : memref<10x5xf32, #tpu.memory_space<smem>>
    %71 = vector.extract_strided_slice %0 {offsets = [1, 1, 0, 0], sizes = [1, 1, 16, 16], strides = [1, 1, 1, 1]} : vector<4x2x16x16xf32> to vector<1x1x16x16xf32>
    %72 = vector.shape_cast %71 : vector<1x1x16x16xf32> to vector<16x16xf32>
    %73 = vector.broadcast %70 : f32 to vector<16x16xf32>
    %74 = arith.mulf %73, %72 : vector<16x16xf32>
    %75 = arith.addf %63, %74 : vector<16x16xf32>
    %c0_29 = arith.constant 0 : index
    %c2_30 = arith.constant 2 : index
    %76 = memref.load %arg3[%c0_29, %c2_30] : memref<10x5xf32, #tpu.memory_space<smem>>
    %77 = vector.extract_strided_slice %0 {offsets = [2, 1, 0, 0], sizes = [1, 1, 16, 16], strides = [1, 1, 1, 1]} : vector<4x2x16x16xf32> to vector<1x1x16x16xf32>
    %78 = vector.shape_cast %77 : vector<1x1x16x16xf32> to vector<16x16xf32>
    %79 = vector.broadcast %76 : f32 to vector<16x16xf32>
    %80 = arith.mulf %79, %78 : vector<16x16xf32>
    %81 = arith.addf %69, %80 : vector<16x16xf32>
    %c5_31 = arith.constant 5 : index
    %c2_32 = arith.constant 2 : index
    %82 = memref.load %arg3[%c5_31, %c2_32] : memref<10x5xf32, #tpu.memory_space<smem>>
    %83 = vector.extract_strided_slice %0 {offsets = [2, 1, 0, 0], sizes = [1, 1, 16, 16], strides = [1, 1, 1, 1]} : vector<4x2x16x16xf32> to vector<1x1x16x16xf32>
    %84 = vector.shape_cast %83 : vector<1x1x16x16xf32> to vector<16x16xf32>
    %85 = vector.broadcast %82 : f32 to vector<16x16xf32>
    %86 = arith.mulf %85, %84 : vector<16x16xf32>
    %87 = arith.addf %75, %86 : vector<16x16xf32>
    %c0_33 = arith.constant 0 : index
    %c3_34 = arith.constant 3 : index
    %88 = memref.load %arg3[%c0_33, %c3_34] : memref<10x5xf32, #tpu.memory_space<smem>>
    %89 = vector.extract_strided_slice %0 {offsets = [3, 1, 0, 0], sizes = [1, 1, 16, 16], strides = [1, 1, 1, 1]} : vector<4x2x16x16xf32> to vector<1x1x16x16xf32>
    %90 = vector.shape_cast %89 : vector<1x1x16x16xf32> to vector<16x16xf32>
    %91 = vector.broadcast %88 : f32 to vector<16x16xf32>
    %92 = arith.mulf %91, %90 : vector<16x16xf32>
    %93 = arith.addf %81, %92 : vector<16x16xf32>
    %c5_35 = arith.constant 5 : index
    %c3_36 = arith.constant 3 : index
    %94 = memref.load %arg3[%c5_35, %c3_36] : memref<10x5xf32, #tpu.memory_space<smem>>
    %95 = vector.extract_strided_slice %0 {offsets = [3, 1, 0, 0], sizes = [1, 1, 16, 16], strides = [1, 1, 1, 1]} : vector<4x2x16x16xf32> to vector<1x1x16x16xf32>
    %96 = vector.shape_cast %95 : vector<1x1x16x16xf32> to vector<16x16xf32>
    %97 = vector.broadcast %94 : f32 to vector<16x16xf32>
    %98 = arith.mulf %97, %96 : vector<16x16xf32>
    %99 = arith.addf %87, %98 : vector<16x16xf32>
    %c0_37 = arith.constant 0 : index
    %c4_38 = arith.constant 4 : index
    %100 = memref.load %arg3[%c0_37, %c4_38] : memref<10x5xf32, #tpu.memory_space<smem>>
    %101 = vector.broadcast %100 : f32 to vector<16x16xf32>
    %102 = arith.addf %93, %101 : vector<16x16xf32>
    %c5_39 = arith.constant 5 : index
    %c4_40 = arith.constant 4 : index
    %103 = memref.load %arg3[%c5_39, %c4_40] : memref<10x5xf32, #tpu.memory_space<smem>>
    %104 = vector.broadcast %103 : f32 to vector<16x16xf32>
    %105 = arith.addf %99, %104 : vector<16x16xf32>
    %c1_41 = arith.constant 1 : index
    %c0_42 = arith.constant 0 : index
    %106 = memref.load %arg3[%c1_41, %c0_42] : memref<10x5xf32, #tpu.memory_space<smem>>
    %107 = vector.extract_strided_slice %0 {offsets = [0, 0, 0, 0], sizes = [1, 1, 16, 16], strides = [1, 1, 1, 1]} : vector<4x2x16x16xf32> to vector<1x1x16x16xf32>
    %108 = vector.shape_cast %107 : vector<1x1x16x16xf32> to vector<16x16xf32>
    %109 = vector.broadcast %106 : f32 to vector<16x16xf32>
    %110 = arith.mulf %109, %108 : vector<16x16xf32>
    %c6 = arith.constant 6 : index
    %c0_43 = arith.constant 0 : index
    %111 = memref.load %arg3[%c6, %c0_43] : memref<10x5xf32, #tpu.memory_space<smem>>
    %112 = vector.extract_strided_slice %0 {offsets = [0, 0, 0, 0], sizes = [1, 1, 16, 16], strides = [1, 1, 1, 1]} : vector<4x2x16x16xf32> to vector<1x1x16x16xf32>
    %113 = vector.shape_cast %112 : vector<1x1x16x16xf32> to vector<16x16xf32>
    %114 = vector.broadcast %111 : f32 to vector<16x16xf32>
    %115 = arith.mulf %114, %113 : vector<16x16xf32>
    %c1_44 = arith.constant 1 : index
    %c1_45 = arith.constant 1 : index
    %116 = memref.load %arg3[%c1_44, %c1_45] : memref<10x5xf32, #tpu.memory_space<smem>>
    %117 = vector.extract_strided_slice %0 {offsets = [1, 0, 0, 0], sizes = [1, 1, 16, 16], strides = [1, 1, 1, 1]} : vector<4x2x16x16xf32> to vector<1x1x16x16xf32>
    %118 = vector.shape_cast %117 : vector<1x1x16x16xf32> to vector<16x16xf32>
    %119 = vector.broadcast %116 : f32 to vector<16x16xf32>
    %120 = arith.mulf %119, %118 : vector<16x16xf32>
    %121 = arith.addf %110, %120 : vector<16x16xf32>
    %c6_46 = arith.constant 6 : index
    %c1_47 = arith.constant 1 : index
    %122 = memref.load %arg3[%c6_46, %c1_47] : memref<10x5xf32, #tpu.memory_space<smem>>
    %123 = vector.extract_strided_slice %0 {offsets = [1, 0, 0, 0], sizes = [1, 1, 16, 16], strides = [1, 1, 1, 1]} : vector<4x2x16x16xf32> to vector<1x1x16x16xf32>
    %124 = vector.shape_cast %123 : vector<1x1x16x16xf32> to vector<16x16xf32>
    %125 = vector.broadcast %122 : f32 to vector<16x16xf32>
    %126 = arith.mulf %125, %124 : vector<16x16xf32>
    %127 = arith.addf %115, %126 : vector<16x16xf32>
    %c1_48 = arith.constant 1 : index
    %c2_49 = arith.constant 2 : index
    %128 = memref.load %arg3[%c1_48, %c2_49] : memref<10x5xf32, #tpu.memory_space<smem>>
    %129 = vector.extract_strided_slice %0 {offsets = [2, 0, 0, 0], sizes = [1, 1, 16, 16], strides = [1, 1, 1, 1]} : vector<4x2x16x16xf32> to vector<1x1x16x16xf32>
    %130 = vector.shape_cast %129 : vector<1x1x16x16xf32> to vector<16x16xf32>
    %131 = vector.broadcast %128 : f32 to vector<16x16xf32>
    %132 = arith.mulf %131, %130 : vector<16x16xf32>
    %133 = arith.addf %121, %132 : vector<16x16xf32>
    %c6_50 = arith.constant 6 : index
    %c2_51 = arith.constant 2 : index
    %134 = memref.load %arg3[%c6_50, %c2_51] : memref<10x5xf32, #tpu.memory_space<smem>>
    %135 = vector.extract_strided_slice %0 {offsets = [2, 0, 0, 0], sizes = [1, 1, 16, 16], strides = [1, 1, 1, 1]} : vector<4x2x16x16xf32> to vector<1x1x16x16xf32>
    %136 = vector.shape_cast %135 : vector<1x1x16x16xf32> to vector<16x16xf32>
    %137 = vector.broadcast %134 : f32 to vector<16x16xf32>
    %138 = arith.mulf %137, %136 : vector<16x16xf32>
    %139 = arith.addf %127, %138 : vector<16x16xf32>
    %c1_52 = arith.constant 1 : index
    %c3_53 = arith.constant 3 : index
    %140 = memref.load %arg3[%c1_52, %c3_53] : memref<10x5xf32, #tpu.memory_space<smem>>
    %141 = vector.extract_strided_slice %0 {offsets = [3, 0, 0, 0], sizes = [1, 1, 16, 16], strides = [1, 1, 1, 1]} : vector<4x2x16x16xf32> to vector<1x1x16x16xf32>
    %142 = vector.shape_cast %141 : vector<1x1x16x16xf32> to vector<16x16xf32>
    %143 = vector.broadcast %140 : f32 to vector<16x16xf32>
    %144 = arith.mulf %143, %142 : vector<16x16xf32>
    %145 = arith.addf %133, %144 : vector<16x16xf32>
    %c6_54 = arith.constant 6 : index
    %c3_55 = arith.constant 3 : index
    %146 = memref.load %arg3[%c6_54, %c3_55] : memref<10x5xf32, #tpu.memory_space<smem>>
    %147 = vector.extract_strided_slice %0 {offsets = [3, 0, 0, 0], sizes = [1, 1, 16, 16], strides = [1, 1, 1, 1]} : vector<4x2x16x16xf32> to vector<1x1x16x16xf32>
    %148 = vector.shape_cast %147 : vector<1x1x16x16xf32> to vector<16x16xf32>
    %149 = vector.broadcast %146 : f32 to vector<16x16xf32>
    %150 = arith.mulf %149, %148 : vector<16x16xf32>
    %151 = arith.addf %139, %150 : vector<16x16xf32>
    %c1_56 = arith.constant 1 : index
    %c4_57 = arith.constant 4 : index
    %152 = memref.load %arg3[%c1_56, %c4_57] : memref<10x5xf32, #tpu.memory_space<smem>>
    %153 = vector.broadcast %152 : f32 to vector<16x16xf32>
    %154 = arith.addf %145, %153 : vector<16x16xf32>
    %c6_58 = arith.constant 6 : index
    %c4_59 = arith.constant 4 : index
    %155 = memref.load %arg3[%c6_58, %c4_59] : memref<10x5xf32, #tpu.memory_space<smem>>
    %156 = vector.broadcast %155 : f32 to vector<16x16xf32>
    %157 = arith.addf %151, %156 : vector<16x16xf32>
    %c1_60 = arith.constant 1 : index
    %c0_61 = arith.constant 0 : index
    %158 = memref.load %arg3[%c1_60, %c0_61] : memref<10x5xf32, #tpu.memory_space<smem>>
    %159 = vector.extract_strided_slice %0 {offsets = [0, 1, 0, 0], sizes = [1, 1, 16, 16], strides = [1, 1, 1, 1]} : vector<4x2x16x16xf32> to vector<1x1x16x16xf32>
    %160 = vector.shape_cast %159 : vector<1x1x16x16xf32> to vector<16x16xf32>
    %161 = vector.broadcast %158 : f32 to vector<16x16xf32>
    %162 = arith.mulf %161, %160 : vector<16x16xf32>
    %c6_62 = arith.constant 6 : index
    %c0_63 = arith.constant 0 : index
    %163 = memref.load %arg3[%c6_62, %c0_63] : memref<10x5xf32, #tpu.memory_space<smem>>
    %164 = vector.extract_strided_slice %0 {offsets = [0, 1, 0, 0], sizes = [1, 1, 16, 16], strides = [1, 1, 1, 1]} : vector<4x2x16x16xf32> to vector<1x1x16x16xf32>
    %165 = vector.shape_cast %164 : vector<1x1x16x16xf32> to vector<16x16xf32>
    %166 = vector.broadcast %163 : f32 to vector<16x16xf32>
    %167 = arith.mulf %166, %165 : vector<16x16xf32>
    %c1_64 = arith.constant 1 : index
    %c1_65 = arith.constant 1 : index
    %168 = memref.load %arg3[%c1_64, %c1_65] : memref<10x5xf32, #tpu.memory_space<smem>>
    %169 = vector.extract_strided_slice %0 {offsets = [1, 1, 0, 0], sizes = [1, 1, 16, 16], strides = [1, 1, 1, 1]} : vector<4x2x16x16xf32> to vector<1x1x16x16xf32>
    %170 = vector.shape_cast %169 : vector<1x1x16x16xf32> to vector<16x16xf32>
    %171 = vector.broadcast %168 : f32 to vector<16x16xf32>
    %172 = arith.mulf %171, %170 : vector<16x16xf32>
    %173 = arith.addf %162, %172 : vector<16x16xf32>
    %c6_66 = arith.constant 6 : index
    %c1_67 = arith.constant 1 : index
    %174 = memref.load %arg3[%c6_66, %c1_67] : memref<10x5xf32, #tpu.memory_space<smem>>
    %175 = vector.extract_strided_slice %0 {offsets = [1, 1, 0, 0], sizes = [1, 1, 16, 16], strides = [1, 1, 1, 1]} : vector<4x2x16x16xf32> to vector<1x1x16x16xf32>
    %176 = vector.shape_cast %175 : vector<1x1x16x16xf32> to vector<16x16xf32>
    %177 = vector.broadcast %174 : f32 to vector<16x16xf32>
    %178 = arith.mulf %177, %176 : vector<16x16xf32>
    %179 = arith.addf %167, %178 : vector<16x16xf32>
    %c1_68 = arith.constant 1 : index
    %c2_69 = arith.constant 2 : index
    %180 = memref.load %arg3[%c1_68, %c2_69] : memref<10x5xf32, #tpu.memory_space<smem>>
    %181 = vector.extract_strided_slice %0 {offsets = [2, 1, 0, 0], sizes = [1, 1, 16, 16], strides = [1, 1, 1, 1]} : vector<4x2x16x16xf32> to vector<1x1x16x16xf32>
    %182 = vector.shape_cast %181 : vector<1x1x16x16xf32> to vector<16x16xf32>
    %183 = vector.broadcast %180 : f32 to vector<16x16xf32>
    %184 = arith.mulf %183, %182 : vector<16x16xf32>
    %185 = arith.addf %173, %184 : vector<16x16xf32>
    %c6_70 = arith.constant 6 : index
    %c2_71 = arith.constant 2 : index
    %186 = memref.load %arg3[%c6_70, %c2_71] : memref<10x5xf32, #tpu.memory_space<smem>>
    %187 = vector.extract_strided_slice %0 {offsets = [2, 1, 0, 0], sizes = [1, 1, 16, 16], strides = [1, 1, 1, 1]} : vector<4x2x16x16xf32> to vector<1x1x16x16xf32>
    %188 = vector.shape_cast %187 : vector<1x1x16x16xf32> to vector<16x16xf32>
    %189 = vector.broadcast %186 : f32 to vector<16x16xf32>
    %190 = arith.mulf %189, %188 : vector<16x16xf32>
    %191 = arith.addf %179, %190 : vector<16x16xf32>
    %c1_72 = arith.constant 1 : index
    %c3_73 = arith.constant 3 : index
    %192 = memref.load %arg3[%c1_72, %c3_73] : memref<10x5xf32, #tpu.memory_space<smem>>
    %193 = vector.extract_strided_slice %0 {offsets = [3, 1, 0, 0], sizes = [1, 1, 16, 16], strides = [1, 1, 1, 1]} : vector<4x2x16x16xf32> to vector<1x1x16x16xf32>
    %194 = vector.shape_cast %193 : vector<1x1x16x16xf32> to vector<16x16xf32>
    %195 = vector.broadcast %192 : f32 to vector<16x16xf32>
    %196 = arith.mulf %195, %194 : vector<16x16xf32>
    %197 = arith.addf %185, %196 : vector<16x16xf32>
    %c6_74 = arith.constant 6 : index
    %c3_75 = arith.constant 3 : index
    %198 = memref.load %arg3[%c6_74, %c3_75] : memref<10x5xf32, #tpu.memory_space<smem>>
    %199 = vector.extract_strided_slice %0 {offsets = [3, 1, 0, 0], sizes = [1, 1, 16, 16], strides = [1, 1, 1, 1]} : vector<4x2x16x16xf32> to vector<1x1x16x16xf32>
    %200 = vector.shape_cast %199 : vector<1x1x16x16xf32> to vector<16x16xf32>
    %201 = vector.broadcast %198 : f32 to vector<16x16xf32>
    %202 = arith.mulf %201, %200 : vector<16x16xf32>
    %203 = arith.addf %191, %202 : vector<16x16xf32>
    %c1_76 = arith.constant 1 : index
    %c4_77 = arith.constant 4 : index
    %204 = memref.load %arg3[%c1_76, %c4_77] : memref<10x5xf32, #tpu.memory_space<smem>>
    %205 = vector.broadcast %204 : f32 to vector<16x16xf32>
    %206 = arith.addf %197, %205 : vector<16x16xf32>
    %c6_78 = arith.constant 6 : index
    %c4_79 = arith.constant 4 : index
    %207 = memref.load %arg3[%c6_78, %c4_79] : memref<10x5xf32, #tpu.memory_space<smem>>
    %208 = vector.broadcast %207 : f32 to vector<16x16xf32>
    %209 = arith.addf %203, %208 : vector<16x16xf32>
    %c2_80 = arith.constant 2 : index
    %c0_81 = arith.constant 0 : index
    %210 = memref.load %arg3[%c2_80, %c0_81] : memref<10x5xf32, #tpu.memory_space<smem>>
    %211 = vector.extract_strided_slice %0 {offsets = [0, 0, 0, 0], sizes = [1, 1, 16, 16], strides = [1, 1, 1, 1]} : vector<4x2x16x16xf32> to vector<1x1x16x16xf32>
    %212 = vector.shape_cast %211 : vector<1x1x16x16xf32> to vector<16x16xf32>
    %213 = vector.broadcast %210 : f32 to vector<16x16xf32>
    %214 = arith.mulf %213, %212 : vector<16x16xf32>
    %c7 = arith.constant 7 : index
    %c0_82 = arith.constant 0 : index
    %215 = memref.load %arg3[%c7, %c0_82] : memref<10x5xf32, #tpu.memory_space<smem>>
    %216 = vector.extract_strided_slice %0 {offsets = [0, 0, 0, 0], sizes = [1, 1, 16, 16], strides = [1, 1, 1, 1]} : vector<4x2x16x16xf32> to vector<1x1x16x16xf32>
    %217 = vector.shape_cast %216 : vector<1x1x16x16xf32> to vector<16x16xf32>
    %218 = vector.broadcast %215 : f32 to vector<16x16xf32>
    %219 = arith.mulf %218, %217 : vector<16x16xf32>
    %c2_83 = arith.constant 2 : index
    %c1_84 = arith.constant 1 : index
    %220 = memref.load %arg3[%c2_83, %c1_84] : memref<10x5xf32, #tpu.memory_space<smem>>
    %221 = vector.extract_strided_slice %0 {offsets = [1, 0, 0, 0], sizes = [1, 1, 16, 16], strides = [1, 1, 1, 1]} : vector<4x2x16x16xf32> to vector<1x1x16x16xf32>
    %222 = vector.shape_cast %221 : vector<1x1x16x16xf32> to vector<16x16xf32>
    %223 = vector.broadcast %220 : f32 to vector<16x16xf32>
    %224 = arith.mulf %223, %222 : vector<16x16xf32>
    %225 = arith.addf %214, %224 : vector<16x16xf32>
    %c7_85 = arith.constant 7 : index
    %c1_86 = arith.constant 1 : index
    %226 = memref.load %arg3[%c7_85, %c1_86] : memref<10x5xf32, #tpu.memory_space<smem>>
    %227 = vector.extract_strided_slice %0 {offsets = [1, 0, 0, 0], sizes = [1, 1, 16, 16], strides = [1, 1, 1, 1]} : vector<4x2x16x16xf32> to vector<1x1x16x16xf32>
    %228 = vector.shape_cast %227 : vector<1x1x16x16xf32> to vector<16x16xf32>
    %229 = vector.broadcast %226 : f32 to vector<16x16xf32>
    %230 = arith.mulf %229, %228 : vector<16x16xf32>
    %231 = arith.addf %219, %230 : vector<16x16xf32>
    %c2_87 = arith.constant 2 : index
    %c2_88 = arith.constant 2 : index
    %232 = memref.load %arg3[%c2_87, %c2_88] : memref<10x5xf32, #tpu.memory_space<smem>>
    %233 = vector.extract_strided_slice %0 {offsets = [2, 0, 0, 0], sizes = [1, 1, 16, 16], strides = [1, 1, 1, 1]} : vector<4x2x16x16xf32> to vector<1x1x16x16xf32>
    %234 = vector.shape_cast %233 : vector<1x1x16x16xf32> to vector<16x16xf32>
    %235 = vector.broadcast %232 : f32 to vector<16x16xf32>
    %236 = arith.mulf %235, %234 : vector<16x16xf32>
    %237 = arith.addf %225, %236 : vector<16x16xf32>
    %c7_89 = arith.constant 7 : index
    %c2_90 = arith.constant 2 : index
    %238 = memref.load %arg3[%c7_89, %c2_90] : memref<10x5xf32, #tpu.memory_space<smem>>
    %239 = vector.extract_strided_slice %0 {offsets = [2, 0, 0, 0], sizes = [1, 1, 16, 16], strides = [1, 1, 1, 1]} : vector<4x2x16x16xf32> to vector<1x1x16x16xf32>
    %240 = vector.shape_cast %239 : vector<1x1x16x16xf32> to vector<16x16xf32>
    %241 = vector.broadcast %238 : f32 to vector<16x16xf32>
    %242 = arith.mulf %241, %240 : vector<16x16xf32>
    %243 = arith.addf %231, %242 : vector<16x16xf32>
    %c2_91 = arith.constant 2 : index
    %c3_92 = arith.constant 3 : index
    %244 = memref.load %arg3[%c2_91, %c3_92] : memref<10x5xf32, #tpu.memory_space<smem>>
    %245 = vector.extract_strided_slice %0 {offsets = [3, 0, 0, 0], sizes = [1, 1, 16, 16], strides = [1, 1, 1, 1]} : vector<4x2x16x16xf32> to vector<1x1x16x16xf32>
    %246 = vector.shape_cast %245 : vector<1x1x16x16xf32> to vector<16x16xf32>
    %247 = vector.broadcast %244 : f32 to vector<16x16xf32>
    %248 = arith.mulf %247, %246 : vector<16x16xf32>
    %249 = arith.addf %237, %248 : vector<16x16xf32>
    %c7_93 = arith.constant 7 : index
    %c3_94 = arith.constant 3 : index
    %250 = memref.load %arg3[%c7_93, %c3_94] : memref<10x5xf32, #tpu.memory_space<smem>>
    %251 = vector.extract_strided_slice %0 {offsets = [3, 0, 0, 0], sizes = [1, 1, 16, 16], strides = [1, 1, 1, 1]} : vector<4x2x16x16xf32> to vector<1x1x16x16xf32>
    %252 = vector.shape_cast %251 : vector<1x1x16x16xf32> to vector<16x16xf32>
    %253 = vector.broadcast %250 : f32 to vector<16x16xf32>
    %254 = arith.mulf %253, %252 : vector<16x16xf32>
    %255 = arith.addf %243, %254 : vector<16x16xf32>
    %c2_95 = arith.constant 2 : index
    %c4_96 = arith.constant 4 : index
    %256 = memref.load %arg3[%c2_95, %c4_96] : memref<10x5xf32, #tpu.memory_space<smem>>
    %257 = vector.broadcast %256 : f32 to vector<16x16xf32>
    %258 = arith.addf %249, %257 : vector<16x16xf32>
    %c7_97 = arith.constant 7 : index
    %c4_98 = arith.constant 4 : index
    %259 = memref.load %arg3[%c7_97, %c4_98] : memref<10x5xf32, #tpu.memory_space<smem>>
    %260 = vector.broadcast %259 : f32 to vector<16x16xf32>
    %261 = arith.addf %255, %260 : vector<16x16xf32>
    %c2_99 = arith.constant 2 : index
    %c0_100 = arith.constant 0 : index
    %262 = memref.load %arg3[%c2_99, %c0_100] : memref<10x5xf32, #tpu.memory_space<smem>>
    %263 = vector.extract_strided_slice %0 {offsets = [0, 1, 0, 0], sizes = [1, 1, 16, 16], strides = [1, 1, 1, 1]} : vector<4x2x16x16xf32> to vector<1x1x16x16xf32>
    %264 = vector.shape_cast %263 : vector<1x1x16x16xf32> to vector<16x16xf32>
    %265 = vector.broadcast %262 : f32 to vector<16x16xf32>
    %266 = arith.mulf %265, %264 : vector<16x16xf32>
    %c7_101 = arith.constant 7 : index
    %c0_102 = arith.constant 0 : index
    %267 = memref.load %arg3[%c7_101, %c0_102] : memref<10x5xf32, #tpu.memory_space<smem>>
    %268 = vector.extract_strided_slice %0 {offsets = [0, 1, 0, 0], sizes = [1, 1, 16, 16], strides = [1, 1, 1, 1]} : vector<4x2x16x16xf32> to vector<1x1x16x16xf32>
    %269 = vector.shape_cast %268 : vector<1x1x16x16xf32> to vector<16x16xf32>
    %270 = vector.broadcast %267 : f32 to vector<16x16xf32>
    %271 = arith.mulf %270, %269 : vector<16x16xf32>
    %c2_103 = arith.constant 2 : index
    %c1_104 = arith.constant 1 : index
    %272 = memref.load %arg3[%c2_103, %c1_104] : memref<10x5xf32, #tpu.memory_space<smem>>
    %273 = vector.extract_strided_slice %0 {offsets = [1, 1, 0, 0], sizes = [1, 1, 16, 16], strides = [1, 1, 1, 1]} : vector<4x2x16x16xf32> to vector<1x1x16x16xf32>
    %274 = vector.shape_cast %273 : vector<1x1x16x16xf32> to vector<16x16xf32>
    %275 = vector.broadcast %272 : f32 to vector<16x16xf32>
    %276 = arith.mulf %275, %274 : vector<16x16xf32>
    %277 = arith.addf %266, %276 : vector<16x16xf32>
    %c7_105 = arith.constant 7 : index
    %c1_106 = arith.constant 1 : index
    %278 = memref.load %arg3[%c7_105, %c1_106] : memref<10x5xf32, #tpu.memory_space<smem>>
    %279 = vector.extract_strided_slice %0 {offsets = [1, 1, 0, 0], sizes = [1, 1, 16, 16], strides = [1, 1, 1, 1]} : vector<4x2x16x16xf32> to vector<1x1x16x16xf32>
    %280 = vector.shape_cast %279 : vector<1x1x16x16xf32> to vector<16x16xf32>
    %281 = vector.broadcast %278 : f32 to vector<16x16xf32>
    %282 = arith.mulf %281, %280 : vector<16x16xf32>
    %283 = arith.addf %271, %282 : vector<16x16xf32>
    %c2_107 = arith.constant 2 : index
    %c2_108 = arith.constant 2 : index
    %284 = memref.load %arg3[%c2_107, %c2_108] : memref<10x5xf32, #tpu.memory_space<smem>>
    %285 = vector.extract_strided_slice %0 {offsets = [2, 1, 0, 0], sizes = [1, 1, 16, 16], strides = [1, 1, 1, 1]} : vector<4x2x16x16xf32> to vector<1x1x16x16xf32>
    %286 = vector.shape_cast %285 : vector<1x1x16x16xf32> to vector<16x16xf32>
    %287 = vector.broadcast %284 : f32 to vector<16x16xf32>
    %288 = arith.mulf %287, %286 : vector<16x16xf32>
    %289 = arith.addf %277, %288 : vector<16x16xf32>
    %c7_109 = arith.constant 7 : index
    %c2_110 = arith.constant 2 : index
    %290 = memref.load %arg3[%c7_109, %c2_110] : memref<10x5xf32, #tpu.memory_space<smem>>
    %291 = vector.extract_strided_slice %0 {offsets = [2, 1, 0, 0], sizes = [1, 1, 16, 16], strides = [1, 1, 1, 1]} : vector<4x2x16x16xf32> to vector<1x1x16x16xf32>
    %292 = vector.shape_cast %291 : vector<1x1x16x16xf32> to vector<16x16xf32>
    %293 = vector.broadcast %290 : f32 to vector<16x16xf32>
    %294 = arith.mulf %293, %292 : vector<16x16xf32>
    %295 = arith.addf %283, %294 : vector<16x16xf32>
    %c2_111 = arith.constant 2 : index
    %c3_112 = arith.constant 3 : index
    %296 = memref.load %arg3[%c2_111, %c3_112] : memref<10x5xf32, #tpu.memory_space<smem>>
    %297 = vector.extract_strided_slice %0 {offsets = [3, 1, 0, 0], sizes = [1, 1, 16, 16], strides = [1, 1, 1, 1]} : vector<4x2x16x16xf32> to vector<1x1x16x16xf32>
    %298 = vector.shape_cast %297 : vector<1x1x16x16xf32> to vector<16x16xf32>
    %299 = vector.broadcast %296 : f32 to vector<16x16xf32>
    %300 = arith.mulf %299, %298 : vector<16x16xf32>
    %301 = arith.addf %289, %300 : vector<16x16xf32>
    %c7_113 = arith.constant 7 : index
    %c3_114 = arith.constant 3 : index
    %302 = memref.load %arg3[%c7_113, %c3_114] : memref<10x5xf32, #tpu.memory_space<smem>>
    %303 = vector.extract_strided_slice %0 {offsets = [3, 1, 0, 0], sizes = [1, 1, 16, 16], strides = [1, 1, 1, 1]} : vector<4x2x16x16xf32> to vector<1x1x16x16xf32>
    %304 = vector.shape_cast %303 : vector<1x1x16x16xf32> to vector<16x16xf32>
    %305 = vector.broadcast %302 : f32 to vector<16x16xf32>
    %306 = arith.mulf %305, %304 : vector<16x16xf32>
    %307 = arith.addf %295, %306 : vector<16x16xf32>
    %c2_115 = arith.constant 2 : index
    %c4_116 = arith.constant 4 : index
    %308 = memref.load %arg3[%c2_115, %c4_116] : memref<10x5xf32, #tpu.memory_space<smem>>
    %309 = vector.broadcast %308 : f32 to vector<16x16xf32>
    %310 = arith.addf %301, %309 : vector<16x16xf32>
    %c7_117 = arith.constant 7 : index
    %c4_118 = arith.constant 4 : index
    %311 = memref.load %arg3[%c7_117, %c4_118] : memref<10x5xf32, #tpu.memory_space<smem>>
    %312 = vector.broadcast %311 : f32 to vector<16x16xf32>
    %313 = arith.addf %307, %312 : vector<16x16xf32>
    %c3_119 = arith.constant 3 : index
    %c0_120 = arith.constant 0 : index
    %314 = memref.load %arg3[%c3_119, %c0_120] : memref<10x5xf32, #tpu.memory_space<smem>>
    %315 = vector.extract_strided_slice %0 {offsets = [0, 0, 0, 0], sizes = [1, 1, 16, 16], strides = [1, 1, 1, 1]} : vector<4x2x16x16xf32> to vector<1x1x16x16xf32>
    %316 = vector.shape_cast %315 : vector<1x1x16x16xf32> to vector<16x16xf32>
    %317 = vector.broadcast %314 : f32 to vector<16x16xf32>
    %318 = arith.mulf %317, %316 : vector<16x16xf32>
    %c8 = arith.constant 8 : index
    %c0_121 = arith.constant 0 : index
    %319 = memref.load %arg3[%c8, %c0_121] : memref<10x5xf32, #tpu.memory_space<smem>>
    %320 = vector.extract_strided_slice %0 {offsets = [0, 0, 0, 0], sizes = [1, 1, 16, 16], strides = [1, 1, 1, 1]} : vector<4x2x16x16xf32> to vector<1x1x16x16xf32>
    %321 = vector.shape_cast %320 : vector<1x1x16x16xf32> to vector<16x16xf32>
    %322 = vector.broadcast %319 : f32 to vector<16x16xf32>
    %323 = arith.mulf %322, %321 : vector<16x16xf32>
    %c3_122 = arith.constant 3 : index
    %c1_123 = arith.constant 1 : index
    %324 = memref.load %arg3[%c3_122, %c1_123] : memref<10x5xf32, #tpu.memory_space<smem>>
    %325 = vector.extract_strided_slice %0 {offsets = [1, 0, 0, 0], sizes = [1, 1, 16, 16], strides = [1, 1, 1, 1]} : vector<4x2x16x16xf32> to vector<1x1x16x16xf32>
    %326 = vector.shape_cast %325 : vector<1x1x16x16xf32> to vector<16x16xf32>
    %327 = vector.broadcast %324 : f32 to vector<16x16xf32>
    %328 = arith.mulf %327, %326 : vector<16x16xf32>
    %329 = arith.addf %318, %328 : vector<16x16xf32>
    %c8_124 = arith.constant 8 : index
    %c1_125 = arith.constant 1 : index
    %330 = memref.load %arg3[%c8_124, %c1_125] : memref<10x5xf32, #tpu.memory_space<smem>>
    %331 = vector.extract_strided_slice %0 {offsets = [1, 0, 0, 0], sizes = [1, 1, 16, 16], strides = [1, 1, 1, 1]} : vector<4x2x16x16xf32> to vector<1x1x16x16xf32>
    %332 = vector.shape_cast %331 : vector<1x1x16x16xf32> to vector<16x16xf32>
    %333 = vector.broadcast %330 : f32 to vector<16x16xf32>
    %334 = arith.mulf %333, %332 : vector<16x16xf32>
    %335 = arith.addf %323, %334 : vector<16x16xf32>
    %c3_126 = arith.constant 3 : index
    %c2_127 = arith.constant 2 : index
    %336 = memref.load %arg3[%c3_126, %c2_127] : memref<10x5xf32, #tpu.memory_space<smem>>
    %337 = vector.extract_strided_slice %0 {offsets = [2, 0, 0, 0], sizes = [1, 1, 16, 16], strides = [1, 1, 1, 1]} : vector<4x2x16x16xf32> to vector<1x1x16x16xf32>
    %338 = vector.shape_cast %337 : vector<1x1x16x16xf32> to vector<16x16xf32>
    %339 = vector.broadcast %336 : f32 to vector<16x16xf32>
    %340 = arith.mulf %339, %338 : vector<16x16xf32>
    %341 = arith.addf %329, %340 : vector<16x16xf32>
    %c8_128 = arith.constant 8 : index
    %c2_129 = arith.constant 2 : index
    %342 = memref.load %arg3[%c8_128, %c2_129] : memref<10x5xf32, #tpu.memory_space<smem>>
    %343 = vector.extract_strided_slice %0 {offsets = [2, 0, 0, 0], sizes = [1, 1, 16, 16], strides = [1, 1, 1, 1]} : vector<4x2x16x16xf32> to vector<1x1x16x16xf32>
    %344 = vector.shape_cast %343 : vector<1x1x16x16xf32> to vector<16x16xf32>
    %345 = vector.broadcast %342 : f32 to vector<16x16xf32>
    %346 = arith.mulf %345, %344 : vector<16x16xf32>
    %347 = arith.addf %335, %346 : vector<16x16xf32>
    %c3_130 = arith.constant 3 : index
    %c3_131 = arith.constant 3 : index
    %348 = memref.load %arg3[%c3_130, %c3_131] : memref<10x5xf32, #tpu.memory_space<smem>>
    %349 = vector.extract_strided_slice %0 {offsets = [3, 0, 0, 0], sizes = [1, 1, 16, 16], strides = [1, 1, 1, 1]} : vector<4x2x16x16xf32> to vector<1x1x16x16xf32>
    %350 = vector.shape_cast %349 : vector<1x1x16x16xf32> to vector<16x16xf32>
    %351 = vector.broadcast %348 : f32 to vector<16x16xf32>
    %352 = arith.mulf %351, %350 : vector<16x16xf32>
    %353 = arith.addf %341, %352 : vector<16x16xf32>
    %c8_132 = arith.constant 8 : index
    %c3_133 = arith.constant 3 : index
    %354 = memref.load %arg3[%c8_132, %c3_133] : memref<10x5xf32, #tpu.memory_space<smem>>
    %355 = vector.extract_strided_slice %0 {offsets = [3, 0, 0, 0], sizes = [1, 1, 16, 16], strides = [1, 1, 1, 1]} : vector<4x2x16x16xf32> to vector<1x1x16x16xf32>
    %356 = vector.shape_cast %355 : vector<1x1x16x16xf32> to vector<16x16xf32>
    %357 = vector.broadcast %354 : f32 to vector<16x16xf32>
    %358 = arith.mulf %357, %356 : vector<16x16xf32>
    %359 = arith.addf %347, %358 : vector<16x16xf32>
    %c3_134 = arith.constant 3 : index
    %c4_135 = arith.constant 4 : index
    %360 = memref.load %arg3[%c3_134, %c4_135] : memref<10x5xf32, #tpu.memory_space<smem>>
    %361 = vector.broadcast %360 : f32 to vector<16x16xf32>
    %362 = arith.addf %353, %361 : vector<16x16xf32>
    %c8_136 = arith.constant 8 : index
    %c4_137 = arith.constant 4 : index
    %363 = memref.load %arg3[%c8_136, %c4_137] : memref<10x5xf32, #tpu.memory_space<smem>>
    %364 = vector.broadcast %363 : f32 to vector<16x16xf32>
    %365 = arith.addf %359, %364 : vector<16x16xf32>
    %c3_138 = arith.constant 3 : index
    %c0_139 = arith.constant 0 : index
    %366 = memref.load %arg3[%c3_138, %c0_139] : memref<10x5xf32, #tpu.memory_space<smem>>
    %367 = vector.extract_strided_slice %0 {offsets = [0, 1, 0, 0], sizes = [1, 1, 16, 16], strides = [1, 1, 1, 1]} : vector<4x2x16x16xf32> to vector<1x1x16x16xf32>
    %368 = vector.shape_cast %367 : vector<1x1x16x16xf32> to vector<16x16xf32>
    %369 = vector.broadcast %366 : f32 to vector<16x16xf32>
    %370 = arith.mulf %369, %368 : vector<16x16xf32>
    %c8_140 = arith.constant 8 : index
    %c0_141 = arith.constant 0 : index
    %371 = memref.load %arg3[%c8_140, %c0_141] : memref<10x5xf32, #tpu.memory_space<smem>>
    %372 = vector.extract_strided_slice %0 {offsets = [0, 1, 0, 0], sizes = [1, 1, 16, 16], strides = [1, 1, 1, 1]} : vector<4x2x16x16xf32> to vector<1x1x16x16xf32>
    %373 = vector.shape_cast %372 : vector<1x1x16x16xf32> to vector<16x16xf32>
    %374 = vector.broadcast %371 : f32 to vector<16x16xf32>
    %375 = arith.mulf %374, %373 : vector<16x16xf32>
    %c3_142 = arith.constant 3 : index
    %c1_143 = arith.constant 1 : index
    %376 = memref.load %arg3[%c3_142, %c1_143] : memref<10x5xf32, #tpu.memory_space<smem>>
    %377 = vector.extract_strided_slice %0 {offsets = [1, 1, 0, 0], sizes = [1, 1, 16, 16], strides = [1, 1, 1, 1]} : vector<4x2x16x16xf32> to vector<1x1x16x16xf32>
    %378 = vector.shape_cast %377 : vector<1x1x16x16xf32> to vector<16x16xf32>
    %379 = vector.broadcast %376 : f32 to vector<16x16xf32>
    %380 = arith.mulf %379, %378 : vector<16x16xf32>
    %381 = arith.addf %370, %380 : vector<16x16xf32>
    %c8_144 = arith.constant 8 : index
    %c1_145 = arith.constant 1 : index
    %382 = memref.load %arg3[%c8_144, %c1_145] : memref<10x5xf32, #tpu.memory_space<smem>>
    %383 = vector.extract_strided_slice %0 {offsets = [1, 1, 0, 0], sizes = [1, 1, 16, 16], strides = [1, 1, 1, 1]} : vector<4x2x16x16xf32> to vector<1x1x16x16xf32>
    %384 = vector.shape_cast %383 : vector<1x1x16x16xf32> to vector<16x16xf32>
    %385 = vector.broadcast %382 : f32 to vector<16x16xf32>
    %386 = arith.mulf %385, %384 : vector<16x16xf32>
    %387 = arith.addf %375, %386 : vector<16x16xf32>
    %c3_146 = arith.constant 3 : index
    %c2_147 = arith.constant 2 : index
    %388 = memref.load %arg3[%c3_146, %c2_147] : memref<10x5xf32, #tpu.memory_space<smem>>
    %389 = vector.extract_strided_slice %0 {offsets = [2, 1, 0, 0], sizes = [1, 1, 16, 16], strides = [1, 1, 1, 1]} : vector<4x2x16x16xf32> to vector<1x1x16x16xf32>
    %390 = vector.shape_cast %389 : vector<1x1x16x16xf32> to vector<16x16xf32>
    %391 = vector.broadcast %388 : f32 to vector<16x16xf32>
    %392 = arith.mulf %391, %390 : vector<16x16xf32>
    %393 = arith.addf %381, %392 : vector<16x16xf32>
    %c8_148 = arith.constant 8 : index
    %c2_149 = arith.constant 2 : index
    %394 = memref.load %arg3[%c8_148, %c2_149] : memref<10x5xf32, #tpu.memory_space<smem>>
    %395 = vector.extract_strided_slice %0 {offsets = [2, 1, 0, 0], sizes = [1, 1, 16, 16], strides = [1, 1, 1, 1]} : vector<4x2x16x16xf32> to vector<1x1x16x16xf32>
    %396 = vector.shape_cast %395 : vector<1x1x16x16xf32> to vector<16x16xf32>
    %397 = vector.broadcast %394 : f32 to vector<16x16xf32>
    %398 = arith.mulf %397, %396 : vector<16x16xf32>
    %399 = arith.addf %387, %398 : vector<16x16xf32>
    %c3_150 = arith.constant 3 : index
    %c3_151 = arith.constant 3 : index
    %400 = memref.load %arg3[%c3_150, %c3_151] : memref<10x5xf32, #tpu.memory_space<smem>>
    %401 = vector.extract_strided_slice %0 {offsets = [3, 1, 0, 0], sizes = [1, 1, 16, 16], strides = [1, 1, 1, 1]} : vector<4x2x16x16xf32> to vector<1x1x16x16xf32>
    %402 = vector.shape_cast %401 : vector<1x1x16x16xf32> to vector<16x16xf32>
    %403 = vector.broadcast %400 : f32 to vector<16x16xf32>
    %404 = arith.mulf %403, %402 : vector<16x16xf32>
    %405 = arith.addf %393, %404 : vector<16x16xf32>
    %c8_152 = arith.constant 8 : index
    %c3_153 = arith.constant 3 : index
    %406 = memref.load %arg3[%c8_152, %c3_153] : memref<10x5xf32, #tpu.memory_space<smem>>
    %407 = vector.extract_strided_slice %0 {offsets = [3, 1, 0, 0], sizes = [1, 1, 16, 16], strides = [1, 1, 1, 1]} : vector<4x2x16x16xf32> to vector<1x1x16x16xf32>
    %408 = vector.shape_cast %407 : vector<1x1x16x16xf32> to vector<16x16xf32>
    %409 = vector.broadcast %406 : f32 to vector<16x16xf32>
    %410 = arith.mulf %409, %408 : vector<16x16xf32>
    %411 = arith.addf %399, %410 : vector<16x16xf32>
    %c3_154 = arith.constant 3 : index
    %c4_155 = arith.constant 4 : index
    %412 = memref.load %arg3[%c3_154, %c4_155] : memref<10x5xf32, #tpu.memory_space<smem>>
    %413 = vector.broadcast %412 : f32 to vector<16x16xf32>
    %414 = arith.addf %405, %413 : vector<16x16xf32>
    %c8_156 = arith.constant 8 : index
    %c4_157 = arith.constant 4 : index
    %415 = memref.load %arg3[%c8_156, %c4_157] : memref<10x5xf32, #tpu.memory_space<smem>>
    %416 = vector.broadcast %415 : f32 to vector<16x16xf32>
    %417 = arith.addf %411, %416 : vector<16x16xf32>
    %c4_158 = arith.constant 4 : index
    %c0_159 = arith.constant 0 : index
    %418 = memref.load %arg3[%c4_158, %c0_159] : memref<10x5xf32, #tpu.memory_space<smem>>
    %419 = vector.extract_strided_slice %0 {offsets = [0, 0, 0, 0], sizes = [1, 1, 16, 16], strides = [1, 1, 1, 1]} : vector<4x2x16x16xf32> to vector<1x1x16x16xf32>
    %420 = vector.shape_cast %419 : vector<1x1x16x16xf32> to vector<16x16xf32>
    %421 = vector.broadcast %418 : f32 to vector<16x16xf32>
    %422 = arith.mulf %421, %420 : vector<16x16xf32>
    %c9 = arith.constant 9 : index
    %c0_160 = arith.constant 0 : index
    %423 = memref.load %arg3[%c9, %c0_160] : memref<10x5xf32, #tpu.memory_space<smem>>
    %424 = vector.extract_strided_slice %0 {offsets = [0, 0, 0, 0], sizes = [1, 1, 16, 16], strides = [1, 1, 1, 1]} : vector<4x2x16x16xf32> to vector<1x1x16x16xf32>
    %425 = vector.shape_cast %424 : vector<1x1x16x16xf32> to vector<16x16xf32>
    %426 = vector.broadcast %423 : f32 to vector<16x16xf32>
    %427 = arith.mulf %426, %425 : vector<16x16xf32>
    %c4_161 = arith.constant 4 : index
    %c1_162 = arith.constant 1 : index
    %428 = memref.load %arg3[%c4_161, %c1_162] : memref<10x5xf32, #tpu.memory_space<smem>>
    %429 = vector.extract_strided_slice %0 {offsets = [1, 0, 0, 0], sizes = [1, 1, 16, 16], strides = [1, 1, 1, 1]} : vector<4x2x16x16xf32> to vector<1x1x16x16xf32>
    %430 = vector.shape_cast %429 : vector<1x1x16x16xf32> to vector<16x16xf32>
    %431 = vector.broadcast %428 : f32 to vector<16x16xf32>
    %432 = arith.mulf %431, %430 : vector<16x16xf32>
    %433 = arith.addf %422, %432 : vector<16x16xf32>
    %c9_163 = arith.constant 9 : index
    %c1_164 = arith.constant 1 : index
    %434 = memref.load %arg3[%c9_163, %c1_164] : memref<10x5xf32, #tpu.memory_space<smem>>
    %435 = vector.extract_strided_slice %0 {offsets = [1, 0, 0, 0], sizes = [1, 1, 16, 16], strides = [1, 1, 1, 1]} : vector<4x2x16x16xf32> to vector<1x1x16x16xf32>
    %436 = vector.shape_cast %435 : vector<1x1x16x16xf32> to vector<16x16xf32>
    %437 = vector.broadcast %434 : f32 to vector<16x16xf32>
    %438 = arith.mulf %437, %436 : vector<16x16xf32>
    %439 = arith.addf %427, %438 : vector<16x16xf32>
    %c4_165 = arith.constant 4 : index
    %c2_166 = arith.constant 2 : index
    %440 = memref.load %arg3[%c4_165, %c2_166] : memref<10x5xf32, #tpu.memory_space<smem>>
    %441 = vector.extract_strided_slice %0 {offsets = [2, 0, 0, 0], sizes = [1, 1, 16, 16], strides = [1, 1, 1, 1]} : vector<4x2x16x16xf32> to vector<1x1x16x16xf32>
    %442 = vector.shape_cast %441 : vector<1x1x16x16xf32> to vector<16x16xf32>
    %443 = vector.broadcast %440 : f32 to vector<16x16xf32>
    %444 = arith.mulf %443, %442 : vector<16x16xf32>
    %445 = arith.addf %433, %444 : vector<16x16xf32>
    %c9_167 = arith.constant 9 : index
    %c2_168 = arith.constant 2 : index
    %446 = memref.load %arg3[%c9_167, %c2_168] : memref<10x5xf32, #tpu.memory_space<smem>>
    %447 = vector.extract_strided_slice %0 {offsets = [2, 0, 0, 0], sizes = [1, 1, 16, 16], strides = [1, 1, 1, 1]} : vector<4x2x16x16xf32> to vector<1x1x16x16xf32>
    %448 = vector.shape_cast %447 : vector<1x1x16x16xf32> to vector<16x16xf32>
    %449 = vector.broadcast %446 : f32 to vector<16x16xf32>
    %450 = arith.mulf %449, %448 : vector<16x16xf32>
    %451 = arith.addf %439, %450 : vector<16x16xf32>
    %c4_169 = arith.constant 4 : index
    %c3_170 = arith.constant 3 : index
    %452 = memref.load %arg3[%c4_169, %c3_170] : memref<10x5xf32, #tpu.memory_space<smem>>
    %453 = vector.extract_strided_slice %0 {offsets = [3, 0, 0, 0], sizes = [1, 1, 16, 16], strides = [1, 1, 1, 1]} : vector<4x2x16x16xf32> to vector<1x1x16x16xf32>
    %454 = vector.shape_cast %453 : vector<1x1x16x16xf32> to vector<16x16xf32>
    %455 = vector.broadcast %452 : f32 to vector<16x16xf32>
    %456 = arith.mulf %455, %454 : vector<16x16xf32>
    %457 = arith.addf %445, %456 : vector<16x16xf32>
    %c9_171 = arith.constant 9 : index
    %c3_172 = arith.constant 3 : index
    %458 = memref.load %arg3[%c9_171, %c3_172] : memref<10x5xf32, #tpu.memory_space<smem>>
    %459 = vector.extract_strided_slice %0 {offsets = [3, 0, 0, 0], sizes = [1, 1, 16, 16], strides = [1, 1, 1, 1]} : vector<4x2x16x16xf32> to vector<1x1x16x16xf32>
    %460 = vector.shape_cast %459 : vector<1x1x16x16xf32> to vector<16x16xf32>
    %461 = vector.broadcast %458 : f32 to vector<16x16xf32>
    %462 = arith.mulf %461, %460 : vector<16x16xf32>
    %463 = arith.addf %451, %462 : vector<16x16xf32>
    %c4_173 = arith.constant 4 : index
    %c4_174 = arith.constant 4 : index
    %464 = memref.load %arg3[%c4_173, %c4_174] : memref<10x5xf32, #tpu.memory_space<smem>>
    %465 = vector.broadcast %464 : f32 to vector<16x16xf32>
    %466 = arith.addf %457, %465 : vector<16x16xf32>
    %c9_175 = arith.constant 9 : index
    %c4_176 = arith.constant 4 : index
    %467 = memref.load %arg3[%c9_175, %c4_176] : memref<10x5xf32, #tpu.memory_space<smem>>
    %468 = vector.broadcast %467 : f32 to vector<16x16xf32>
    %469 = arith.addf %463, %468 : vector<16x16xf32>
    %c4_177 = arith.constant 4 : index
    %c0_178 = arith.constant 0 : index
    %470 = memref.load %arg3[%c4_177, %c0_178] : memref<10x5xf32, #tpu.memory_space<smem>>
    %471 = vector.extract_strided_slice %0 {offsets = [0, 1, 0, 0], sizes = [1, 1, 16, 16], strides = [1, 1, 1, 1]} : vector<4x2x16x16xf32> to vector<1x1x16x16xf32>
    %472 = vector.shape_cast %471 : vector<1x1x16x16xf32> to vector<16x16xf32>
    %473 = vector.broadcast %470 : f32 to vector<16x16xf32>
    %474 = arith.mulf %473, %472 : vector<16x16xf32>
    %c9_179 = arith.constant 9 : index
    %c0_180 = arith.constant 0 : index
    %475 = memref.load %arg3[%c9_179, %c0_180] : memref<10x5xf32, #tpu.memory_space<smem>>
    %476 = vector.extract_strided_slice %0 {offsets = [0, 1, 0, 0], sizes = [1, 1, 16, 16], strides = [1, 1, 1, 1]} : vector<4x2x16x16xf32> to vector<1x1x16x16xf32>
    %477 = vector.shape_cast %476 : vector<1x1x16x16xf32> to vector<16x16xf32>
    %478 = vector.broadcast %475 : f32 to vector<16x16xf32>
    %479 = arith.mulf %478, %477 : vector<16x16xf32>
    %c4_181 = arith.constant 4 : index
    %c1_182 = arith.constant 1 : index
    %480 = memref.load %arg3[%c4_181, %c1_182] : memref<10x5xf32, #tpu.memory_space<smem>>
    %481 = vector.extract_strided_slice %0 {offsets = [1, 1, 0, 0], sizes = [1, 1, 16, 16], strides = [1, 1, 1, 1]} : vector<4x2x16x16xf32> to vector<1x1x16x16xf32>
    %482 = vector.shape_cast %481 : vector<1x1x16x16xf32> to vector<16x16xf32>
    %483 = vector.broadcast %480 : f32 to vector<16x16xf32>
    %484 = arith.mulf %483, %482 : vector<16x16xf32>
    %485 = arith.addf %474, %484 : vector<16x16xf32>
    %c9_183 = arith.constant 9 : index
    %c1_184 = arith.constant 1 : index
    %486 = memref.load %arg3[%c9_183, %c1_184] : memref<10x5xf32, #tpu.memory_space<smem>>
    %487 = vector.extract_strided_slice %0 {offsets = [1, 1, 0, 0], sizes = [1, 1, 16, 16], strides = [1, 1, 1, 1]} : vector<4x2x16x16xf32> to vector<1x1x16x16xf32>
    %488 = vector.shape_cast %487 : vector<1x1x16x16xf32> to vector<16x16xf32>
    %489 = vector.broadcast %486 : f32 to vector<16x16xf32>
    %490 = arith.mulf %489, %488 : vector<16x16xf32>
    %491 = arith.addf %479, %490 : vector<16x16xf32>
    %c4_185 = arith.constant 4 : index
    %c2_186 = arith.constant 2 : index
    %492 = memref.load %arg3[%c4_185, %c2_186] : memref<10x5xf32, #tpu.memory_space<smem>>
    %493 = vector.extract_strided_slice %0 {offsets = [2, 1, 0, 0], sizes = [1, 1, 16, 16], strides = [1, 1, 1, 1]} : vector<4x2x16x16xf32> to vector<1x1x16x16xf32>
    %494 = vector.shape_cast %493 : vector<1x1x16x16xf32> to vector<16x16xf32>
    %495 = vector.broadcast %492 : f32 to vector<16x16xf32>
    %496 = arith.mulf %495, %494 : vector<16x16xf32>
    %497 = arith.addf %485, %496 : vector<16x16xf32>
    %c9_187 = arith.constant 9 : index
    %c2_188 = arith.constant 2 : index
    %498 = memref.load %arg3[%c9_187, %c2_188] : memref<10x5xf32, #tpu.memory_space<smem>>
    %499 = vector.extract_strided_slice %0 {offsets = [2, 1, 0, 0], sizes = [1, 1, 16, 16], strides = [1, 1, 1, 1]} : vector<4x2x16x16xf32> to vector<1x1x16x16xf32>
    %500 = vector.shape_cast %499 : vector<1x1x16x16xf32> to vector<16x16xf32>
    %501 = vector.broadcast %498 : f32 to vector<16x16xf32>
    %502 = arith.mulf %501, %500 : vector<16x16xf32>
    %503 = arith.addf %491, %502 : vector<16x16xf32>
    %c4_189 = arith.constant 4 : index
    %c3_190 = arith.constant 3 : index
    %504 = memref.load %arg3[%c4_189, %c3_190] : memref<10x5xf32, #tpu.memory_space<smem>>
    %505 = vector.extract_strided_slice %0 {offsets = [3, 1, 0, 0], sizes = [1, 1, 16, 16], strides = [1, 1, 1, 1]} : vector<4x2x16x16xf32> to vector<1x1x16x16xf32>
    %506 = vector.shape_cast %505 : vector<1x1x16x16xf32> to vector<16x16xf32>
    %507 = vector.broadcast %504 : f32 to vector<16x16xf32>
    %508 = arith.mulf %507, %506 : vector<16x16xf32>
    %509 = arith.addf %497, %508 : vector<16x16xf32>
    %c9_191 = arith.constant 9 : index
    %c3_192 = arith.constant 3 : index
    %510 = memref.load %arg3[%c9_191, %c3_192] : memref<10x5xf32, #tpu.memory_space<smem>>
    %511 = vector.extract_strided_slice %0 {offsets = [3, 1, 0, 0], sizes = [1, 1, 16, 16], strides = [1, 1, 1, 1]} : vector<4x2x16x16xf32> to vector<1x1x16x16xf32>
    %512 = vector.shape_cast %511 : vector<1x1x16x16xf32> to vector<16x16xf32>
    %513 = vector.broadcast %510 : f32 to vector<16x16xf32>
    %514 = arith.mulf %513, %512 : vector<16x16xf32>
    %515 = arith.addf %503, %514 : vector<16x16xf32>
    %c4_193 = arith.constant 4 : index
    %c4_194 = arith.constant 4 : index
    %516 = memref.load %arg3[%c4_193, %c4_194] : memref<10x5xf32, #tpu.memory_space<smem>>
    %517 = vector.broadcast %516 : f32 to vector<16x16xf32>
    %518 = arith.addf %509, %517 : vector<16x16xf32>
    %c9_195 = arith.constant 9 : index
    %c4_196 = arith.constant 4 : index
    %519 = memref.load %arg3[%c9_195, %c4_196] : memref<10x5xf32, #tpu.memory_space<smem>>
    %520 = vector.broadcast %519 : f32 to vector<16x16xf32>
    %521 = arith.addf %515, %520 : vector<16x16xf32>
    %522 = vector.shape_cast %50 : vector<16x16xf32> to vector<1x16x16xf32>
    %523 = vector.shape_cast %102 : vector<16x16xf32> to vector<1x16x16xf32>
    %524 = vector.shape_cast %154 : vector<16x16xf32> to vector<1x16x16xf32>
    %525 = vector.shape_cast %206 : vector<16x16xf32> to vector<1x16x16xf32>
    %526 = vector.shape_cast %258 : vector<16x16xf32> to vector<1x16x16xf32>
    %527 = vector.shape_cast %310 : vector<16x16xf32> to vector<1x16x16xf32>
    %528 = vector.shape_cast %362 : vector<16x16xf32> to vector<1x16x16xf32>
    %529 = vector.shape_cast %414 : vector<16x16xf32> to vector<1x16x16xf32>
    %530 = vector.shape_cast %466 : vector<16x16xf32> to vector<1x16x16xf32>
    %531 = vector.shape_cast %518 : vector<16x16xf32> to vector<1x16x16xf32>
    %532 = tpu.concatenate %522, %523, %524, %525, %526, %527, %528, %529, %530, %531 in 0 : vector<1x16x16xf32>, vector<1x16x16xf32>, vector<1x16x16xf32>, vector<1x16x16xf32>, vector<1x16x16xf32>, vector<1x16x16xf32>, vector<1x16x16xf32>, vector<1x16x16xf32>, vector<1x16x16xf32>, vector<1x16x16xf32> -> vector<10x16x16xf32>
    %533 = vector.shape_cast %53 : vector<16x16xf32> to vector<1x16x16xf32>
    %534 = vector.shape_cast %105 : vector<16x16xf32> to vector<1x16x16xf32>
    %535 = vector.shape_cast %157 : vector<16x16xf32> to vector<1x16x16xf32>
    %536 = vector.shape_cast %209 : vector<16x16xf32> to vector<1x16x16xf32>
    %537 = vector.shape_cast %261 : vector<16x16xf32> to vector<1x16x16xf32>
    %538 = vector.shape_cast %313 : vector<16x16xf32> to vector<1x16x16xf32>
    %539 = vector.shape_cast %365 : vector<16x16xf32> to vector<1x16x16xf32>
    %540 = vector.shape_cast %417 : vector<16x16xf32> to vector<1x16x16xf32>
    %541 = vector.shape_cast %469 : vector<16x16xf32> to vector<1x16x16xf32>
    %542 = vector.shape_cast %521 : vector<16x16xf32> to vector<1x16x16xf32>
    %543 = tpu.concatenate %533, %534, %535, %536, %537, %538, %539, %540, %541, %542 in 0 : vector<1x16x16xf32>, vector<1x16x16xf32>, vector<1x16x16xf32>, vector<1x16x16xf32>, vector<1x16x16xf32>, vector<1x16x16xf32>, vector<1x16x16xf32>, vector<1x16x16xf32>, vector<1x16x16xf32>, vector<1x16x16xf32> -> vector<10x16x16xf32>
    %c0_197 = arith.constant 0 : index
    %c0_198 = arith.constant 0 : index
    %c0_199 = arith.constant 0 : index
    %544 = vector.load %arg13[%c0_197, %c0_198, %c0_199] : memref<10x16x16xf32, #tpu.memory_space<vmem>>, vector<10x16x16xf32>
    tpu.vector_store %arg13[%c0_197, %c0_198, %c0_199], %532 {strides = array<i32>} : memref<10x16x16xf32, #tpu.memory_space<vmem>>, vector<10x16x16xf32>,
    %c0_200 = arith.constant 0 : index
    %c0_201 = arith.constant 0 : index
    %c0_202 = arith.constant 0 : index
    %545 = vector.load %arg14[%c0_200, %c0_201, %c0_202] : memref<10x16x16xf32, #tpu.memory_space<vmem>>, vector<10x16x16xf32>
    tpu.vector_store %arg14[%c0_200, %c0_201, %c0_202], %543 {strides = array<i32>} : memref<10x16x16xf32, #tpu.memory_space<vmem>>, vector<10x16x16xf32>,
    %546 = arith.subf %532, %543 : vector<10x16x16xf32>
    %547 = arith.mulf %546, %546 : vector<10x16x16xf32>
    %cst = arith.constant dense<0.000000e+00> : vector<10x16xf32>
    %548 = vector.multi_reduction <add>, %547, %cst [2] : vector<10x16x16xf32> to vector<10x16xf32>
    %549 = vector.shape_cast %548 : vector<10x16xf32> to vector<10x16x1xf32>
    %cst_203 = arith.constant dense<0.000000e+00> : vector<10x1xf32>
    %550 = vector.multi_reduction <add>, %549, %cst_203 [1] : vector<10x16x1xf32> to vector<10x1xf32>
    %551 = vector.shape_cast %550 : vector<10x1xf32> to vector<10x1x1xf32>
    %cst_204 = arith.constant dense<0.000000e+00> : vector<1x1xf32>
    %552 = vector.multi_reduction <add>, %551, %cst_204 [0] : vector<10x1x1xf32> to vector<1x1xf32>
    %553 = vector.shape_cast %552 : vector<1x1xf32> to vector<1x1x1xf32>
    %cst_205 = arith.constant 2.560000e+03 : f32
    %554 = vector.broadcast %cst_205 : f32 to vector<1x1x1xf32>
    %555 = arith.divf %553, %554 : vector<1x1x1xf32>
    %c0_206 = arith.constant 0 : index
    %c0_207 = arith.constant 0 : index
    %c0_208 = arith.constant 0 : index
    %556 = vector.load %arg2[%c0_206, %c0_207, %c0_208] : memref<2x16x16xf32, #tpu.memory_space<vmem>>, vector<2x16x16xf32>
    %cst_209 = arith.constant dense<0.000000e+00> : vector<2x16xf32>
    %557 = vector.multi_reduction <add>, %556, %cst_209 [2] : vector<2x16x16xf32> to vector<2x16xf32>
    %558 = vector.shape_cast %557 : vector<2x16xf32> to vector<2x16x1xf32>
    %cst_210 = arith.constant dense<0.000000e+00> : vector<2x1xf32>
    %559 = vector.multi_reduction <add>, %558, %cst_210 [1] : vector<2x16x1xf32> to vector<2x1xf32>
    %560 = vector.shape_cast %559 : vector<2x1xf32> to vector<2x1x1xf32>
    %cst_211 = arith.constant dense<0.000000e+00> : vector<1x1xf32>
    %561 = vector.multi_reduction <add>, %560, %cst_211 [0] : vector<2x1x1xf32> to vector<1x1xf32>
    %562 = vector.shape_cast %561 : vector<1x1xf32> to vector<1x1x1xf32>
    %cst_212 = arith.constant 5.120000e+02 : f32
    %563 = vector.broadcast %cst_212 : f32 to vector<1x1x1xf32>
    %564 = arith.divf %562, %563 : vector<1x1x1xf32>
    %565 = arith.mulf %555, %564 : vector<1x1x1xf32>
    %c0_213 = arith.constant 0 : index
    %c0_214 = arith.constant 0 : index
    %c0_215 = arith.constant 0 : index
    %566 = vector.load %arg12[%c0_213, %c0_214, %c0_215] : memref<1x1x1xf32, #tpu.memory_space<vmem>>, vector<1x1x1xf32>
    tpu.vector_store %arg12[%c0_213, %c0_214, %c0_215], %565 {strides = array<i32>} : memref<1x1x1xf32, #tpu.memory_space<vmem>>, vector<1x1x1xf32>,
    %c0_216 = arith.constant 0 : index
    %c0_217 = arith.constant 0 : index
    %c0_218 = arith.constant 0 : index
    %567 = vector.load %arg4[%c0_216, %c0_217, %c0_218] : memref<8x16x8xbf16, #tpu.memory_space<vmem>>, vector<8x16x8xbf16>
    %c0_219 = arith.constant 0 : index
    %c0_220 = arith.constant 0 : index
    %c0_221 = arith.constant 0 : index
    %568 = vector.load %arg5[%c0_219, %c0_220, %c0_221] : memref<8x8x16xbf16, #tpu.memory_space<vmem>>, vector<8x8x16xbf16>
    %c0_222 = arith.constant 0 : index
    %c0_223 = arith.constant 0 : index
    %c0_224 = arith.constant 0 : index
    %569 = vector.load %arg6[%c0_222, %c0_223, %c0_224] : memref<10x8x16xbf16, #tpu.memory_space<vmem>>, vector<10x8x16xbf16>
    %c0_225 = arith.constant 0 : index
    %c0_226 = arith.constant 0 : index
    %c0_227 = arith.constant 0 : index
    %570 = vector.load %arg7[%c0_225, %c0_226, %c0_227] : memref<10x16x8xbf16, #tpu.memory_space<vmem>>, vector<10x16x8xbf16>
    "tpu.trace_start"() <{level = 10 : i32, message = "bhw,bws->bhs"}> : () -> ()
    %cst_228 = arith.constant dense<0.000000e+00> : vector<8x16x8xf32>
    %571 = tpu.matmul %1, %567, %cst_228 {dimension_numbers = #tpu.dot_dimension_numbers<[2], [1], [1], [2], [0, 0, 0, 1, 1, 2], [0], [0]>} : vector<8x16x16xbf16>, vector<8x16x8xbf16>, vector<8x16x8xf32> -> vector<8x16x8xf32>
    "tpu.trace_stop"() : () -> ()
    %572 = arith.truncf %571 : vector<8x16x8xf32> to vector<8x16x8xbf16>
    "tpu.trace_start"() <{level = 10 : i32, message = "bgh,bhs->bgs"}> : () -> ()
    %cst_229 = arith.constant dense<0.000000e+00> : vector<8x8x8xf32>
    %573 = tpu.matmul %568, %572, %cst_229 {dimension_numbers = #tpu.dot_dimension_numbers<[2], [1], [1], [2], [0, 0, 0, 1, 1, 2], [0], [0]>} : vector<8x8x16xbf16>, vector<8x16x8xbf16>, vector<8x8x8xf32> -> vector<8x8x8xf32>
    "tpu.trace_stop"() : () -> ()
    %c0_230 = arith.constant 0 : index
    %c0_231 = arith.constant 0 : index
    %574 = memref.load %arg3[%c0_230, %c0_231] : memref<10x5xf32, #tpu.memory_space<smem>>
    %575 = vector.extract_strided_slice %573 {offsets = [0, 0, 0], sizes = [1, 8, 8], strides = [1, 1, 1]} : vector<8x8x8xf32> to vector<1x8x8xf32>
    %576 = vector.shape_cast %575 : vector<1x8x8xf32> to vector<8x8xf32>
    %577 = vector.broadcast %574 : f32 to vector<8x8xf32>
    %578 = arith.mulf %577, %576 : vector<8x8xf32>
    %c0_232 = arith.constant 0 : index
    %c1_233 = arith.constant 1 : index
    %579 = memref.load %arg3[%c0_232, %c1_233] : memref<10x5xf32, #tpu.memory_space<smem>>
    %580 = vector.extract_strided_slice %573 {offsets = [2, 0, 0], sizes = [1, 8, 8], strides = [1, 1, 1]} : vector<8x8x8xf32> to vector<1x8x8xf32>
    %581 = vector.shape_cast %580 : vector<1x8x8xf32> to vector<8x8xf32>
    %582 = vector.broadcast %579 : f32 to vector<8x8xf32>
    %583 = arith.mulf %582, %581 : vector<8x8xf32>
    %584 = arith.addf %578, %583 : vector<8x8xf32>
    %c0_234 = arith.constant 0 : index
    %c2_235 = arith.constant 2 : index
    %585 = memref.load %arg3[%c0_234, %c2_235] : memref<10x5xf32, #tpu.memory_space<smem>>
    %586 = vector.extract_strided_slice %573 {offsets = [4, 0, 0], sizes = [1, 8, 8], strides = [1, 1, 1]} : vector<8x8x8xf32> to vector<1x8x8xf32>
    %587 = vector.shape_cast %586 : vector<1x8x8xf32> to vector<8x8xf32>
    %588 = vector.broadcast %585 : f32 to vector<8x8xf32>
    %589 = arith.mulf %588, %587 : vector<8x8xf32>
    %590 = arith.addf %584, %589 : vector<8x8xf32>
    %c0_236 = arith.constant 0 : index
    %c3_237 = arith.constant 3 : index
    %591 = memref.load %arg3[%c0_236, %c3_237] : memref<10x5xf32, #tpu.memory_space<smem>>
    %592 = vector.extract_strided_slice %573 {offsets = [6, 0, 0], sizes = [1, 8, 8], strides = [1, 1, 1]} : vector<8x8x8xf32> to vector<1x8x8xf32>
    %593 = vector.shape_cast %592 : vector<1x8x8xf32> to vector<8x8xf32>
    %594 = vector.broadcast %591 : f32 to vector<8x8xf32>
    %595 = arith.mulf %594, %593 : vector<8x8xf32>
    %596 = arith.addf %590, %595 : vector<8x8xf32>
    %c0_238 = arith.constant 0 : index
    %c4_239 = arith.constant 4 : index
    %597 = memref.load %arg3[%c0_238, %c4_239] : memref<10x5xf32, #tpu.memory_space<smem>>
    %598 = vector.broadcast %597 : f32 to vector<8x8xf32>
    %599 = arith.addf %596, %598 : vector<8x8xf32>
    %c0_240 = arith.constant 0 : index
    %c0_241 = arith.constant 0 : index
    %600 = memref.load %arg3[%c0_240, %c0_241] : memref<10x5xf32, #tpu.memory_space<smem>>
    %601 = vector.extract_strided_slice %573 {offsets = [1, 0, 0], sizes = [1, 8, 8], strides = [1, 1, 1]} : vector<8x8x8xf32> to vector<1x8x8xf32>
    %602 = vector.shape_cast %601 : vector<1x8x8xf32> to vector<8x8xf32>
    %603 = vector.broadcast %600 : f32 to vector<8x8xf32>
    %604 = arith.mulf %603, %602 : vector<8x8xf32>
    %c0_242 = arith.constant 0 : index
    %c1_243 = arith.constant 1 : index
    %605 = memref.load %arg3[%c0_242, %c1_243] : memref<10x5xf32, #tpu.memory_space<smem>>
    %606 = vector.extract_strided_slice %573 {offsets = [3, 0, 0], sizes = [1, 8, 8], strides = [1, 1, 1]} : vector<8x8x8xf32> to vector<1x8x8xf32>
    %607 = vector.shape_cast %606 : vector<1x8x8xf32> to vector<8x8xf32>
    %608 = vector.broadcast %605 : f32 to vector<8x8xf32>
    %609 = arith.mulf %608, %607 : vector<8x8xf32>
    %610 = arith.addf %604, %609 : vector<8x8xf32>
    %c0_244 = arith.constant 0 : index
    %c2_245 = arith.constant 2 : index
    %611 = memref.load %arg3[%c0_244, %c2_245] : memref<10x5xf32, #tpu.memory_space<smem>>
    %612 = vector.extract_strided_slice %573 {offsets = [5, 0, 0], sizes = [1, 8, 8], strides = [1, 1, 1]} : vector<8x8x8xf32> to vector<1x8x8xf32>
    %613 = vector.shape_cast %612 : vector<1x8x8xf32> to vector<8x8xf32>
    %614 = vector.broadcast %611 : f32 to vector<8x8xf32>
    %615 = arith.mulf %614, %613 : vector<8x8xf32>
    %616 = arith.addf %610, %615 : vector<8x8xf32>
    %c0_246 = arith.constant 0 : index
    %c3_247 = arith.constant 3 : index
    %617 = memref.load %arg3[%c0_246, %c3_247] : memref<10x5xf32, #tpu.memory_space<smem>>
    %618 = vector.extract_strided_slice %573 {offsets = [7, 0, 0], sizes = [1, 8, 8], strides = [1, 1, 1]} : vector<8x8x8xf32> to vector<1x8x8xf32>
    %619 = vector.shape_cast %618 : vector<1x8x8xf32> to vector<8x8xf32>
    %620 = vector.broadcast %617 : f32 to vector<8x8xf32>
    %621 = arith.mulf %620, %619 : vector<8x8xf32>
    %622 = arith.addf %616, %621 : vector<8x8xf32>
    %c0_248 = arith.constant 0 : index
    %c4_249 = arith.constant 4 : index
    %623 = memref.load %arg3[%c0_248, %c4_249] : memref<10x5xf32, #tpu.memory_space<smem>>
    %624 = vector.broadcast %623 : f32 to vector<8x8xf32>
    %625 = arith.addf %622, %624 : vector<8x8xf32>
    %c1_250 = arith.constant 1 : index
    %c0_251 = arith.constant 0 : index
    %626 = memref.load %arg3[%c1_250, %c0_251] : memref<10x5xf32, #tpu.memory_space<smem>>
    %627 = vector.extract_strided_slice %573 {offsets = [0, 0, 0], sizes = [1, 8, 8], strides = [1, 1, 1]} : vector<8x8x8xf32> to vector<1x8x8xf32>
    %628 = vector.shape_cast %627 : vector<1x8x8xf32> to vector<8x8xf32>
    %629 = vector.broadcast %626 : f32 to vector<8x8xf32>
    %630 = arith.mulf %629, %628 : vector<8x8xf32>
    %c1_252 = arith.constant 1 : index
    %c1_253 = arith.constant 1 : index
    %631 = memref.load %arg3[%c1_252, %c1_253] : memref<10x5xf32, #tpu.memory_space<smem>>
    %632 = vector.extract_strided_slice %573 {offsets = [2, 0, 0], sizes = [1, 8, 8], strides = [1, 1, 1]} : vector<8x8x8xf32> to vector<1x8x8xf32>
    %633 = vector.shape_cast %632 : vector<1x8x8xf32> to vector<8x8xf32>
    %634 = vector.broadcast %631 : f32 to vector<8x8xf32>
    %635 = arith.mulf %634, %633 : vector<8x8xf32>
    %636 = arith.addf %630, %635 : vector<8x8xf32>
    %c1_254 = arith.constant 1 : index
    %c2_255 = arith.constant 2 : index
    %637 = memref.load %arg3[%c1_254, %c2_255] : memref<10x5xf32, #tpu.memory_space<smem>>
    %638 = vector.extract_strided_slice %573 {offsets = [4, 0, 0], sizes = [1, 8, 8], strides = [1, 1, 1]} : vector<8x8x8xf32> to vector<1x8x8xf32>
    %639 = vector.shape_cast %638 : vector<1x8x8xf32> to vector<8x8xf32>
    %640 = vector.broadcast %637 : f32 to vector<8x8xf32>
    %641 = arith.mulf %640, %639 : vector<8x8xf32>
    %642 = arith.addf %636, %641 : vector<8x8xf32>
    %c1_256 = arith.constant 1 : index
    %c3_257 = arith.constant 3 : index
    %643 = memref.load %arg3[%c1_256, %c3_257] : memref<10x5xf32, #tpu.memory_space<smem>>
    %644 = vector.extract_strided_slice %573 {offsets = [6, 0, 0], sizes = [1, 8, 8], strides = [1, 1, 1]} : vector<8x8x8xf32> to vector<1x8x8xf32>
    %645 = vector.shape_cast %644 : vector<1x8x8xf32> to vector<8x8xf32>
    %646 = vector.broadcast %643 : f32 to vector<8x8xf32>
    %647 = arith.mulf %646, %645 : vector<8x8xf32>
    %648 = arith.addf %642, %647 : vector<8x8xf32>
    %c1_258 = arith.constant 1 : index
    %c4_259 = arith.constant 4 : index
    %649 = memref.load %arg3[%c1_258, %c4_259] : memref<10x5xf32, #tpu.memory_space<smem>>
    %650 = vector.broadcast %649 : f32 to vector<8x8xf32>
    %651 = arith.addf %648, %650 : vector<8x8xf32>
    %c1_260 = arith.constant 1 : index
    %c0_261 = arith.constant 0 : index
    %652 = memref.load %arg3[%c1_260, %c0_261] : memref<10x5xf32, #tpu.memory_space<smem>>
    %653 = vector.extract_strided_slice %573 {offsets = [1, 0, 0], sizes = [1, 8, 8], strides = [1, 1, 1]} : vector<8x8x8xf32> to vector<1x8x8xf32>
    %654 = vector.shape_cast %653 : vector<1x8x8xf32> to vector<8x8xf32>
    %655 = vector.broadcast %652 : f32 to vector<8x8xf32>
    %656 = arith.mulf %655, %654 : vector<8x8xf32>
    %c1_262 = arith.constant 1 : index
    %c1_263 = arith.constant 1 : index
    %657 = memref.load %arg3[%c1_262, %c1_263] : memref<10x5xf32, #tpu.memory_space<smem>>
    %658 = vector.extract_strided_slice %573 {offsets = [3, 0, 0], sizes = [1, 8, 8], strides = [1, 1, 1]} : vector<8x8x8xf32> to vector<1x8x8xf32>
    %659 = vector.shape_cast %658 : vector<1x8x8xf32> to vector<8x8xf32>
    %660 = vector.broadcast %657 : f32 to vector<8x8xf32>
    %661 = arith.mulf %660, %659 : vector<8x8xf32>
    %662 = arith.addf %656, %661 : vector<8x8xf32>
    %c1_264 = arith.constant 1 : index
    %c2_265 = arith.constant 2 : index
    %663 = memref.load %arg3[%c1_264, %c2_265] : memref<10x5xf32, #tpu.memory_space<smem>>
    %664 = vector.extract_strided_slice %573 {offsets = [5, 0, 0], sizes = [1, 8, 8], strides = [1, 1, 1]} : vector<8x8x8xf32> to vector<1x8x8xf32>
    %665 = vector.shape_cast %664 : vector<1x8x8xf32> to vector<8x8xf32>
    %666 = vector.broadcast %663 : f32 to vector<8x8xf32>
    %667 = arith.mulf %666, %665 : vector<8x8xf32>
    %668 = arith.addf %662, %667 : vector<8x8xf32>
    %c1_266 = arith.constant 1 : index
    %c3_267 = arith.constant 3 : index
    %669 = memref.load %arg3[%c1_266, %c3_267] : memref<10x5xf32, #tpu.memory_space<smem>>
    %670 = vector.extract_strided_slice %573 {offsets = [7, 0, 0], sizes = [1, 8, 8], strides = [1, 1, 1]} : vector<8x8x8xf32> to vector<1x8x8xf32>
    %671 = vector.shape_cast %670 : vector<1x8x8xf32> to vector<8x8xf32>
    %672 = vector.broadcast %669 : f32 to vector<8x8xf32>
    %673 = arith.mulf %672, %671 : vector<8x8xf32>
    %674 = arith.addf %668, %673 : vector<8x8xf32>
    %c1_268 = arith.constant 1 : index
    %c4_269 = arith.constant 4 : index
    %675 = memref.load %arg3[%c1_268, %c4_269] : memref<10x5xf32, #tpu.memory_space<smem>>
    %676 = vector.broadcast %675 : f32 to vector<8x8xf32>
    %677 = arith.addf %674, %676 : vector<8x8xf32>
    %c2_270 = arith.constant 2 : index
    %c0_271 = arith.constant 0 : index
    %678 = memref.load %arg3[%c2_270, %c0_271] : memref<10x5xf32, #tpu.memory_space<smem>>
    %679 = vector.extract_strided_slice %573 {offsets = [0, 0, 0], sizes = [1, 8, 8], strides = [1, 1, 1]} : vector<8x8x8xf32> to vector<1x8x8xf32>
    %680 = vector.shape_cast %679 : vector<1x8x8xf32> to vector<8x8xf32>
    %681 = vector.broadcast %678 : f32 to vector<8x8xf32>
    %682 = arith.mulf %681, %680 : vector<8x8xf32>
    %c2_272 = arith.constant 2 : index
    %c1_273 = arith.constant 1 : index
    %683 = memref.load %arg3[%c2_272, %c1_273] : memref<10x5xf32, #tpu.memory_space<smem>>
    %684 = vector.extract_strided_slice %573 {offsets = [2, 0, 0], sizes = [1, 8, 8], strides = [1, 1, 1]} : vector<8x8x8xf32> to vector<1x8x8xf32>
    %685 = vector.shape_cast %684 : vector<1x8x8xf32> to vector<8x8xf32>
    %686 = vector.broadcast %683 : f32 to vector<8x8xf32>
    %687 = arith.mulf %686, %685 : vector<8x8xf32>
    %688 = arith.addf %682, %687 : vector<8x8xf32>
    %c2_274 = arith.constant 2 : index
    %c2_275 = arith.constant 2 : index
    %689 = memref.load %arg3[%c2_274, %c2_275] : memref<10x5xf32, #tpu.memory_space<smem>>
    %690 = vector.extract_strided_slice %573 {offsets = [4, 0, 0], sizes = [1, 8, 8], strides = [1, 1, 1]} : vector<8x8x8xf32> to vector<1x8x8xf32>
    %691 = vector.shape_cast %690 : vector<1x8x8xf32> to vector<8x8xf32>
    %692 = vector.broadcast %689 : f32 to vector<8x8xf32>
    %693 = arith.mulf %692, %691 : vector<8x8xf32>
    %694 = arith.addf %688, %693 : vector<8x8xf32>
    %c2_276 = arith.constant 2 : index
    %c3_277 = arith.constant 3 : index
    %695 = memref.load %arg3[%c2_276, %c3_277] : memref<10x5xf32, #tpu.memory_space<smem>>
    %696 = vector.extract_strided_slice %573 {offsets = [6, 0, 0], sizes = [1, 8, 8], strides = [1, 1, 1]} : vector<8x8x8xf32> to vector<1x8x8xf32>
    %697 = vector.shape_cast %696 : vector<1x8x8xf32> to vector<8x8xf32>
    %698 = vector.broadcast %695 : f32 to vector<8x8xf32>
    %699 = arith.mulf %698, %697 : vector<8x8xf32>
    %700 = arith.addf %694, %699 : vector<8x8xf32>
    %c2_278 = arith.constant 2 : index
    %c4_279 = arith.constant 4 : index
    %701 = memref.load %arg3[%c2_278, %c4_279] : memref<10x5xf32, #tpu.memory_space<smem>>
    %702 = vector.broadcast %701 : f32 to vector<8x8xf32>
    %703 = arith.addf %700, %702 : vector<8x8xf32>
    %c2_280 = arith.constant 2 : index
    %c0_281 = arith.constant 0 : index
    %704 = memref.load %arg3[%c2_280, %c0_281] : memref<10x5xf32, #tpu.memory_space<smem>>
    %705 = vector.extract_strided_slice %573 {offsets = [1, 0, 0], sizes = [1, 8, 8], strides = [1, 1, 1]} : vector<8x8x8xf32> to vector<1x8x8xf32>
    %706 = vector.shape_cast %705 : vector<1x8x8xf32> to vector<8x8xf32>
    %707 = vector.broadcast %704 : f32 to vector<8x8xf32>
    %708 = arith.mulf %707, %706 : vector<8x8xf32>
    %c2_282 = arith.constant 2 : index
    %c1_283 = arith.constant 1 : index
    %709 = memref.load %arg3[%c2_282, %c1_283] : memref<10x5xf32, #tpu.memory_space<smem>>
    %710 = vector.extract_strided_slice %573 {offsets = [3, 0, 0], sizes = [1, 8, 8], strides = [1, 1, 1]} : vector<8x8x8xf32> to vector<1x8x8xf32>
    %711 = vector.shape_cast %710 : vector<1x8x8xf32> to vector<8x8xf32>
    %712 = vector.broadcast %709 : f32 to vector<8x8xf32>
    %713 = arith.mulf %712, %711 : vector<8x8xf32>
    %714 = arith.addf %708, %713 : vector<8x8xf32>
    %c2_284 = arith.constant 2 : index
    %c2_285 = arith.constant 2 : index
    %715 = memref.load %arg3[%c2_284, %c2_285] : memref<10x5xf32, #tpu.memory_space<smem>>
    %716 = vector.extract_strided_slice %573 {offsets = [5, 0, 0], sizes = [1, 8, 8], strides = [1, 1, 1]} : vector<8x8x8xf32> to vector<1x8x8xf32>
    %717 = vector.shape_cast %716 : vector<1x8x8xf32> to vector<8x8xf32>
    %718 = vector.broadcast %715 : f32 to vector<8x8xf32>
    %719 = arith.mulf %718, %717 : vector<8x8xf32>
    %720 = arith.addf %714, %719 : vector<8x8xf32>
    %c2_286 = arith.constant 2 : index
    %c3_287 = arith.constant 3 : index
    %721 = memref.load %arg3[%c2_286, %c3_287] : memref<10x5xf32, #tpu.memory_space<smem>>
    %722 = vector.extract_strided_slice %573 {offsets = [7, 0, 0], sizes = [1, 8, 8], strides = [1, 1, 1]} : vector<8x8x8xf32> to vector<1x8x8xf32>
    %723 = vector.shape_cast %722 : vector<1x8x8xf32> to vector<8x8xf32>
    %724 = vector.broadcast %721 : f32 to vector<8x8xf32>
    %725 = arith.mulf %724, %723 : vector<8x8xf32>
    %726 = arith.addf %720, %725 : vector<8x8xf32>
    %c2_288 = arith.constant 2 : index
    %c4_289 = arith.constant 4 : index
    %727 = memref.load %arg3[%c2_288, %c4_289] : memref<10x5xf32, #tpu.memory_space<smem>>
    %728 = vector.broadcast %727 : f32 to vector<8x8xf32>
    %729 = arith.addf %726, %728 : vector<8x8xf32>
    %c3_290 = arith.constant 3 : index
    %c0_291 = arith.constant 0 : index
    %730 = memref.load %arg3[%c3_290, %c0_291] : memref<10x5xf32, #tpu.memory_space<smem>>
    %731 = vector.extract_strided_slice %573 {offsets = [0, 0, 0], sizes = [1, 8, 8], strides = [1, 1, 1]} : vector<8x8x8xf32> to vector<1x8x8xf32>
    %732 = vector.shape_cast %731 : vector<1x8x8xf32> to vector<8x8xf32>
    %733 = vector.broadcast %730 : f32 to vector<8x8xf32>
    %734 = arith.mulf %733, %732 : vector<8x8xf32>
    %c3_292 = arith.constant 3 : index
    %c1_293 = arith.constant 1 : index
    %735 = memref.load %arg3[%c3_292, %c1_293] : memref<10x5xf32, #tpu.memory_space<smem>>
    %736 = vector.extract_strided_slice %573 {offsets = [2, 0, 0], sizes = [1, 8, 8], strides = [1, 1, 1]} : vector<8x8x8xf32> to vector<1x8x8xf32>
    %737 = vector.shape_cast %736 : vector<1x8x8xf32> to vector<8x8xf32>
    %738 = vector.broadcast %735 : f32 to vector<8x8xf32>
    %739 = arith.mulf %738, %737 : vector<8x8xf32>
    %740 = arith.addf %734, %739 : vector<8x8xf32>
    %c3_294 = arith.constant 3 : index
    %c2_295 = arith.constant 2 : index
    %741 = memref.load %arg3[%c3_294, %c2_295] : memref<10x5xf32, #tpu.memory_space<smem>>
    %742 = vector.extract_strided_slice %573 {offsets = [4, 0, 0], sizes = [1, 8, 8], strides = [1, 1, 1]} : vector<8x8x8xf32> to vector<1x8x8xf32>
    %743 = vector.shape_cast %742 : vector<1x8x8xf32> to vector<8x8xf32>
    %744 = vector.broadcast %741 : f32 to vector<8x8xf32>
    %745 = arith.mulf %744, %743 : vector<8x8xf32>
    %746 = arith.addf %740, %745 : vector<8x8xf32>
    %c3_296 = arith.constant 3 : index
    %c3_297 = arith.constant 3 : index
    %747 = memref.load %arg3[%c3_296, %c3_297] : memref<10x5xf32, #tpu.memory_space<smem>>
    %748 = vector.extract_strided_slice %573 {offsets = [6, 0, 0], sizes = [1, 8, 8], strides = [1, 1, 1]} : vector<8x8x8xf32> to vector<1x8x8xf32>
    %749 = vector.shape_cast %748 : vector<1x8x8xf32> to vector<8x8xf32>
    %750 = vector.broadcast %747 : f32 to vector<8x8xf32>
    %751 = arith.mulf %750, %749 : vector<8x8xf32>
    %752 = arith.addf %746, %751 : vector<8x8xf32>
    %c3_298 = arith.constant 3 : index
    %c4_299 = arith.constant 4 : index
    %753 = memref.load %arg3[%c3_298, %c4_299] : memref<10x5xf32, #tpu.memory_space<smem>>
    %754 = vector.broadcast %753 : f32 to vector<8x8xf32>
    %755 = arith.addf %752, %754 : vector<8x8xf32>
    %c3_300 = arith.constant 3 : index
    %c0_301 = arith.constant 0 : index
    %756 = memref.load %arg3[%c3_300, %c0_301] : memref<10x5xf32, #tpu.memory_space<smem>>
    %757 = vector.extract_strided_slice %573 {offsets = [1, 0, 0], sizes = [1, 8, 8], strides = [1, 1, 1]} : vector<8x8x8xf32> to vector<1x8x8xf32>
    %758 = vector.shape_cast %757 : vector<1x8x8xf32> to vector<8x8xf32>
    %759 = vector.broadcast %756 : f32 to vector<8x8xf32>
    %760 = arith.mulf %759, %758 : vector<8x8xf32>
    %c3_302 = arith.constant 3 : index
    %c1_303 = arith.constant 1 : index
    %761 = memref.load %arg3[%c3_302, %c1_303] : memref<10x5xf32, #tpu.memory_space<smem>>
    %762 = vector.extract_strided_slice %573 {offsets = [3, 0, 0], sizes = [1, 8, 8], strides = [1, 1, 1]} : vector<8x8x8xf32> to vector<1x8x8xf32>
    %763 = vector.shape_cast %762 : vector<1x8x8xf32> to vector<8x8xf32>
    %764 = vector.broadcast %761 : f32 to vector<8x8xf32>
    %765 = arith.mulf %764, %763 : vector<8x8xf32>
    %766 = arith.addf %760, %765 : vector<8x8xf32>
    %c3_304 = arith.constant 3 : index
    %c2_305 = arith.constant 2 : index
    %767 = memref.load %arg3[%c3_304, %c2_305] : memref<10x5xf32, #tpu.memory_space<smem>>
    %768 = vector.extract_strided_slice %573 {offsets = [5, 0, 0], sizes = [1, 8, 8], strides = [1, 1, 1]} : vector<8x8x8xf32> to vector<1x8x8xf32>
    %769 = vector.shape_cast %768 : vector<1x8x8xf32> to vector<8x8xf32>
    %770 = vector.broadcast %767 : f32 to vector<8x8xf32>
    %771 = arith.mulf %770, %769 : vector<8x8xf32>
    %772 = arith.addf %766, %771 : vector<8x8xf32>
    %c3_306 = arith.constant 3 : index
    %c3_307 = arith.constant 3 : index
    %773 = memref.load %arg3[%c3_306, %c3_307] : memref<10x5xf32, #tpu.memory_space<smem>>
    %774 = vector.extract_strided_slice %573 {offsets = [7, 0, 0], sizes = [1, 8, 8], strides = [1, 1, 1]} : vector<8x8x8xf32> to vector<1x8x8xf32>
    %775 = vector.shape_cast %774 : vector<1x8x8xf32> to vector<8x8xf32>
    %776 = vector.broadcast %773 : f32 to vector<8x8xf32>
    %777 = arith.mulf %776, %775 : vector<8x8xf32>
    %778 = arith.addf %772, %777 : vector<8x8xf32>
    %c3_308 = arith.constant 3 : index
    %c4_309 = arith.constant 4 : index
    %779 = memref.load %arg3[%c3_308, %c4_309] : memref<10x5xf32, #tpu.memory_space<smem>>
    %780 = vector.broadcast %779 : f32 to vector<8x8xf32>
    %781 = arith.addf %778, %780 : vector<8x8xf32>
    %c4_310 = arith.constant 4 : index
    %c0_311 = arith.constant 0 : index
    %782 = memref.load %arg3[%c4_310, %c0_311] : memref<10x5xf32, #tpu.memory_space<smem>>
    %783 = vector.extract_strided_slice %573 {offsets = [0, 0, 0], sizes = [1, 8, 8], strides = [1, 1, 1]} : vector<8x8x8xf32> to vector<1x8x8xf32>
    %784 = vector.shape_cast %783 : vector<1x8x8xf32> to vector<8x8xf32>
    %785 = vector.broadcast %782 : f32 to vector<8x8xf32>
    %786 = arith.mulf %785, %784 : vector<8x8xf32>
    %c4_312 = arith.constant 4 : index
    %c1_313 = arith.constant 1 : index
    %787 = memref.load %arg3[%c4_312, %c1_313] : memref<10x5xf32, #tpu.memory_space<smem>>
    %788 = vector.extract_strided_slice %573 {offsets = [2, 0, 0], sizes = [1, 8, 8], strides = [1, 1, 1]} : vector<8x8x8xf32> to vector<1x8x8xf32>
    %789 = vector.shape_cast %788 : vector<1x8x8xf32> to vector<8x8xf32>
    %790 = vector.broadcast %787 : f32 to vector<8x8xf32>
    %791 = arith.mulf %790, %789 : vector<8x8xf32>
    %792 = arith.addf %786, %791 : vector<8x8xf32>
    %c4_314 = arith.constant 4 : index
    %c2_315 = arith.constant 2 : index
    %793 = memref.load %arg3[%c4_314, %c2_315] : memref<10x5xf32, #tpu.memory_space<smem>>
    %794 = vector.extract_strided_slice %573 {offsets = [4, 0, 0], sizes = [1, 8, 8], strides = [1, 1, 1]} : vector<8x8x8xf32> to vector<1x8x8xf32>
    %795 = vector.shape_cast %794 : vector<1x8x8xf32> to vector<8x8xf32>
    %796 = vector.broadcast %793 : f32 to vector<8x8xf32>
    %797 = arith.mulf %796, %795 : vector<8x8xf32>
    %798 = arith.addf %792, %797 : vector<8x8xf32>
    %c4_316 = arith.constant 4 : index
    %c3_317 = arith.constant 3 : index
    %799 = memref.load %arg3[%c4_316, %c3_317] : memref<10x5xf32, #tpu.memory_space<smem>>
    %800 = vector.extract_strided_slice %573 {offsets = [6, 0, 0], sizes = [1, 8, 8], strides = [1, 1, 1]} : vector<8x8x8xf32> to vector<1x8x8xf32>
    %801 = vector.shape_cast %800 : vector<1x8x8xf32> to vector<8x8xf32>
    %802 = vector.broadcast %799 : f32 to vector<8x8xf32>
    %803 = arith.mulf %802, %801 : vector<8x8xf32>
    %804 = arith.addf %798, %803 : vector<8x8xf32>
    %c4_318 = arith.constant 4 : index
    %c4_319 = arith.constant 4 : index
    %805 = memref.load %arg3[%c4_318, %c4_319] : memref<10x5xf32, #tpu.memory_space<smem>>
    %806 = vector.broadcast %805 : f32 to vector<8x8xf32>
    %807 = arith.addf %804, %806 : vector<8x8xf32>
    %c4_320 = arith.constant 4 : index
    %c0_321 = arith.constant 0 : index
    %808 = memref.load %arg3[%c4_320, %c0_321] : memref<10x5xf32, #tpu.memory_space<smem>>
    %809 = vector.extract_strided_slice %573 {offsets = [1, 0, 0], sizes = [1, 8, 8], strides = [1, 1, 1]} : vector<8x8x8xf32> to vector<1x8x8xf32>
    %810 = vector.shape_cast %809 : vector<1x8x8xf32> to vector<8x8xf32>
    %811 = vector.broadcast %808 : f32 to vector<8x8xf32>
    %812 = arith.mulf %811, %810 : vector<8x8xf32>
    %c4_322 = arith.constant 4 : index
    %c1_323 = arith.constant 1 : index
    %813 = memref.load %arg3[%c4_322, %c1_323] : memref<10x5xf32, #tpu.memory_space<smem>>
    %814 = vector.extract_strided_slice %573 {offsets = [3, 0, 0], sizes = [1, 8, 8], strides = [1, 1, 1]} : vector<8x8x8xf32> to vector<1x8x8xf32>
    %815 = vector.shape_cast %814 : vector<1x8x8xf32> to vector<8x8xf32>
    %816 = vector.broadcast %813 : f32 to vector<8x8xf32>
    %817 = arith.mulf %816, %815 : vector<8x8xf32>
    %818 = arith.addf %812, %817 : vector<8x8xf32>
    %c4_324 = arith.constant 4 : index
    %c2_325 = arith.constant 2 : index
    %819 = memref.load %arg3[%c4_324, %c2_325] : memref<10x5xf32, #tpu.memory_space<smem>>
    %820 = vector.extract_strided_slice %573 {offsets = [5, 0, 0], sizes = [1, 8, 8], strides = [1, 1, 1]} : vector<8x8x8xf32> to vector<1x8x8xf32>
    %821 = vector.shape_cast %820 : vector<1x8x8xf32> to vector<8x8xf32>
    %822 = vector.broadcast %819 : f32 to vector<8x8xf32>
    %823 = arith.mulf %822, %821 : vector<8x8xf32>
    %824 = arith.addf %818, %823 : vector<8x8xf32>
    %c4_326 = arith.constant 4 : index
    %c3_327 = arith.constant 3 : index
    %825 = memref.load %arg3[%c4_326, %c3_327] : memref<10x5xf32, #tpu.memory_space<smem>>
    %826 = vector.extract_strided_slice %573 {offsets = [7, 0, 0], sizes = [1, 8, 8], strides = [1, 1, 1]} : vector<8x8x8xf32> to vector<1x8x8xf32>
    %827 = vector.shape_cast %826 : vector<1x8x8xf32> to vector<8x8xf32>
    %828 = vector.broadcast %825 : f32 to vector<8x8xf32>
    %829 = arith.mulf %828, %827 : vector<8x8xf32>
    %830 = arith.addf %824, %829 : vector<8x8xf32>
    %c4_328 = arith.constant 4 : index
    %c4_329 = arith.constant 4 : index
    %831 = memref.load %arg3[%c4_328, %c4_329] : memref<10x5xf32, #tpu.memory_space<smem>>
    %832 = vector.broadcast %831 : f32 to vector<8x8xf32>
    %833 = arith.addf %830, %832 : vector<8x8xf32>
    %834 = vector.shape_cast %599 : vector<8x8xf32> to vector<1x8x8xf32>
    %835 = vector.shape_cast %625 : vector<8x8xf32> to vector<1x8x8xf32>
    %836 = vector.shape_cast %651 : vector<8x8xf32> to vector<1x8x8xf32>
    %837 = vector.shape_cast %677 : vector<8x8xf32> to vector<1x8x8xf32>
    %838 = vector.shape_cast %703 : vector<8x8xf32> to vector<1x8x8xf32>
    %839 = vector.shape_cast %729 : vector<8x8xf32> to vector<1x8x8xf32>
    %840 = vector.shape_cast %755 : vector<8x8xf32> to vector<1x8x8xf32>
    %841 = vector.shape_cast %781 : vector<8x8xf32> to vector<1x8x8xf32>
    %842 = vector.shape_cast %807 : vector<8x8xf32> to vector<1x8x8xf32>
    %843 = vector.shape_cast %833 : vector<8x8xf32> to vector<1x8x8xf32>
    %844 = tpu.concatenate %834, %835, %836, %837, %838, %839, %840, %841, %842, %843 in 0 : vector<1x8x8xf32>, vector<1x8x8xf32>, vector<1x8x8xf32>, vector<1x8x8xf32>, vector<1x8x8xf32>, vector<1x8x8xf32>, vector<1x8x8xf32>, vector<1x8x8xf32>, vector<1x8x8xf32>, vector<1x8x8xf32> -> vector<10x8x8xf32>
    %845 = arith.truncf %844 : vector<10x8x8xf32> to vector<10x8x8xbf16>
    "tpu.trace_start"() <{level = 10 : i32, message = "bgs,bsw->bgw"}> : () -> ()
    %cst_330 = arith.constant dense<0.000000e+00> : vector<10x8x16xf32>
    %846 = tpu.matmul %845, %569, %cst_330 {dimension_numbers = #tpu.dot_dimension_numbers<[2], [1], [1], [2], [0, 0, 0, 1, 1, 2], [0], [0]>} : vector<10x8x8xbf16>, vector<10x8x16xbf16>, vector<10x8x16xf32> -> vector<10x8x16xf32>
    "tpu.trace_stop"() : () -> ()
    %847 = arith.truncf %846 : vector<10x8x16xf32> to vector<10x8x16xbf16>
    "tpu.trace_start"() <{level = 10 : i32, message = "bhg,bgw->bhw"}> : () -> ()
    %cst_331 = arith.constant dense<0.000000e+00> : vector<10x16x16xf32>
    %848 = tpu.matmul %570, %847, %cst_331 {dimension_numbers = #tpu.dot_dimension_numbers<[2], [1], [1], [2], [0, 0, 0, 1, 1, 2], [0], [0]>} : vector<10x16x8xbf16>, vector<10x8x16xbf16>, vector<10x16x16xf32> -> vector<10x16x16xf32>
    "tpu.trace_stop"() : () -> ()
    %849 = arith.maximumf %532, %848 : vector<10x16x16xf32>
    %c0_332 = arith.constant 0 : index
    %c0_333 = arith.constant 0 : index
    %c0_334 = arith.constant 0 : index
    %850 = vector.load %arg8[%c0_332, %c0_333, %c0_334] : memref<8x16x12xbf16, #tpu.memory_space<vmem>>, vector<8x16x12xbf16>
    %c0_335 = arith.constant 0 : index
    %c0_336 = arith.constant 0 : index
    %c0_337 = arith.constant 0 : index
    %851 = vector.load %arg9[%c0_335, %c0_336, %c0_337] : memref<8x12x16xbf16, #tpu.memory_space<vmem>>, vector<8x12x16xbf16>
    %c0_338 = arith.constant 0 : index
    %c0_339 = arith.constant 0 : index
    %c0_340 = arith.constant 0 : index
    %852 = vector.load %arg10[%c0_338, %c0_339, %c0_340] : memref<10x12x16xbf16, #tpu.memory_space<vmem>>, vector<10x12x16xbf16>
    %c0_341 = arith.constant 0 : index
    %c0_342 = arith.constant 0 : index
    %c0_343 = arith.constant 0 : index
    %853 = vector.load %arg11[%c0_341, %c0_342, %c0_343] : memref<10x16x12xbf16, #tpu.memory_space<vmem>>, vector<10x16x12xbf16>
    "tpu.trace_start"() <{level = 10 : i32, message = "bhw,bws->bhs"}> : () -> ()
    %cst_344 = arith.constant dense<0.000000e+00> : vector<8x16x12xf32>
    %854 = tpu.matmul %1, %850, %cst_344 {dimension_numbers = #tpu.dot_dimension_numbers<[2], [1], [1], [2], [0, 0, 0, 1, 1, 2], [0], [0]>} : vector<8x16x16xbf16>, vector<8x16x12xbf16>, vector<8x16x12xf32> -> vector<8x16x12xf32>
    "tpu.trace_stop"() : () -> ()
    %855 = arith.truncf %854 : vector<8x16x12xf32> to vector<8x16x12xbf16>
    "tpu.trace_start"() <{level = 10 : i32, message = "bgh,bhs->bgs"}> : () -> ()
    %cst_345 = arith.constant dense<0.000000e+00> : vector<8x12x12xf32>
    %856 = tpu.matmul %851, %855, %cst_345 {dimension_numbers = #tpu.dot_dimension_numbers<[2], [1], [1], [2], [0, 0, 0, 1, 1, 2], [0], [0]>} : vector<8x12x16xbf16>, vector<8x16x12xbf16>, vector<8x12x12xf32> -> vector<8x12x12xf32>
    "tpu.trace_stop"() : () -> ()
    %c0_346 = arith.constant 0 : index
    %c0_347 = arith.constant 0 : index
    %857 = memref.load %arg3[%c0_346, %c0_347] : memref<10x5xf32, #tpu.memory_space<smem>>
    %858 = vector.extract_strided_slice %856 {offsets = [0, 0, 0], sizes = [1, 12, 12], strides = [1, 1, 1]} : vector<8x12x12xf32> to vector<1x12x12xf32>
    %859 = vector.shape_cast %858 : vector<1x12x12xf32> to vector<12x12xf32>
    %860 = vector.broadcast %857 : f32 to vector<12x12xf32>
    %861 = arith.mulf %860, %859 : vector<12x12xf32>
    %c0_348 = arith.constant 0 : index
    %c1_349 = arith.constant 1 : index
    %862 = memref.load %arg3[%c0_348, %c1_349] : memref<10x5xf32, #tpu.memory_space<smem>>
    %863 = vector.extract_strided_slice %856 {offsets = [2, 0, 0], sizes = [1, 12, 12], strides = [1, 1, 1]} : vector<8x12x12xf32> to vector<1x12x12xf32>
    %864 = vector.shape_cast %863 : vector<1x12x12xf32> to vector<12x12xf32>
    %865 = vector.broadcast %862 : f32 to vector<12x12xf32>
    %866 = arith.mulf %865, %864 : vector<12x12xf32>
    %867 = arith.addf %861, %866 : vector<12x12xf32>
    %c0_350 = arith.constant 0 : index
    %c2_351 = arith.constant 2 : index
    %868 = memref.load %arg3[%c0_350, %c2_351] : memref<10x5xf32, #tpu.memory_space<smem>>
    %869 = vector.extract_strided_slice %856 {offsets = [4, 0, 0], sizes = [1, 12, 12], strides = [1, 1, 1]} : vector<8x12x12xf32> to vector<1x12x12xf32>
    %870 = vector.shape_cast %869 : vector<1x12x12xf32> to vector<12x12xf32>
    %871 = vector.broadcast %868 : f32 to vector<12x12xf32>
    %872 = arith.mulf %871, %870 : vector<12x12xf32>
    %873 = arith.addf %867, %872 : vector<12x12xf32>
    %c0_352 = arith.constant 0 : index
    %c3_353 = arith.constant 3 : index
    %874 = memref.load %arg3[%c0_352, %c3_353] : memref<10x5xf32, #tpu.memory_space<smem>>
    %875 = vector.extract_strided_slice %856 {offsets = [6, 0, 0], sizes = [1, 12, 12], strides = [1, 1, 1]} : vector<8x12x12xf32> to vector<1x12x12xf32>
    %876 = vector.shape_cast %875 : vector<1x12x12xf32> to vector<12x12xf32>
    %877 = vector.broadcast %874 : f32 to vector<12x12xf32>
    %878 = arith.mulf %877, %876 : vector<12x12xf32>
    %879 = arith.addf %873, %878 : vector<12x12xf32>
    %c0_354 = arith.constant 0 : index
    %c4_355 = arith.constant 4 : index
    %880 = memref.load %arg3[%c0_354, %c4_355] : memref<10x5xf32, #tpu.memory_space<smem>>
    %881 = vector.broadcast %880 : f32 to vector<12x12xf32>
    %882 = arith.addf %879, %881 : vector<12x12xf32>
    %c0_356 = arith.constant 0 : index
    %c0_357 = arith.constant 0 : index
    %883 = memref.load %arg3[%c0_356, %c0_357] : memref<10x5xf32, #tpu.memory_space<smem>>
    %884 = vector.extract_strided_slice %856 {offsets = [1, 0, 0], sizes = [1, 12, 12], strides = [1, 1, 1]} : vector<8x12x12xf32> to vector<1x12x12xf32>
    %885 = vector.shape_cast %884 : vector<1x12x12xf32> to vector<12x12xf32>
    %886 = vector.broadcast %883 : f32 to vector<12x12xf32>
    %887 = arith.mulf %886, %885 : vector<12x12xf32>
    %c0_358 = arith.constant 0 : index
    %c1_359 = arith.constant 1 : index
    %888 = memref.load %arg3[%c0_358, %c1_359] : memref<10x5xf32, #tpu.memory_space<smem>>
    %889 = vector.extract_strided_slice %856 {offsets = [3, 0, 0], sizes = [1, 12, 12], strides = [1, 1, 1]} : vector<8x12x12xf32> to vector<1x12x12xf32>
    %890 = vector.shape_cast %889 : vector<1x12x12xf32> to vector<12x12xf32>
    %891 = vector.broadcast %888 : f32 to vector<12x12xf32>
    %892 = arith.mulf %891, %890 : vector<12x12xf32>
    %893 = arith.addf %887, %892 : vector<12x12xf32>
    %c0_360 = arith.constant 0 : index
    %c2_361 = arith.constant 2 : index
    %894 = memref.load %arg3[%c0_360, %c2_361] : memref<10x5xf32, #tpu.memory_space<smem>>
    %895 = vector.extract_strided_slice %856 {offsets = [5, 0, 0], sizes = [1, 12, 12], strides = [1, 1, 1]} : vector<8x12x12xf32> to vector<1x12x12xf32>
    %896 = vector.shape_cast %895 : vector<1x12x12xf32> to vector<12x12xf32>
    %897 = vector.broadcast %894 : f32 to vector<12x12xf32>
    %898 = arith.mulf %897, %896 : vector<12x12xf32>
    %899 = arith.addf %893, %898 : vector<12x12xf32>
    %c0_362 = arith.constant 0 : index
    %c3_363 = arith.constant 3 : index
    %900 = memref.load %arg3[%c0_362, %c3_363] : memref<10x5xf32, #tpu.memory_space<smem>>
    %901 = vector.extract_strided_slice %856 {offsets = [7, 0, 0], sizes = [1, 12, 12], strides = [1, 1, 1]} : vector<8x12x12xf32> to vector<1x12x12xf32>
    %902 = vector.shape_cast %901 : vector<1x12x12xf32> to vector<12x12xf32>
    %903 = vector.broadcast %900 : f32 to vector<12x12xf32>
    %904 = arith.mulf %903, %902 : vector<12x12xf32>
    %905 = arith.addf %899, %904 : vector<12x12xf32>
    %c0_364 = arith.constant 0 : index
    %c4_365 = arith.constant 4 : index
    %906 = memref.load %arg3[%c0_364, %c4_365] : memref<10x5xf32, #tpu.memory_space<smem>>
    %907 = vector.broadcast %906 : f32 to vector<12x12xf32>
    %908 = arith.addf %905, %907 : vector<12x12xf32>
    %c1_366 = arith.constant 1 : index
    %c0_367 = arith.constant 0 : index
    %909 = memref.load %arg3[%c1_366, %c0_367] : memref<10x5xf32, #tpu.memory_space<smem>>
    %910 = vector.extract_strided_slice %856 {offsets = [0, 0, 0], sizes = [1, 12, 12], strides = [1, 1, 1]} : vector<8x12x12xf32> to vector<1x12x12xf32>
    %911 = vector.shape_cast %910 : vector<1x12x12xf32> to vector<12x12xf32>
    %912 = vector.broadcast %909 : f32 to vector<12x12xf32>
    %913 = arith.mulf %912, %911 : vector<12x12xf32>
    %c1_368 = arith.constant 1 : index
    %c1_369 = arith.constant 1 : index
    %914 = memref.load %arg3[%c1_368, %c1_369] : memref<10x5xf32, #tpu.memory_space<smem>>
    %915 = vector.extract_strided_slice %856 {offsets = [2, 0, 0], sizes = [1, 12, 12], strides = [1, 1, 1]} : vector<8x12x12xf32> to vector<1x12x12xf32>
    %916 = vector.shape_cast %915 : vector<1x12x12xf32> to vector<12x12xf32>
    %917 = vector.broadcast %914 : f32 to vector<12x12xf32>
    %918 = arith.mulf %917, %916 : vector<12x12xf32>
    %919 = arith.addf %913, %918 : vector<12x12xf32>
    %c1_370 = arith.constant 1 : index
    %c2_371 = arith.constant 2 : index
    %920 = memref.load %arg3[%c1_370, %c2_371] : memref<10x5xf32, #tpu.memory_space<smem>>
    %921 = vector.extract_strided_slice %856 {offsets = [4, 0, 0], sizes = [1, 12, 12], strides = [1, 1, 1]} : vector<8x12x12xf32> to vector<1x12x12xf32>
    %922 = vector.shape_cast %921 : vector<1x12x12xf32> to vector<12x12xf32>
    %923 = vector.broadcast %920 : f32 to vector<12x12xf32>
    %924 = arith.mulf %923, %922 : vector<12x12xf32>
    %925 = arith.addf %919, %924 : vector<12x12xf32>
    %c1_372 = arith.constant 1 : index
    %c3_373 = arith.constant 3 : index
    %926 = memref.load %arg3[%c1_372, %c3_373] : memref<10x5xf32, #tpu.memory_space<smem>>
    %927 = vector.extract_strided_slice %856 {offsets = [6, 0, 0], sizes = [1, 12, 12], strides = [1, 1, 1]} : vector<8x12x12xf32> to vector<1x12x12xf32>
    %928 = vector.shape_cast %927 : vector<1x12x12xf32> to vector<12x12xf32>
    %929 = vector.broadcast %926 : f32 to vector<12x12xf32>
    %930 = arith.mulf %929, %928 : vector<12x12xf32>
    %931 = arith.addf %925, %930 : vector<12x12xf32>
    %c1_374 = arith.constant 1 : index
    %c4_375 = arith.constant 4 : index
    %932 = memref.load %arg3[%c1_374, %c4_375] : memref<10x5xf32, #tpu.memory_space<smem>>
    %933 = vector.broadcast %932 : f32 to vector<12x12xf32>
    %934 = arith.addf %931, %933 : vector<12x12xf32>
    %c1_376 = arith.constant 1 : index
    %c0_377 = arith.constant 0 : index
    %935 = memref.load %arg3[%c1_376, %c0_377] : memref<10x5xf32, #tpu.memory_space<smem>>
    %936 = vector.extract_strided_slice %856 {offsets = [1, 0, 0], sizes = [1, 12, 12], strides = [1, 1, 1]} : vector<8x12x12xf32> to vector<1x12x12xf32>
    %937 = vector.shape_cast %936 : vector<1x12x12xf32> to vector<12x12xf32>
    %938 = vector.broadcast %935 : f32 to vector<12x12xf32>
    %939 = arith.mulf %938, %937 : vector<12x12xf32>
    %c1_378 = arith.constant 1 : index
    %c1_379 = arith.constant 1 : index
    %940 = memref.load %arg3[%c1_378, %c1_379] : memref<10x5xf32, #tpu.memory_space<smem>>
    %941 = vector.extract_strided_slice %856 {offsets = [3, 0, 0], sizes = [1, 12, 12], strides = [1, 1, 1]} : vector<8x12x12xf32> to vector<1x12x12xf32>
    %942 = vector.shape_cast %941 : vector<1x12x12xf32> to vector<12x12xf32>
    %943 = vector.broadcast %940 : f32 to vector<12x12xf32>
    %944 = arith.mulf %943, %942 : vector<12x12xf32>
    %945 = arith.addf %939, %944 : vector<12x12xf32>
    %c1_380 = arith.constant 1 : index
    %c2_381 = arith.constant 2 : index
    %946 = memref.load %arg3[%c1_380, %c2_381] : memref<10x5xf32, #tpu.memory_space<smem>>
    %947 = vector.extract_strided_slice %856 {offsets = [5, 0, 0], sizes = [1, 12, 12], strides = [1, 1, 1]} : vector<8x12x12xf32> to vector<1x12x12xf32>
    %948 = vector.shape_cast %947 : vector<1x12x12xf32> to vector<12x12xf32>
    %949 = vector.broadcast %946 : f32 to vector<12x12xf32>
    %950 = arith.mulf %949, %948 : vector<12x12xf32>
    %951 = arith.addf %945, %950 : vector<12x12xf32>
    %c1_382 = arith.constant 1 : index
    %c3_383 = arith.constant 3 : index
    %952 = memref.load %arg3[%c1_382, %c3_383] : memref<10x5xf32, #tpu.memory_space<smem>>
    %953 = vector.extract_strided_slice %856 {offsets = [7, 0, 0], sizes = [1, 12, 12], strides = [1, 1, 1]} : vector<8x12x12xf32> to vector<1x12x12xf32>
    %954 = vector.shape_cast %953 : vector<1x12x12xf32> to vector<12x12xf32>
    %955 = vector.broadcast %952 : f32 to vector<12x12xf32>
    %956 = arith.mulf %955, %954 : vector<12x12xf32>
    %957 = arith.addf %951, %956 : vector<12x12xf32>
    %c1_384 = arith.constant 1 : index
    %c4_385 = arith.constant 4 : index
    %958 = memref.load %arg3[%c1_384, %c4_385] : memref<10x5xf32, #tpu.memory_space<smem>>
    %959 = vector.broadcast %958 : f32 to vector<12x12xf32>
    %960 = arith.addf %957, %959 : vector<12x12xf32>
    %c2_386 = arith.constant 2 : index
    %c0_387 = arith.constant 0 : index
    %961 = memref.load %arg3[%c2_386, %c0_387] : memref<10x5xf32, #tpu.memory_space<smem>>
    %962 = vector.extract_strided_slice %856 {offsets = [0, 0, 0], sizes = [1, 12, 12], strides = [1, 1, 1]} : vector<8x12x12xf32> to vector<1x12x12xf32>
    %963 = vector.shape_cast %962 : vector<1x12x12xf32> to vector<12x12xf32>
    %964 = vector.broadcast %961 : f32 to vector<12x12xf32>
    %965 = arith.mulf %964, %963 : vector<12x12xf32>
    %c2_388 = arith.constant 2 : index
    %c1_389 = arith.constant 1 : index
    %966 = memref.load %arg3[%c2_388, %c1_389] : memref<10x5xf32, #tpu.memory_space<smem>>
    %967 = vector.extract_strided_slice %856 {offsets = [2, 0, 0], sizes = [1, 12, 12], strides = [1, 1, 1]} : vector<8x12x12xf32> to vector<1x12x12xf32>
    %968 = vector.shape_cast %967 : vector<1x12x12xf32> to vector<12x12xf32>
    %969 = vector.broadcast %966 : f32 to vector<12x12xf32>
    %970 = arith.mulf %969, %968 : vector<12x12xf32>
    %971 = arith.addf %965, %970 : vector<12x12xf32>
    %c2_390 = arith.constant 2 : index
    %c2_391 = arith.constant 2 : index
    %972 = memref.load %arg3[%c2_390, %c2_391] : memref<10x5xf32, #tpu.memory_space<smem>>
    %973 = vector.extract_strided_slice %856 {offsets = [4, 0, 0], sizes = [1, 12, 12], strides = [1, 1, 1]} : vector<8x12x12xf32> to vector<1x12x12xf32>
    %974 = vector.shape_cast %973 : vector<1x12x12xf32> to vector<12x12xf32>
    %975 = vector.broadcast %972 : f32 to vector<12x12xf32>
    %976 = arith.mulf %975, %974 : vector<12x12xf32>
    %977 = arith.addf %971, %976 : vector<12x12xf32>
    %c2_392 = arith.constant 2 : index
    %c3_393 = arith.constant 3 : index
    %978 = memref.load %arg3[%c2_392, %c3_393] : memref<10x5xf32, #tpu.memory_space<smem>>
    %979 = vector.extract_strided_slice %856 {offsets = [6, 0, 0], sizes = [1, 12, 12], strides = [1, 1, 1]} : vector<8x12x12xf32> to vector<1x12x12xf32>
    %980 = vector.shape_cast %979 : vector<1x12x12xf32> to vector<12x12xf32>
    %981 = vector.broadcast %978 : f32 to vector<12x12xf32>
    %982 = arith.mulf %981, %980 : vector<12x12xf32>
    %983 = arith.addf %977, %982 : vector<12x12xf32>
    %c2_394 = arith.constant 2 : index
    %c4_395 = arith.constant 4 : index
    %984 = memref.load %arg3[%c2_394, %c4_395] : memref<10x5xf32, #tpu.memory_space<smem>>
    %985 = vector.broadcast %984 : f32 to vector<12x12xf32>
    %986 = arith.addf %983, %985 : vector<12x12xf32>
    %c2_396 = arith.constant 2 : index
    %c0_397 = arith.constant 0 : index
    %987 = memref.load %arg3[%c2_396, %c0_397] : memref<10x5xf32, #tpu.memory_space<smem>>
    %988 = vector.extract_strided_slice %856 {offsets = [1, 0, 0], sizes = [1, 12, 12], strides = [1, 1, 1]} : vector<8x12x12xf32> to vector<1x12x12xf32>
    %989 = vector.shape_cast %988 : vector<1x12x12xf32> to vector<12x12xf32>
    %990 = vector.broadcast %987 : f32 to vector<12x12xf32>
    %991 = arith.mulf %990, %989 : vector<12x12xf32>
    %c2_398 = arith.constant 2 : index
    %c1_399 = arith.constant 1 : index
    %992 = memref.load %arg3[%c2_398, %c1_399] : memref<10x5xf32, #tpu.memory_space<smem>>
    %993 = vector.extract_strided_slice %856 {offsets = [3, 0, 0], sizes = [1, 12, 12], strides = [1, 1, 1]} : vector<8x12x12xf32> to vector<1x12x12xf32>
    %994 = vector.shape_cast %993 : vector<1x12x12xf32> to vector<12x12xf32>
    %995 = vector.broadcast %992 : f32 to vector<12x12xf32>
    %996 = arith.mulf %995, %994 : vector<12x12xf32>
    %997 = arith.addf %991, %996 : vector<12x12xf32>
    %c2_400 = arith.constant 2 : index
    %c2_401 = arith.constant 2 : index
    %998 = memref.load %arg3[%c2_400, %c2_401] : memref<10x5xf32, #tpu.memory_space<smem>>
    %999 = vector.extract_strided_slice %856 {offsets = [5, 0, 0], sizes = [1, 12, 12], strides = [1, 1, 1]} : vector<8x12x12xf32> to vector<1x12x12xf32>
    %1000 = vector.shape_cast %999 : vector<1x12x12xf32> to vector<12x12xf32>
    %1001 = vector.broadcast %998 : f32 to vector<12x12xf32>
    %1002 = arith.mulf %1001, %1000 : vector<12x12xf32>
    %1003 = arith.addf %997, %1002 : vector<12x12xf32>
    %c2_402 = arith.constant 2 : index
    %c3_403 = arith.constant 3 : index
    %1004 = memref.load %arg3[%c2_402, %c3_403] : memref<10x5xf32, #tpu.memory_space<smem>>
    %1005 = vector.extract_strided_slice %856 {offsets = [7, 0, 0], sizes = [1, 12, 12], strides = [1, 1, 1]} : vector<8x12x12xf32> to vector<1x12x12xf32>
    %1006 = vector.shape_cast %1005 : vector<1x12x12xf32> to vector<12x12xf32>
    %1007 = vector.broadcast %1004 : f32 to vector<12x12xf32>
    %1008 = arith.mulf %1007, %1006 : vector<12x12xf32>
    %1009 = arith.addf %1003, %1008 : vector<12x12xf32>
    %c2_404 = arith.constant 2 : index
    %c4_405 = arith.constant 4 : index
    %1010 = memref.load %arg3[%c2_404, %c4_405] : memref<10x5xf32, #tpu.memory_space<smem>>
    %1011 = vector.broadcast %1010 : f32 to vector<12x12xf32>
    %1012 = arith.addf %1009, %1011 : vector<12x12xf32>
    %c3_406 = arith.constant 3 : index
    %c0_407 = arith.constant 0 : index
    %1013 = memref.load %arg3[%c3_406, %c0_407] : memref<10x5xf32, #tpu.memory_space<smem>>
    %1014 = vector.extract_strided_slice %856 {offsets = [0, 0, 0], sizes = [1, 12, 12], strides = [1, 1, 1]} : vector<8x12x12xf32> to vector<1x12x12xf32>
    %1015 = vector.shape_cast %1014 : vector<1x12x12xf32> to vector<12x12xf32>
    %1016 = vector.broadcast %1013 : f32 to vector<12x12xf32>
    %1017 = arith.mulf %1016, %1015 : vector<12x12xf32>
    %c3_408 = arith.constant 3 : index
    %c1_409 = arith.constant 1 : index
    %1018 = memref.load %arg3[%c3_408, %c1_409] : memref<10x5xf32, #tpu.memory_space<smem>>
    %1019 = vector.extract_strided_slice %856 {offsets = [2, 0, 0], sizes = [1, 12, 12], strides = [1, 1, 1]} : vector<8x12x12xf32> to vector<1x12x12xf32>
    %1020 = vector.shape_cast %1019 : vector<1x12x12xf32> to vector<12x12xf32>
    %1021 = vector.broadcast %1018 : f32 to vector<12x12xf32>
    %1022 = arith.mulf %1021, %1020 : vector<12x12xf32>
    %1023 = arith.addf %1017, %1022 : vector<12x12xf32>
    %c3_410 = arith.constant 3 : index
    %c2_411 = arith.constant 2 : index
    %1024 = memref.load %arg3[%c3_410, %c2_411] : memref<10x5xf32, #tpu.memory_space<smem>>
    %1025 = vector.extract_strided_slice %856 {offsets = [4, 0, 0], sizes = [1, 12, 12], strides = [1, 1, 1]} : vector<8x12x12xf32> to vector<1x12x12xf32>
    %1026 = vector.shape_cast %1025 : vector<1x12x12xf32> to vector<12x12xf32>
    %1027 = vector.broadcast %1024 : f32 to vector<12x12xf32>
    %1028 = arith.mulf %1027, %1026 : vector<12x12xf32>
    %1029 = arith.addf %1023, %1028 : vector<12x12xf32>
    %c3_412 = arith.constant 3 : index
    %c3_413 = arith.constant 3 : index
    %1030 = memref.load %arg3[%c3_412, %c3_413] : memref<10x5xf32, #tpu.memory_space<smem>>
    %1031 = vector.extract_strided_slice %856 {offsets = [6, 0, 0], sizes = [1, 12, 12], strides = [1, 1, 1]} : vector<8x12x12xf32> to vector<1x12x12xf32>
    %1032 = vector.shape_cast %1031 : vector<1x12x12xf32> to vector<12x12xf32>
    %1033 = vector.broadcast %1030 : f32 to vector<12x12xf32>
    %1034 = arith.mulf %1033, %1032 : vector<12x12xf32>
    %1035 = arith.addf %1029, %1034 : vector<12x12xf32>
    %c3_414 = arith.constant 3 : index
    %c4_415 = arith.constant 4 : index
    %1036 = memref.load %arg3[%c3_414, %c4_415] : memref<10x5xf32, #tpu.memory_space<smem>>
    %1037 = vector.broadcast %1036 : f32 to vector<12x12xf32>
    %1038 = arith.addf %1035, %1037 : vector<12x12xf32>
    %c3_416 = arith.constant 3 : index
    %c0_417 = arith.constant 0 : index
    %1039 = memref.load %arg3[%c3_416, %c0_417] : memref<10x5xf32, #tpu.memory_space<smem>>
    %1040 = vector.extract_strided_slice %856 {offsets = [1, 0, 0], sizes = [1, 12, 12], strides = [1, 1, 1]} : vector<8x12x12xf32> to vector<1x12x12xf32>
    %1041 = vector.shape_cast %1040 : vector<1x12x12xf32> to vector<12x12xf32>
    %1042 = vector.broadcast %1039 : f32 to vector<12x12xf32>
    %1043 = arith.mulf %1042, %1041 : vector<12x12xf32>
    %c3_418 = arith.constant 3 : index
    %c1_419 = arith.constant 1 : index
    %1044 = memref.load %arg3[%c3_418, %c1_419] : memref<10x5xf32, #tpu.memory_space<smem>>
    %1045 = vector.extract_strided_slice %856 {offsets = [3, 0, 0], sizes = [1, 12, 12], strides = [1, 1, 1]} : vector<8x12x12xf32> to vector<1x12x12xf32>
    %1046 = vector.shape_cast %1045 : vector<1x12x12xf32> to vector<12x12xf32>
    %1047 = vector.broadcast %1044 : f32 to vector<12x12xf32>
    %1048 = arith.mulf %1047, %1046 : vector<12x12xf32>
    %1049 = arith.addf %1043, %1048 : vector<12x12xf32>
    %c3_420 = arith.constant 3 : index
    %c2_421 = arith.constant 2 : index
    %1050 = memref.load %arg3[%c3_420, %c2_421] : memref<10x5xf32, #tpu.memory_space<smem>>
    %1051 = vector.extract_strided_slice %856 {offsets = [5, 0, 0], sizes = [1, 12, 12], strides = [1, 1, 1]} : vector<8x12x12xf32> to vector<1x12x12xf32>
    %1052 = vector.shape_cast %1051 : vector<1x12x12xf32> to vector<12x12xf32>
    %1053 = vector.broadcast %1050 : f32 to vector<12x12xf32>
    %1054 = arith.mulf %1053, %1052 : vector<12x12xf32>
    %1055 = arith.addf %1049, %1054 : vector<12x12xf32>
    %c3_422 = arith.constant 3 : index
    %c3_423 = arith.constant 3 : index
    %1056 = memref.load %arg3[%c3_422, %c3_423] : memref<10x5xf32, #tpu.memory_space<smem>>
    %1057 = vector.extract_strided_slice %856 {offsets = [7, 0, 0], sizes = [1, 12, 12], strides = [1, 1, 1]} : vector<8x12x12xf32> to vector<1x12x12xf32>
    %1058 = vector.shape_cast %1057 : vector<1x12x12xf32> to vector<12x12xf32>
    %1059 = vector.broadcast %1056 : f32 to vector<12x12xf32>
    %1060 = arith.mulf %1059, %1058 : vector<12x12xf32>
    %1061 = arith.addf %1055, %1060 : vector<12x12xf32>
    %c3_424 = arith.constant 3 : index
    %c4_425 = arith.constant 4 : index
    %1062 = memref.load %arg3[%c3_424, %c4_425] : memref<10x5xf32, #tpu.memory_space<smem>>
    %1063 = vector.broadcast %1062 : f32 to vector<12x12xf32>
    %1064 = arith.addf %1061, %1063 : vector<12x12xf32>
    %c4_426 = arith.constant 4 : index
    %c0_427 = arith.constant 0 : index
    %1065 = memref.load %arg3[%c4_426, %c0_427] : memref<10x5xf32, #tpu.memory_space<smem>>
    %1066 = vector.extract_strided_slice %856 {offsets = [0, 0, 0], sizes = [1, 12, 12], strides = [1, 1, 1]} : vector<8x12x12xf32> to vector<1x12x12xf32>
    %1067 = vector.shape_cast %1066 : vector<1x12x12xf32> to vector<12x12xf32>
    %1068 = vector.broadcast %1065 : f32 to vector<12x12xf32>
    %1069 = arith.mulf %1068, %1067 : vector<12x12xf32>
    %c4_428 = arith.constant 4 : index
    %c1_429 = arith.constant 1 : index
    %1070 = memref.load %arg3[%c4_428, %c1_429] : memref<10x5xf32, #tpu.memory_space<smem>>
    %1071 = vector.extract_strided_slice %856 {offsets = [2, 0, 0], sizes = [1, 12, 12], strides = [1, 1, 1]} : vector<8x12x12xf32> to vector<1x12x12xf32>
    %1072 = vector.shape_cast %1071 : vector<1x12x12xf32> to vector<12x12xf32>
    %1073 = vector.broadcast %1070 : f32 to vector<12x12xf32>
    %1074 = arith.mulf %1073, %1072 : vector<12x12xf32>
    %1075 = arith.addf %1069, %1074 : vector<12x12xf32>
    %c4_430 = arith.constant 4 : index
    %c2_431 = arith.constant 2 : index
    %1076 = memref.load %arg3[%c4_430, %c2_431] : memref<10x5xf32, #tpu.memory_space<smem>>
    %1077 = vector.extract_strided_slice %856 {offsets = [4, 0, 0], sizes = [1, 12, 12], strides = [1, 1, 1]} : vector<8x12x12xf32> to vector<1x12x12xf32>
    %1078 = vector.shape_cast %1077 : vector<1x12x12xf32> to vector<12x12xf32>
    %1079 = vector.broadcast %1076 : f32 to vector<12x12xf32>
    %1080 = arith.mulf %1079, %1078 : vector<12x12xf32>
    %1081 = arith.addf %1075, %1080 : vector<12x12xf32>
    %c4_432 = arith.constant 4 : index
    %c3_433 = arith.constant 3 : index
    %1082 = memref.load %arg3[%c4_432, %c3_433] : memref<10x5xf32, #tpu.memory_space<smem>>
    %1083 = vector.extract_strided_slice %856 {offsets = [6, 0, 0], sizes = [1, 12, 12], strides = [1, 1, 1]} : vector<8x12x12xf32> to vector<1x12x12xf32>
    %1084 = vector.shape_cast %1083 : vector<1x12x12xf32> to vector<12x12xf32>
    %1085 = vector.broadcast %1082 : f32 to vector<12x12xf32>
    %1086 = arith.mulf %1085, %1084 : vector<12x12xf32>
    %1087 = arith.addf %1081, %1086 : vector<12x12xf32>
    %c4_434 = arith.constant 4 : index
    %c4_435 = arith.constant 4 : index
    %1088 = memref.load %arg3[%c4_434, %c4_435] : memref<10x5xf32, #tpu.memory_space<smem>>
    %1089 = vector.broadcast %1088 : f32 to vector<12x12xf32>
    %1090 = arith.addf %1087, %1089 : vector<12x12xf32>
    %c4_436 = arith.constant 4 : index
    %c0_437 = arith.constant 0 : index
    %1091 = memref.load %arg3[%c4_436, %c0_437] : memref<10x5xf32, #tpu.memory_space<smem>>
    %1092 = vector.extract_strided_slice %856 {offsets = [1, 0, 0], sizes = [1, 12, 12], strides = [1, 1, 1]} : vector<8x12x12xf32> to vector<1x12x12xf32>
    %1093 = vector.shape_cast %1092 : vector<1x12x12xf32> to vector<12x12xf32>
    %1094 = vector.broadcast %1091 : f32 to vector<12x12xf32>
    %1095 = arith.mulf %1094, %1093 : vector<12x12xf32>
    %c4_438 = arith.constant 4 : index
    %c1_439 = arith.constant 1 : index
    %1096 = memref.load %arg3[%c4_438, %c1_439] : memref<10x5xf32, #tpu.memory_space<smem>>
    %1097 = vector.extract_strided_slice %856 {offsets = [3, 0, 0], sizes = [1, 12, 12], strides = [1, 1, 1]} : vector<8x12x12xf32> to vector<1x12x12xf32>
    %1098 = vector.shape_cast %1097 : vector<1x12x12xf32> to vector<12x12xf32>
    %1099 = vector.broadcast %1096 : f32 to vector<12x12xf32>
    %1100 = arith.mulf %1099, %1098 : vector<12x12xf32>
    %1101 = arith.addf %1095, %1100 : vector<12x12xf32>
    %c4_440 = arith.constant 4 : index
    %c2_441 = arith.constant 2 : index
    %1102 = memref.load %arg3[%c4_440, %c2_441] : memref<10x5xf32, #tpu.memory_space<smem>>
    %1103 = vector.extract_strided_slice %856 {offsets = [5, 0, 0], sizes = [1, 12, 12], strides = [1, 1, 1]} : vector<8x12x12xf32> to vector<1x12x12xf32>
    %1104 = vector.shape_cast %1103 : vector<1x12x12xf32> to vector<12x12xf32>
    %1105 = vector.broadcast %1102 : f32 to vector<12x12xf32>
    %1106 = arith.mulf %1105, %1104 : vector<12x12xf32>
    %1107 = arith.addf %1101, %1106 : vector<12x12xf32>
    %c4_442 = arith.constant 4 : index
    %c3_443 = arith.constant 3 : index
    %1108 = memref.load %arg3[%c4_442, %c3_443] : memref<10x5xf32, #tpu.memory_space<smem>>
    %1109 = vector.extract_strided_slice %856 {offsets = [7, 0, 0], sizes = [1, 12, 12], strides = [1, 1, 1]} : vector<8x12x12xf32> to vector<1x12x12xf32>
    %1110 = vector.shape_cast %1109 : vector<1x12x12xf32> to vector<12x12xf32>
    %1111 = vector.broadcast %1108 : f32 to vector<12x12xf32>
    %1112 = arith.mulf %1111, %1110 : vector<12x12xf32>
    %1113 = arith.addf %1107, %1112 : vector<12x12xf32>
    %c4_444 = arith.constant 4 : index
    %c4_445 = arith.constant 4 : index
    %1114 = memref.load %arg3[%c4_444, %c4_445] : memref<10x5xf32, #tpu.memory_space<smem>>
    %1115 = vector.broadcast %1114 : f32 to vector<12x12xf32>
    %1116 = arith.addf %1113, %1115 : vector<12x12xf32>
    %1117 = vector.shape_cast %882 : vector<12x12xf32> to vector<1x12x12xf32>
    %1118 = vector.shape_cast %908 : vector<12x12xf32> to vector<1x12x12xf32>
    %1119 = vector.shape_cast %934 : vector<12x12xf32> to vector<1x12x12xf32>
    %1120 = vector.shape_cast %960 : vector<12x12xf32> to vector<1x12x12xf32>
    %1121 = vector.shape_cast %986 : vector<12x12xf32> to vector<1x12x12xf32>
    %1122 = vector.shape_cast %1012 : vector<12x12xf32> to vector<1x12x12xf32>
    %1123 = vector.shape_cast %1038 : vector<12x12xf32> to vector<1x12x12xf32>
    %1124 = vector.shape_cast %1064 : vector<12x12xf32> to vector<1x12x12xf32>
    %1125 = vector.shape_cast %1090 : vector<12x12xf32> to vector<1x12x12xf32>
    %1126 = vector.shape_cast %1116 : vector<12x12xf32> to vector<1x12x12xf32>
    %1127 = tpu.concatenate %1117, %1118, %1119, %1120, %1121, %1122, %1123, %1124, %1125, %1126 in 0 : vector<1x12x12xf32>, vector<1x12x12xf32>, vector<1x12x12xf32>, vector<1x12x12xf32>, vector<1x12x12xf32>, vector<1x12x12xf32>, vector<1x12x12xf32>, vector<1x12x12xf32>, vector<1x12x12xf32>, vector<1x12x12xf32> -> vector<10x12x12xf32>
    %1128 = arith.truncf %1127 : vector<10x12x12xf32> to vector<10x12x12xbf16>
    "tpu.trace_start"() <{level = 10 : i32, message = "bgs,bsw->bgw"}> : () -> ()
    %cst_446 = arith.constant dense<0.000000e+00> : vector<10x12x16xf32>
    %1129 = tpu.matmul %1128, %852, %cst_446 {dimension_numbers = #tpu.dot_dimension_numbers<[2], [1], [1], [2], [0, 0, 0, 1, 1, 2], [0], [0]>} : vector<10x12x12xbf16>, vector<10x12x16xbf16>, vector<10x12x16xf32> -> vector<10x12x16xf32>
    "tpu.trace_stop"() : () -> ()
    %1130 = arith.truncf %1129 : vector<10x12x16xf32> to vector<10x12x16xbf16>
    "tpu.trace_start"() <{level = 10 : i32, message = "bhg,bgw->bhw"}> : () -> ()
    %cst_447 = arith.constant dense<0.000000e+00> : vector<10x16x16xf32>
    %1131 = tpu.matmul %853, %1130, %cst_447 {dimension_numbers = #tpu.dot_dimension_numbers<[2], [1], [1], [2], [0, 0, 0, 1, 1, 2], [0], [0]>} : vector<10x16x12xbf16>, vector<10x12x16xbf16>, vector<10x16x16xf32> -> vector<10x16x16xf32>
    "tpu.trace_stop"() : () -> ()
    %1132 = arith.maximumf %849, %1131 : vector<10x16x16xf32>
    %c0_448 = arith.constant 0 : index
    %c0_449 = arith.constant 0 : index
    %c0_450 = arith.constant 0 : index
    %1133 = vector.load %arg15[%c0_448, %c0_449, %c0_450] : memref<10x16x16xf32, #tpu.memory_space<vmem>>, vector<10x16x16xf32>
    tpu.vector_store %arg15[%c0_448, %c0_449, %c0_450], %1132 {strides = array<i32>} : memref<10x16x16xf32, #tpu.memory_space<vmem>>, vector<10x16x16xf32>,
    return
  }
}

</mosaic_0001>

<bundles_post_ra>
// kernel: _lambda_.1
= control target key start
LH: loop header
LB: loop body
LE: loop exit
PB: predicated region body
PF: predicated region fallthrough
CT: control target
= control target key end

     0   :  { %21 = vsyncpa [#allocation4], 0  ;;  %s7837_s0 = inlined_call_operand.vmem [shape: f32[4,2,16,16], index: 0, kind: input, shape index: {}]   ;;  %s7838_s1 = inlined_call_operand.vmem [shape: bf16[8,16,16], index: 1, kind: input, shape index: {}]   ;;  %s7839_s2 = inlined_call_operand.vmem [shape: f32[2,16,16], index: 2, kind: input, shape index: {}]   ;;  %s7840_s3 = inlined_call_operand.vmem [shape: f32[10,5], index: 3, kind: input, shape index: {}]   ;;  %s7841_s4 = inlined_call_operand.vmem [shape: bf16[8,16,8], index: 4, kind: input, shape index: {}]   ;;  %s7842_s5 = inlined_call_operand.vmem [shape: bf16[8,8,16], index: 5, kind: input, shape index: {}]   ;;  %s7843_s6 = inlined_call_operand.vmem [shape: bf16[10,8,16], index: 6, kind: input, shape index: {}]   ;;  %s7844_s7 = inlined_call_operand.vmem [shape: bf16[10,16,8], index: 7, kind: input, shape index: {}]   ;;  %s7845_s8 = inlined_call_operand.vmem [shape: bf16[8,16,12], index: 8, kind: input, shape index: {}]   ;;  %s7846_s9 = inlined_call_operand.vmem [shape: bf16[8,12,16], index: 9, kind: input, shape index: {}]   ;;  %s7847_s10 = inlined_call_operand.vmem [shape: bf16[10,12,16], index: 10, kind: input, shape index: {}]   ;;  %s7848_s11 = inlined_call_operand.vmem [shape: bf16[10,16,12], index: 11, kind: input, shape index: {}]   ;;  %s7849_s12 = inlined_call_operand.hbm [shape: f32[1,1,1], index: 12, kind: output, shape index: {0}]   ;;  %s7850_s13 = inlined_call_operand.vmem [shape: f32[10,16,16], index: 13, kind: output, shape index: {1}]   ;;  %s7851_s14 = inlined_call_operand.vmem [shape: f32[10,16,16], index: 14, kind: output, shape index: {2}]   ;;  %s7852_s15 = inlined_call_operand.vmem [shape: f32[10,16,16], index: 15, kind: output, shape index: {3}]  }
   0x1   :  { %22 = vsyncpa [#allocation3], 0  ;;  %s34_s20 = sshll.u32 %s7840_s3, 4  ;;  %s35_s20 = int_to_ptr.vmem [resolvable:$true] %s34_s20 }
   0x2   :  { %s5856_s21 = scalar_lea.vmem %s35_s20, 256  ;;  %p5861_p1 = scmp.lt.s32.totalorder %s35_s20, %s35_s20 }
   0x3   :  { %p5857_p0 = scmp.ne.s32.totalorder %s35_s20, %s5856_s21  ;;  %p5862_p2 = scmp.lt.s32.totalorder %s5856_s21, %s5856_s21 }
   0x5   :  { %p5863_p3 = por %p5862_p2, %p5861_p1 }
   0x7   :  { %p5864_p4 = pnand %p5863_p3, %p5857_p0 }
   0x9   :  { %5867 = shalt.err (!%p5864_p4)
}
   0xa   :  { %s5894_s22 = smov [#allocation2]   ;;  %s5895_s23 = smov 128  }
   0xb   :  { %s5896_s24 = smov 8  }
   0xc   :  { %40 = dma.vmem_to_smem %s35_s20, 256, %s5894_s22, [#allocation4], %s5895_s23, %s5895_s23, %s5896_s24  }
   0xd   :  { %5890 = dma.done.wait [#allocation4], 256  }
   0xe   :  { %5891 = vsyncadd [#allocation4], 4294967040 }
   0xf   :  { %60 = sfence }
  0x10   :  { %v5770_v0 = vld [vmem:[%s7841_s4] sm:$0xff]   ;;  %v7853_v1 = vmov 0.0   ;;  %v5771_v2 = vld [vmem:[%s7841_s4 + $0x8] sm:$0xff]   ;;  %vm5898_vm0 = vmmov 0   ;;  %vm514_vm1 = vcmask 130048   ;;  %v5774_v5 = vld [vmem:[%s7841_s4 + $0x10] sm:$0xff]  }
  0x11   :  { %5332 = vmatprep.subr.bf16.mxu0 %v7853_v1  ;;  %5338 = vmatprep.subr.bf16.mxu1 %v7853_v1  ;;  %v5772_v3 = vld [vmem:[%s7838_s1] sm:$0xff]   ;;  %v5773_v4 = vld [vmem:[%s7838_s1 + $0x8] sm:$0xff]   ;;  %v5775_v6 = vld [vmem:[%s7841_s4 + $0x18] sm:$0xff]   ;;  %vm1762_vm2 = vcmask 1043456   ;;  %s1618_s26 = sld [smem:[#allocation2]]  ;;  %s5038_s30 = sld [smem:[#allocation2 + $0x1]] }
  0x12   :  { %5333 = vmatpush3.bf16.msra.mxu0 %v5770_v0  ;;  %5334 = vmatprep.mubr.msk.bf16.mxu0 %vm5898_vm0, %v7853_v1  ;;  %v5776_v7 = vld [vmem:[%s7838_s1 + $0x10] sm:$0xff]   ;;  %v5777_v8 = vld [vmem:[%s7838_s1 + $0x18] sm:$0xff]   ;;  %v5778_v9 = vld [vmem:[%s7841_s4 + $0x20] sm:$0xff]   ;;  %s5042_s3 = sld [smem:[#allocation2 + $0x80]]  ;;  %s5043_s16 = sld [smem:[#allocation2 + $0x81]]  ;;  %vm1758_vm3 = vcmask 64512  }
  0x13   :  { %5339 = vmatpush3.bf16.msra.mxu1 %v5771_v2  ;;  %5340 = vmatprep.mubr.msk.bf16.mxu1 %vm5898_vm0, %v7853_v1  ;;  %v5779_v10 = vld [vmem:[%s7841_s4 + $0x28] sm:$0xff]   ;;  %v5780_v11 = vld [vmem:[%s7838_s1 + $0x20] sm:$0xff]   ;;  %v5782_v13 = vld [vmem:[%s7841_s4 + $0x30] sm:$0xff]   ;;  %s6135_s27 = sld [smem:[#allocation2 + $0x100]]  ;;  %s6141_s17 = sld [smem:[#allocation2 + $0x101]]  ;;  %vm3847_vm4 = vcmask 1045504  }
  0x14   :  { %5344 = vmatprep.subr.bf16.mxu0 %v7853_v1  ;;  %5350 = vmatprep.subr.bf16.mxu1 %v7853_v1  ;;  %v5781_v12 = vld [vmem:[%s7838_s1 + $0x28] sm:$0xff]   ;;  %v5783_v14 = vld [vmem:[%s7841_s4 + $0x38] sm:$0xff]   ;;  %v5784_v15 = vld [vmem:[%s7838_s1 + $0x30] sm:$0xff]   ;;  %s6137_s28 = sld [smem:[#allocation2 + $0x180]]  ;;  %s6143_s18 = sld [smem:[#allocation2 + $0x181]]  ;;  %vm3843_vm5 = vcmask 97280  }
  0x15   :  { %5335 = vmatmul.mubr.msk.bf16.vlgmr.msra.gmra.mrb[0].mxu0 %vm514_vm1, %v5772_v3  ;;  %v5785_v16 = vld [vmem:[%s7838_s1 + $0x38] sm:$0xff]   ;;  %v788_v27 = vld [vmem:[%s7842_s5] sm:$0xf]  ;;  %v789_v28 = vld [vmem:[%s7842_s5 + $0x4] sm:$0xf]  ;;  %s6139_s29 = sld [smem:[#allocation2 + $0x200]] }
  0x16   :  { %5341 = vmatmul.mubr.msk.bf16.vlgmr.msra.gmra.mrb[0].mxu1 %vm514_vm1, %v5773_v4  ;;  %5345 = vmatpush3.bf16.msra.mxu0 %v5774_v5  ;;  %v790_v39 = vld [vmem:[%s7842_s5 + $0x8] sm:$0xf]  ;;  %v791_v40 = vld [vmem:[%s7842_s5 + $0xc] sm:$0xf]  ;;  %v792_v51 = vld [vmem:[%s7842_s5 + $0x10] sm:$0xf] }
  0x17   :  { %5351 = vmatpush3.bf16.msra.mxu1 %v5775_v6  ;;  %5346 = vmatprep.mubr.msk.bf16.mxu0 %vm5898_vm0, %v7853_v1  ;;  %v793_v52 = vld [vmem:[%s7842_s5 + $0x14] sm:$0xf]  ;;  %v794_v63 = vld [vmem:[%s7842_s5 + $0x18] sm:$0xf]  ;;  %v795_v0 = vld [vmem:[%s7842_s5 + $0x1c] sm:$0xf] }
  0x18   :  { %5352 = vmatprep.mubr.msk.bf16.mxu1 %vm5898_vm0, %v7853_v1  ;;  %5356 = vmatprep.subr.bf16.mxu0 %v7853_v1  ;;  %v796_v2 = vld [vmem:[%s7843_s6] sm:$0xf]  ;;  %v797_v3 = vld [vmem:[%s7843_s6 + $0x4] sm:$0xf]  ;;  %s6145_s19 = sld [smem:[#allocation2 + $0x201]]  ;;  %s6156_s20 = sld [smem:[#allocation2 + $0x2]] }
  0x19   :  { %5362 = vmatprep.subr.bf16.mxu1 %v7853_v1  ;;  %v1764_v4 = vsel %vm1762_vm2, %v796_v2, 0  ;;  %v1810_v5 = vsel %vm1762_vm2, %v797_v3, 0  ;;  %s6158_s21 = sld [smem:[#allocation2 + $0x82]]  ;;  %s6179_s4 = sld [smem:[#allocation2 + $0x3]]  ;;  %vm770_vm6 = vcmask 0  }
  0x1a   :  { %s6165_s22 = sld [smem:[#allocation2 + $0x102]]  ;;  %s6181_s5 = sld [smem:[#allocation2 + $0x83]] }
  0x1b   :  { %s6167_s23 = sld [smem:[#allocation2 + $0x182]]  ;;  %s6193_s25 = sld [smem:[#allocation2 + $0x103]] }
  0x1c   :  { %s6171_s24 = sld [smem:[#allocation2 + $0x202]] }
  0x1d   :  { %5347 = vmatmul.mubr.msk.bf16.vlgmr.msra.gmra.mrb[4].mxu0 %vm514_vm1, %v5776_v7 }
  0x1e   :  { %5353 = vmatmul.mubr.msk.bf16.vlgmr.msra.gmra.mrb[4].mxu1 %vm514_vm1, %v5777_v8  ;;  %5357 = vmatpush3.bf16.msra.mxu0 %v5778_v9 }
  0x1f   :  { %5363 = vmatpush3.bf16.msra.mxu1 %v5779_v10  ;;  %5358 = vmatprep.mubr.msk.bf16.mxu0 %vm5898_vm0, %v7853_v1 }
  0x20   :  { %5364 = vmatprep.mubr.msk.bf16.mxu1 %vm5898_vm0, %v7853_v1  ;;  %5368 = vmatprep.subr.bf16.mxu0 %v7853_v1 }
  0x21   :  { %5374 = vmatprep.subr.bf16.mxu1 %v7853_v1 }
  0x22   :  { %v1730_v3 = vstv %s6171_s24  ;;  %s5136_s24 = sld [smem:[#allocation2 + $0x103]] }
  0x25   :  { %5359 = vmatmul.mubr.msk.bf16.vlgmr.msra.gmra.mrb[8].mxu0 %vm514_vm1, %v5780_v11 }
  0x26   :  { %5365 = vmatmul.mubr.msk.bf16.vlgmr.msra.gmra.mrb[8].mxu1 %vm514_vm1, %v5781_v12  ;;  %5369 = vmatpush3.bf16.msra.mxu0 %v5782_v13  ;;  %v6147_v13 = vstv %s1618_s26  ;;  %s6195_s26 = sld [smem:[#allocation2 + $0x183]] }
  0x27   :  { %5375 = vmatpush3.bf16.msra.mxu1 %v5783_v14  ;;  %5370 = vmatprep.mubr.msk.bf16.mxu0 %vm5898_vm0, %v7853_v1  ;;  %v6149_v14 = vstv %s5042_s3  ;;  %s6198_s3 = sld [smem:[#allocation2 + $0x203]] }
  0x28   :  { %5376 = vmatprep.mubr.msk.bf16.mxu1 %vm5898_vm0, %v7853_v1  ;;  %5380 = vmatprep.subr.bf16.mxu0 %v7853_v1 }
  0x29   :  { %5386 = vmatprep.subr.bf16.mxu1 %v7853_v1 }
  0x2d   :  { %5371 = vmatmul.mubr.msk.bf16.vlgmr.msra.gmra.mrb[12].mxu0 %vm514_vm1, %v5784_v15  ;;  %v1671_v15 = vstv %s6135_s27  ;;  %s6200_s27 = sld [smem:[#allocation2 + $0x4]] }
  0x2e   :  { %5377 = vmatmul.mubr.msk.bf16.vlgmr.msra.gmra.mrb[12].mxu1 %vm514_vm1, %v5785_v16  ;;  %5382 = vmatprep.mubr.msk.bf16.mxu0 %vm5898_vm0, %v7853_v1  ;;  %v1697_v16 = vstv %s6137_s28  ;;  %s6224_s28 = sld [smem:[#allocation2 + $0x84]] }
  0x2f   :  { %5388 = vmatprep.mubr.msk.bf16.mxu1 %vm5898_vm0, %v7853_v1 }
  0xe8   :  { %v874_v17 = vpop.f32.mrb[0].mxu0 }
  0xe9   :  { %v929_v18 = vpop.f32.mrb[0].mxu1  ;;  %v5336_v19 = vpop.f32.mrb[1].mxu0 }
  0xea   :  { %v5342_v20 = vpop.f32.mrb[1].mxu1  ;;  %v877_v21 = vpop.f32.mrb[2].mxu0  ;;  %v6154_v19 = vstv %s5038_s30  ;;  %s6752_s30 = sld [smem:[#allocation2 + $0x200]] }
  0xeb   :  { %v1266_v22 = vpack.c.bf16 %v877_v21, %v874_v17  ;;  %v932_v23 = vpop.f32.mrb[2].mxu1  ;;  %v5337_v24 = vpop.f32.mrb[3].mxu0  ;;  %v6160_v20 = vstv %s5043_s16  ;;  %v1674_v21 = vstv %s6141_s17  ;;  %s6754_s16 = sld [smem:[#allocation2 + $0x201]]  ;;  %s3618_s17 = sld [smem:[#allocation2]] }
  0xec   :  { %v1267_v25 = vpack.c.bf16 %v932_v23, %v929_v18  ;;  %v5343_v26 = vpop.f32.mrb[3].mxu1  ;;  %v1723_v18 = vstv %s6139_s29  ;;  %v1726_v23 = vstv %s6145_s19  ;;  %s4978_s19 = sld [smem:[#allocation2 + $0x101]]  ;;  %s7284_s29 = sld [smem:[#allocation2 + $0x284]] }
  0xed   :  { %5381 = vmatpush3.bf16.msra.mxu0 %v1266_v22  ;;  %v1700_v22 = vstv %s6143_s18  ;;  %s5051_s18 = sld [smem:[#allocation2 + $0x104]] }
  0xee   :  { %5387 = vmatpush3.bf16.msra.mxu1 %v1267_v25  ;;  %5392 = vmatprep.subr.bf16.mxu0 %v7853_v1 }
  0xef   :  { %5398 = vmatprep.subr.bf16.mxu1 %v7853_v1 }
  0xf0   :  { %v984_v29 = vpop.f32.mrb[4].mxu0  ;;  %5383 = vmatmul.mubr.msk.bf16.vlgmr.msra.gmra.mrb[16].mxu0 %vm514_vm1, %v788_v27 }
  0xf1   :  { %v1039_v30 = vpop.f32.mrb[4].mxu1  ;;  %5389 = vmatmul.mubr.msk.bf16.vlgmr.msra.gmra.mrb[16].mxu1 %vm514_vm1, %v789_v28  ;;  %v5348_v31 = vpop.f32.mrb[5].mxu0  ;;  %5394 = vmatprep.mubr.msk.bf16.mxu0 %vm5898_vm0, %v7853_v1 }
  0xf2   :  { %v5354_v32 = vpop.f32.mrb[5].mxu1  ;;  %v987_v33 = vpop.f32.mrb[6].mxu0  ;;  %5400 = vmatprep.mubr.msk.bf16.mxu1 %vm5898_vm0, %v7853_v1 }
  0xf3   :  { %v1268_v34 = vpack.c.bf16 %v987_v33, %v984_v29  ;;  %v1042_v35 = vpop.f32.mrb[6].mxu1  ;;  %v5349_v36 = vpop.f32.mrb[7].mxu0 }
  0xf4   :  { %v1269_v37 = vpack.c.bf16 %v1042_v35, %v1039_v30  ;;  %v5355_v38 = vpop.f32.mrb[7].mxu1 }
  0xf5   :  { %5393 = vmatpush3.bf16.msra.mxu0 %v1268_v34 }
  0xf6   :  { %5399 = vmatpush3.bf16.msra.mxu1 %v1269_v37  ;;  %5404 = vmatprep.subr.bf16.mxu0 %v7853_v1 }
  0xf7   :  { %5410 = vmatprep.subr.bf16.mxu1 %v7853_v1 }
  0xf8   :  { %v1094_v41 = vpop.f32.mrb[8].mxu0  ;;  %5395 = vmatmul.mubr.msk.bf16.vlgmr.msra.gmra.mrb[20].mxu0 %vm514_vm1, %v790_v39 }
  0xf9   :  { %v1149_v42 = vpop.f32.mrb[8].mxu1  ;;  %5401 = vmatmul.mubr.msk.bf16.vlgmr.msra.gmra.mrb[20].mxu1 %vm514_vm1, %v791_v40  ;;  %v5360_v43 = vpop.f32.mrb[9].mxu0  ;;  %5406 = vmatprep.mubr.msk.bf16.mxu0 %vm5898_vm0, %v7853_v1 }
  0xfa   :  { %v5366_v44 = vpop.f32.mrb[9].mxu1  ;;  %v1097_v45 = vpop.f32.mrb[10].mxu0  ;;  %5412 = vmatprep.mubr.msk.bf16.mxu1 %vm5898_vm0, %v7853_v1 }
  0xfb   :  { %v1270_v46 = vpack.c.bf16 %v1097_v45, %v1094_v41  ;;  %v1152_v47 = vpop.f32.mrb[10].mxu1  ;;  %v5361_v48 = vpop.f32.mrb[11].mxu0 }
  0xfc   :  { %v1271_v49 = vpack.c.bf16 %v1152_v47, %v1149_v42  ;;  %v5367_v50 = vpop.f32.mrb[11].mxu1 }
  0xfd   :  { %5405 = vmatpush3.bf16.msra.mxu0 %v1270_v46 }
  0xfe   :  { %5411 = vmatpush3.bf16.msra.mxu1 %v1271_v49  ;;  %5416 = vmatprep.subr.bf16.mxu0 %v7853_v1 }
  0xff   :  { %5422 = vmatprep.subr.bf16.mxu1 %v7853_v1 }
 0x100   :  { %v1204_v53 = vpop.f32.mrb[12].mxu0  ;;  %5407 = vmatmul.mubr.msk.bf16.vlgmr.msra.gmra.mrb[24].mxu0 %vm514_vm1, %v792_v51 }
 0x101   :  { %v1259_v54 = vpop.f32.mrb[12].mxu1  ;;  %5413 = vmatmul.mubr.msk.bf16.vlgmr.msra.gmra.mrb[24].mxu1 %vm514_vm1, %v793_v52  ;;  %v5372_v55 = vpop.f32.mrb[13].mxu0  ;;  %5418 = vmatprep.mubr.msk.bf16.mxu0 %vm5898_vm0, %v7853_v1 }
 0x102   :  { %v5378_v56 = vpop.f32.mrb[13].mxu1  ;;  %v1207_v57 = vpop.f32.mrb[14].mxu0  ;;  %5424 = vmatprep.mubr.msk.bf16.mxu1 %vm5898_vm0, %v7853_v1 }
 0x103   :  { %v1272_v58 = vpack.c.bf16 %v1207_v57, %v1204_v53  ;;  %v1262_v59 = vpop.f32.mrb[14].mxu1  ;;  %v5373_v60 = vpop.f32.mrb[15].mxu0 }
 0x104   :  { %v1273_v61 = vpack.c.bf16 %v1262_v59, %v1259_v54  ;;  %v5379_v62 = vpop.f32.mrb[15].mxu1  ;;  %v6184_v60 = vstv %s6156_s20  ;;  %s5130_s20 = sld [smem:[#allocation2 + $0x82]] }
 0x105   :  { %5417 = vmatpush3.bf16.msra.mxu0 %v1272_v58  ;;  %v6190_v62 = vstv %s6165_s22  ;;  %s5126_s22 = sld [smem:[#allocation2 + $0x3]] }
 0x106   :  { %5423 = vmatpush3.bf16.msra.mxu1 %v1273_v61  ;;  %5428 = vmatprep.subr.bf16.mxu0 %v7853_v1  ;;  %v6187_v61 = vstv %s6158_s21  ;;  %s5002_s21 = sld [smem:[#allocation2 + $0x203]] }
 0x107   :  { %5434 = vmatprep.subr.bf16.mxu1 %v7853_v1 }
 0x108   :  { %5419 = vmatmul.mubr.msk.bf16.vlgmr.msra.gmra.mrb[28].mxu0 %vm514_vm1, %v794_v63  ;;  %v1704_v63 = vstv %s6167_s23  ;;  %s5056_s23 = sld [smem:[#allocation2 + $0x184]] }
 0x109   :  { %5425 = vmatmul.mubr.msk.bf16.vlgmr.msra.gmra.mrb[28].mxu1 %vm514_vm1, %v795_v0  ;;  %5430 = vmatprep.mubr.msk.bf16.mxu0 %vm5898_vm0, %v7853_v1 }
 0x10a   :  { %5436 = vmatprep.mubr.msk.bf16.mxu1 %vm5898_vm0, %v7853_v1  ;;  %5429 = vmatpush3.bf16.msra.mxu0 %v1764_v4 }
 0x10b   :  { %5435 = vmatpush3.bf16.msra.mxu1 %v1810_v5  ;;  %5440 = vmatprep.subr.bf16.mxu0 %v7853_v1 }
 0x10c   :  { %5446 = vmatprep.subr.bf16.mxu1 %v7853_v1 }
 0x1c3   :  { %v1311_v6 = vpop.f32.mrb[16].mxu0 }
 0x1c4   :  { %v1354_v7 = vpop.f32.mrb[16].mxu1  ;;  %v5384_v8 = vpop.f32.mrb[17].mxu0  ;;  %v1620_v24 = vmul.f32 %v6147_v13, %v1311_v6  ;;  %v1646_v25 = vmul.f32 %v6149_v14, %v1311_v6  ;;  %v1672_v26 = vmul.f32 %v1671_v15, %v1311_v6  ;;  %v1698_v27 = vmul.f32 %v1697_v16, %v1311_v6 }
 0x1c5   :  { %v5390_v9 = vpop.f32.mrb[17].mxu1  ;;  %v1314_v10 = vpop.f32.mrb[18].mxu0  ;;  %v1724_v28 = vmul.f32 %v1723_v18, %v1311_v6  ;;  %v1636_v29 = vmul.f32 %v6147_v13, %v1354_v7  ;;  %v1662_v30 = vmul.f32 %v6149_v14, %v1354_v7  ;;  %v1688_v31 = vmul.f32 %v1671_v15, %v1354_v7 }
 0x1c6   :  { %v1357_v11 = vpop.f32.mrb[18].mxu1  ;;  %v5385_v12 = vpop.f32.mrb[19].mxu0  ;;  %v1714_v56 = vmul.f32 %v1697_v16, %v1354_v7  ;;  %v1740_v57 = vmul.f32 %v1723_v18, %v1354_v7 }
 0x1c7   :  { %v5391_v17 = vpop.f32.mrb[19].mxu1 }
 0x1cb   :  { %v1397_v32 = vpop.f32.mrb[20].mxu0 }
 0x1cc   :  { %v1623_v33 = vmul.f32 %v6154_v19, %v1397_v32  ;;  %v1649_v34 = vmul.f32 %v6160_v20, %v1397_v32  ;;  %v1675_v35 = vmul.f32 %v1674_v21, %v1397_v32  ;;  %v1701_v36 = vmul.f32 %v1700_v22, %v1397_v32  ;;  %v1440_v37 = vpop.f32.mrb[20].mxu1  ;;  %v5396_v38 = vpop.f32.mrb[21].mxu0 }
 0x1cd   :  { %v1727_v39 = vmul.f32 %v1726_v23, %v1397_v32  ;;  %v1637_v40 = vmul.f32 %v6154_v19, %v1440_v37  ;;  %v1663_v41 = vmul.f32 %v6160_v20, %v1440_v37  ;;  %v1689_v42 = vmul.f32 %v1674_v21, %v1440_v37  ;;  %v5402_v43 = vpop.f32.mrb[21].mxu1  ;;  %v1400_v44 = vpop.f32.mrb[22].mxu0 }
 0x1ce   :  { %v1624_v45 = vadd.f32 %v1623_v33, %v1620_v24  ;;  %v1650_v46 = vadd.f32 %v1649_v34, %v1646_v25  ;;  %v1676_v47 = vadd.f32 %v1675_v35, %v1672_v26  ;;  %v1702_v48 = vadd.f32 %v1701_v36, %v1698_v27  ;;  %v1443_v49 = vpop.f32.mrb[22].mxu1  ;;  %v5397_v50 = vpop.f32.mrb[23].mxu0 }
 0x1cf   :  { %v1728_v51 = vadd.f32 %v1727_v39, %v1724_v28  ;;  %v1638_v52 = vadd.f32 %v1637_v40, %v1636_v29  ;;  %v1664_v53 = vadd.f32 %v1663_v41, %v1662_v30  ;;  %v1690_v54 = vadd.f32 %v1689_v42, %v1688_v31  ;;  %v5403_v55 = vpop.f32.mrb[23].mxu1 }
 0x1d0   :  { %v1715_v58 = vmul.f32 %v1700_v22, %v1440_v37  ;;  %v1741_v59 = vmul.f32 %v1726_v23, %v1440_v37  ;;  %v6209_v34 = vstv %s6179_s4  ;;  %v6212_v35 = vstv %s6181_s5  ;;  %s4986_s4 = sld [smem:[#allocation2 + $0x180]]  ;;  %s6683_s5 = sld [smem:[#allocation2 + $0x181]] }
 0x1d1   :  { %v6215_v36 = vstv %s6193_s25  ;;  %v6218_v37 = vstv %s6195_s26  ;;  %v1734_v40 = vstv %s6198_s3  ;;  %v6222_v42 = vstv %s6200_s27  ;;  %s5061_s26 = sld [smem:[#allocation2 + $0x204]] }
 0x1d2   :  { %v1716_v0 = vadd.f32 %v1715_v58, %v1714_v56  ;;  %v1742_v2 = vadd.f32 %v1741_v59, %v1740_v57  ;;  %s5132_s25 = sld [smem:[#allocation2 + $0x84]] }
 0x1d3   :  { %v1483_v4 = vpop.f32.mrb[24].mxu0  ;;  %s5147_s3 = sld [smem:[#allocation2 + $0x204]] }
 0x1d4   :  { %v1627_v5 = vmul.f32 %v6184_v60, %v1483_v4  ;;  %v1653_v6 = vmul.f32 %v6187_v61, %v1483_v4  ;;  %v1679_v7 = vmul.f32 %v6190_v62, %v1483_v4  ;;  %v1705_v8 = vmul.f32 %v1704_v63, %v1483_v4  ;;  %v1526_v9 = vpop.f32.mrb[24].mxu1  ;;  %v5408_v10 = vpop.f32.mrb[25].mxu0 }
 0x1d5   :  { %v1731_v11 = vmul.f32 %v1730_v3, %v1483_v4  ;;  %v1639_v12 = vmul.f32 %v6184_v60, %v1526_v9  ;;  %v1665_v15 = vmul.f32 %v6187_v61, %v1526_v9  ;;  %v1691_v16 = vmul.f32 %v6190_v62, %v1526_v9  ;;  %v5414_v17 = vpop.f32.mrb[25].mxu1  ;;  %v1486_v18 = vpop.f32.mrb[26].mxu0  ;;  %v799_v10 = vld [vmem:[%s7843_s6 + $0xc] sm:$0xf] }
 0x1d6   :  { %v1628_v21 = vadd.f32 %v1627_v5, %v1624_v45  ;;  %v1654_v22 = vadd.f32 %v1653_v6, %v1650_v46  ;;  %v1680_v23 = vadd.f32 %v1679_v7, %v1676_v47  ;;  %v1706_v24 = vadd.f32 %v1705_v8, %v1702_v48  ;;  %v1529_v25 = vpop.f32.mrb[26].mxu1  ;;  %v5409_v26 = vpop.f32.mrb[27].mxu0  ;;  %v798_v6 = vld [vmem:[%s7843_s6 + $0x8] sm:$0xf] }
 0x1d7   :  { %v1732_v27 = vadd.f32 %v1731_v11, %v1728_v51  ;;  %v1640_v28 = vadd.f32 %v1639_v12, %v1638_v52  ;;  %v1666_v29 = vadd.f32 %v1665_v15, %v1664_v53  ;;  %v1692_v30 = vadd.f32 %v1691_v16, %v1690_v54  ;;  %v5415_v31 = vpop.f32.mrb[27].mxu1  ;;  %v800_v25 = vld [vmem:[%s7843_s6 + $0x10] sm:$0xf]  ;;  %v801_v26 = vld [vmem:[%s7843_s6 + $0x14] sm:$0xf] }
 0x1d8   :  { %v1717_v32 = vmul.f32 %v1704_v63, %v1526_v9  ;;  %v1743_v33 = vmul.f32 %v1730_v3, %v1526_v9  ;;  %v1856_v17 = vsel %vm1762_vm2, %v798_v6, 0  ;;  %v6271_v31 = vstv %s5051_s18  ;;  %s4976_s18 = sld [smem:[#allocation2 + $0x100]] }
 0x1da   :  { %v1718_v38 = vadd.f32 %v1717_v32, %v1716_v0  ;;  %v1744_v39 = vadd.f32 %v1743_v33, %v1742_v2 }
 0x1db   :  { %v1569_v41 = vpop.f32.mrb[28].mxu0 }
 0x1dc   :  { %v1631_v43 = vmul.f32 %v6209_v34, %v1569_v41  ;;  %v1657_v44 = vmul.f32 %v6212_v35, %v1569_v41  ;;  %v1683_v45 = vmul.f32 %v6215_v36, %v1569_v41  ;;  %v1709_v46 = vmul.f32 %v6218_v37, %v1569_v41  ;;  %v1612_v47 = vpop.f32.mrb[28].mxu1  ;;  %v5420_v48 = vpop.f32.mrb[29].mxu0 }
 0x1dd   :  { %v1735_v49 = vmul.f32 %v1734_v40, %v1569_v41  ;;  %v1641_v50 = vmul.f32 %v6209_v34, %v1612_v47  ;;  %v1667_v51 = vmul.f32 %v6212_v35, %v1612_v47  ;;  %v1693_v52 = vmul.f32 %v6215_v36, %v1612_v47  ;;  %v5426_v53 = vpop.f32.mrb[29].mxu1  ;;  %v1572_v54 = vpop.f32.mrb[30].mxu0  ;;  %v804_v48 = vld [vmem:[%s7843_s6 + $0x20] sm:$0xf] }
 0x1de   :  { %v1632_v55 = vadd.f32 %v1631_v43, %v1628_v21  ;;  %v1658_v56 = vadd.f32 %v1657_v44, %v1654_v22  ;;  %v1684_v57 = vadd.f32 %v1683_v45, %v1680_v23  ;;  %v6233_v58 = vadd.f32 %v1709_v46, %v1706_v24  ;;  %v1615_v59 = vpop.f32.mrb[30].mxu1  ;;  %v5421_v63 = vpop.f32.mrb[31].mxu0 }
 0x1df   :  { %v6235_v0 = vadd.f32 %v1735_v49, %v1732_v27  ;;  %v1642_v2 = vadd.f32 %v1641_v50, %v1640_v28  ;;  %v1668_v3 = vadd.f32 %v1667_v51, %v1666_v29  ;;  %v1694_v4 = vadd.f32 %v1693_v52, %v1692_v30  ;;  %v5427_v5 = vpop.f32.mrb[31].mxu1  ;;  %v805_v49 = vld [vmem:[%s7843_s6 + $0x24] sm:$0xf] }
 0x1e0   :  { %v1719_v7 = vmul.f32 %v6218_v37, %v1612_v47  ;;  %v1745_v8 = vmul.f32 %v1734_v40, %v1612_v47  ;;  %v1635_v9 = vadd.f32 %v6222_v42, %v1632_v55  ;;  %v1902_v21 = vsel %vm1762_vm2, %v799_v10, 0  ;;  %v6335_v59 = vld [vmem:[%s7837_s0] sm:$0xff] }
 0x1e1   :  { %v1643_v11 = vadd.f32 %v1642_v2, %v6222_v42  ;;  %v6251_v22 = vstv %s6224_s28  ;;  %v1948_v28 = vsel %vm1762_vm2, %v800_v25, 0  ;;  %v1994_v30 = vsel %vm1762_vm2, %v801_v26, 0  ;;  %v6340_v63 = vld [vmem:[%s7837_s0 + $0x20] sm:$0xff] }
 0x1e2   :  { %v1720_v12 = vadd.f32 %v1719_v7, %v1718_v38  ;;  %v6246_v15 = vadd.f32 %v1745_v8, %v1744_v39  ;;  %v1748_v16 = vpack.c.bf16 %v1635_v9, %v1635_v9  ;;  %v1661_v23 = vadd.f32 %v6251_v22, %v1658_v56  ;;  %v802_v38 = vld [vmem:[%s7843_s6 + $0x18] sm:$0xf]  ;;  %v803_v39 = vld [vmem:[%s7843_s6 + $0x1c] sm:$0xf]  ;;  %v6350_v2 = vld [vmem:[%s7837_s0 + $0x60] sm:$0xff]  ;;  %s7286_s6 = sld [smem:[#allocation2 + $0x300]] }
 0x1e3   :  { %v1749_v18 = vpack.c.bf16 %v1643_v11, %v1643_v11  ;;  %v1669_v24 = vadd.f32 %v1668_v3, %v6251_v22  ;;  %v1687_v32 = vadd.f32 %v6271_v31, %v1684_v57  ;;  %v1695_v33 = vadd.f32 %v1694_v4, %v6271_v31  ;;  %v5786_v26 = vld [vmem:[%s7844_s7] sm:$0xff]  }
 0x1e4   :  { %5431 = vmatmul.mubr.msk.bf16.vlgmr.msra.gmra.mrb[32].mxu0 %vm1758_vm3, %v1748_v16  ;;  %v1750_v27 = vpack.c.bf16 %v1661_v23, %v1661_v23  ;;  %v2040_v41 = vsel %vm1762_vm2, %v802_v38, 0  ;;  %v2086_v44 = vsel %vm1762_vm2, %v803_v39, 0  ;;  %v6291_v45 = vstv %s5056_s23  ;;  %s5131_s23 = sld [smem:[#allocation2 + $0x83]] }
 0x1e5   :  { %5437 = vmatmul.mubr.msk.bf16.vlgmr.msra.gmra.mrb[32].mxu1 %vm1758_vm3, %v1749_v18  ;;  %5441 = vmatpush3.bf16.msra.mxu0 %v1856_v17  ;;  %v1751_v29 = vpack.c.bf16 %v1669_v24, %v1669_v24  ;;  %v1752_v40 = vpack.c.bf16 %v1687_v32, %v1687_v32  ;;  %v1753_v43 = vpack.c.bf16 %v1695_v33, %v1695_v33  ;;  %v2132_v51 = vsel %vm1762_vm2, %v804_v48, 0 }
 0x1e6   :  { %5447 = vmatpush3.bf16.msra.mxu1 %v1902_v21  ;;  %5442 = vmatprep.mubr.msk.bf16.mxu0 %vm5898_vm0, %v7853_v1  ;;  %v1713_v46 = vadd.f32 %v6291_v45, %v6233_v58  ;;  %v1721_v47 = vadd.f32 %v1720_v12, %v6291_v45  ;;  %v2178_v53 = vsel %vm1762_vm2, %v805_v49, 0  ;;  %v6312_v54 = vstv %s5061_s26  ;;  %s5137_s26 = sld [smem:[#allocation2 + $0x104]] }
 0x1e7   :  { %5448 = vmatprep.mubr.msk.bf16.mxu1 %vm5898_vm0, %v7853_v1  ;;  %5452 = vmatprep.subr.bf16.mxu0 %v7853_v1  ;;  %v1739_v55 = vadd.f32 %v6312_v54, %v6235_v0  ;;  %v1747_v56 = vadd.f32 %v6246_v15, %v6312_v54  ;;  %v6345_v0 = vld [vmem:[%s7837_s0 + $0x40] sm:$0xff]  ;;  %v96_v3 = vmul.f32 %v6147_v13, %v6335_v59 }
 0x1e8   :  { %5458 = vmatprep.subr.bf16.mxu1 %v7853_v1  ;;  %v1754_v50 = vpack.c.bf16 %v1713_v46, %v1713_v46  ;;  %v1755_v52 = vpack.c.bf16 %v1721_v47, %v1721_v47  ;;  %v104_v4 = vmul.f32 %v6154_v19, %v6340_v63  ;;  %v116_v5 = vmul.f32 %v6184_v60, %v6345_v0  ;;  %v5788_v47 = vld [vmem:[%s7844_s7 + $0x10] sm:$0xff]  }
 0x1e9   :  { %v1756_v57 = vpack.c.bf16 %v1739_v55, %v1739_v55  ;;  %v1757_v58 = vpack.c.bf16 %v1747_v56, %v1747_v56  ;;  %v128_v7 = vmul.f32 %v6209_v34, %v6350_v2 }
 0x1ea   :  { %v106_v6 = vadd.f32 %v104_v4, %v96_v3 }
 0x1ec   :  { %5443 = vmatmul.mubr.msk.bf16.vlgmr.msra.gmra.mrb[36].mxu0 %vm1758_vm3, %v1750_v27  ;;  %v118_v8 = vadd.f32 %v116_v5, %v106_v6  ;;  %v5790_v6 = vld [vmem:[%s7844_s7 + $0x20] sm:$0xff]  }
 0x1ed   :  { %5449 = vmatmul.mubr.msk.bf16.vlgmr.msra.gmra.mrb[36].mxu1 %vm1758_vm3, %v1751_v29  ;;  %5453 = vmatpush3.bf16.msra.mxu0 %v1948_v28  ;;  %v5787_v29 = vld [vmem:[%s7844_s7 + $0x8] sm:$0xff]  }
 0x1ee   :  { %5459 = vmatpush3.bf16.msra.mxu1 %v1994_v30  ;;  %5454 = vmatprep.mubr.msk.bf16.mxu0 %vm5898_vm0, %v7853_v1  ;;  %v130_v9 = vadd.f32 %v128_v7, %v118_v8 }
 0x1ef   :  { %5460 = vmatprep.mubr.msk.bf16.mxu1 %vm5898_vm0, %v7853_v1  ;;  %5464 = vmatprep.subr.bf16.mxu0 %v7853_v1 }
 0x1f0   :  { %5470 = vmatprep.subr.bf16.mxu1 %v7853_v1  ;;  %v6361_v10 = vadd.f32 %v6222_v42, %v130_v9  ;;  %v5791_v9 = vld [vmem:[%s7844_s7 + $0x28] sm:$0xff]  }
 0x1f2   :  { %7896 = vst [vmem:[#allocation8_spill] sm:$0xff] %v6361_v10  ;;  %515 = vst.msk [vmem:[%s7850_s13] sm:$0xff] %vm514_vm1, %v6361_v10 }
 0x1f4   :  { %5455 = vmatmul.mubr.msk.bf16.vlgmr.msra.gmra.mrb[40].mxu0 %vm1758_vm3, %v1752_v40 }
 0x1f5   :  { %5461 = vmatmul.mubr.msk.bf16.vlgmr.msra.gmra.mrb[40].mxu1 %vm1758_vm3, %v1753_v43  ;;  %5465 = vmatpush3.bf16.msra.mxu0 %v2040_v41 }
 0x1f6   :  { %5471 = vmatpush3.bf16.msra.mxu1 %v2086_v44  ;;  %5466 = vmatprep.mubr.msk.bf16.mxu0 %vm5898_vm0, %v7853_v1 }
 0x1f7   :  { %5472 = vmatprep.mubr.msk.bf16.mxu1 %vm5898_vm0, %v7853_v1  ;;  %5476 = vmatprep.subr.bf16.mxu0 %v7853_v1 }
 0x1f8   :  { %5482 = vmatprep.subr.bf16.mxu1 %v7853_v1 }
 0x1fc   :  { %5467 = vmatmul.mubr.msk.bf16.vlgmr.msra.gmra.mrb[44].mxu0 %vm1758_vm3, %v1754_v50  ;;  %v5789_v50 = vld [vmem:[%s7844_s7 + $0x18] sm:$0xff]  }
 0x1fd   :  { %5473 = vmatmul.mubr.msk.bf16.vlgmr.msra.gmra.mrb[44].mxu1 %vm1758_vm3, %v1755_v52  ;;  %5477 = vmatpush3.bf16.msra.mxu0 %v2132_v51 }
 0x1fe   :  { %5483 = vmatpush3.bf16.msra.mxu1 %v2178_v53  ;;  %5478 = vmatprep.mubr.msk.bf16.mxu0 %vm5898_vm0, %v7853_v1 }
 0x1ff   :  { %5484 = vmatprep.mubr.msk.bf16.mxu1 %vm5898_vm0, %v7853_v1  ;;  %5488 = vmatprep.subr.bf16.mxu0 %v7853_v1 }
 0x200   :  { %5494 = vmatprep.subr.bf16.mxu1 %v7853_v1 }
 0x204   :  { %5479 = vmatmul.mubr.msk.bf16.vlgmr.msra.gmra.mrb[48].mxu0 %vm1758_vm3, %v1756_v57 }
 0x205   :  { %5485 = vmatmul.mubr.msk.bf16.vlgmr.msra.gmra.mrb[48].mxu1 %vm1758_vm3, %v1757_v58  ;;  %5490 = vmatprep.mubr.msk.bf16.mxu0 %vm5898_vm0, %v7853_v1 }
 0x206   :  { %5496 = vmatprep.mubr.msk.bf16.mxu1 %vm5898_vm0, %v7853_v1 }
 0x2b7   :  { %v1800_v11 = vpop.f32.mrb[32].mxu0 }
 0x2b8   :  { %v2220_v12 = vpack.c.bf16 %v1800_v11, %v1800_v11  ;;  %v1846_v15 = vpop.f32.mrb[32].mxu1  ;;  %v5432_v16 = vpop.f32.mrb[33].mxu0 }
 0x2b9   :  { %v2221_v17 = vpack.c.bf16 %v1846_v15, %v1846_v15  ;;  %v5438_v18 = vpop.f32.mrb[33].mxu1  ;;  %v1803_v21 = vpop.f32.mrb[34].mxu0 }
 0x2ba   :  { %v2239_v23 = vsel %vm1762_vm2, %v2220_v12, 0  ;;  %v1849_v24 = vpop.f32.mrb[34].mxu1  ;;  %v5433_v25 = vpop.f32.mrb[35].mxu0 }
 0x2bb   :  { %v2291_v27 = vsel %vm1762_vm2, %v2221_v17, 0  ;;  %v5439_v28 = vpop.f32.mrb[35].mxu1  ;;  %5489 = vmatpush3.bf16.msra.mxu0 %v2239_v23 }
 0x2bc   :  { %5495 = vmatpush3.bf16.msra.mxu1 %v2291_v27  ;;  %5500 = vmatprep.subr.bf16.mxu0 %v7853_v1 }
 0x2bd   :  { %5506 = vmatprep.subr.bf16.mxu1 %v7853_v1 }
 0x2be   :  { %5491 = vmatmul.mubr.msk.bf16.vlgmr.msra.gmra.mrb[52].mxu0 %vm1758_vm3, %v5786_v26  ;;  %v5792_v26 = vld [vmem:[%s7844_s7 + $0x30] sm:$0xff]  }
 0x2bf   :  { %5497 = vmatmul.mubr.msk.bf16.vlgmr.msra.gmra.mrb[52].mxu1 %vm1758_vm3, %v5787_v29  ;;  %v1892_v30 = vpop.f32.mrb[36].mxu0  ;;  %5502 = vmatprep.mubr.msk.bf16.mxu0 %vm5898_vm0, %v7853_v1  ;;  %v5793_v29 = vld [vmem:[%s7844_s7 + $0x38] sm:$0xff]  }
 0x2c0   :  { %v2222_v32 = vpack.c.bf16 %v1892_v30, %v1892_v30  ;;  %v1938_v33 = vpop.f32.mrb[36].mxu1  ;;  %v5444_v38 = vpop.f32.mrb[37].mxu0  ;;  %5508 = vmatprep.mubr.msk.bf16.mxu1 %vm5898_vm0, %v7853_v1 }
 0x2c1   :  { %v2223_v39 = vpack.c.bf16 %v1938_v33, %v1938_v33  ;;  %v5450_v40 = vpop.f32.mrb[37].mxu1  ;;  %v1895_v41 = vpop.f32.mrb[38].mxu0 }
 0x2c2   :  { %v2343_v43 = vsel %vm1762_vm2, %v2222_v32, 0  ;;  %v1941_v44 = vpop.f32.mrb[38].mxu1  ;;  %v5445_v46 = vpop.f32.mrb[39].mxu0 }
 0x2c3   :  { %v2395_v48 = vsel %vm1762_vm2, %v2223_v39, 0  ;;  %v5451_v49 = vpop.f32.mrb[39].mxu1  ;;  %5501 = vmatpush3.bf16.msra.mxu0 %v2343_v43 }
 0x2c4   :  { %5507 = vmatpush3.bf16.msra.mxu1 %v2395_v48  ;;  %5512 = vmatprep.subr.bf16.mxu0 %v7853_v1 }
 0x2c5   :  { %5518 = vmatprep.subr.bf16.mxu1 %v7853_v1 }
 0x2c6   :  { %5503 = vmatmul.mubr.msk.bf16.vlgmr.msra.gmra.mrb[56].mxu0 %vm1758_vm3, %v5788_v47  ;;  %v5794_v47 = vld [vmem:[%s7844_s7 + $0x40] sm:$0xff]  }
 0x2c7   :  { %5509 = vmatmul.mubr.msk.bf16.vlgmr.msra.gmra.mrb[56].mxu1 %vm1758_vm3, %v5789_v50  ;;  %v1984_v51 = vpop.f32.mrb[40].mxu0  ;;  %5514 = vmatprep.mubr.msk.bf16.mxu0 %vm5898_vm0, %v7853_v1  ;;  %v5795_v50 = vld [vmem:[%s7844_s7 + $0x48] sm:$0xff]   ;;  %s4990_s7 = sld [smem:[#allocation2 + $0x182]] }
 0x2c8   :  { %v2224_v52 = vpack.c.bf16 %v1984_v51, %v1984_v51  ;;  %v2030_v53 = vpop.f32.mrb[40].mxu1  ;;  %v5456_v55 = vpop.f32.mrb[41].mxu0  ;;  %5520 = vmatprep.mubr.msk.bf16.mxu1 %vm5898_vm0, %v7853_v1  ;;  %v5796_v51 = vld [vmem:[%s7845_s8] sm:$0xff]  }
 0x2c9   :  { %v2225_v56 = vpack.c.bf16 %v2030_v53, %v2030_v53  ;;  %v5462_v57 = vpop.f32.mrb[41].mxu1  ;;  %v1987_v58 = vpop.f32.mrb[42].mxu0  ;;  %v5798_v53 = vld [vmem:[%s7845_s8 + $0x10] sm:$0xff]   ;;  %v5799_v55 = vld [vmem:[%s7845_s8 + $0x18] sm:$0xff]  }
 0x2ca   :  { %v2447_v3 = vsel %vm1762_vm2, %v2224_v52, 0  ;;  %v2033_v4 = vpop.f32.mrb[42].mxu1  ;;  %v5457_v5 = vpop.f32.mrb[43].mxu0  ;;  %v5797_v52 = vld [vmem:[%s7845_s8 + $0x8] sm:$0xff]   ;;  %v5800_v58 = vld [vmem:[%s7845_s8 + $0x20] sm:$0xff]  }
 0x2cb   :  { %v2499_v7 = vsel %vm1762_vm2, %v2225_v56, 0  ;;  %v5463_v8 = vpop.f32.mrb[43].mxu1  ;;  %5513 = vmatpush3.bf16.msra.mxu0 %v2447_v3  ;;  %v5832_v56 = vld [vmem:[%s7838_s1] sm:$0xff]   ;;  %v5833_v57 = vld [vmem:[%s7838_s1 + $0x8] sm:$0xff]   ;;  %v5834_v4 = vld [vmem:[%s7838_s1 + $0x10] sm:$0xff]  }
 0x2cc   :  { %5519 = vmatpush3.bf16.msra.mxu1 %v2499_v7  ;;  %5524 = vmatprep.subr.bf16.mxu0 %v7853_v1  ;;  %v5801_v3 = vld [vmem:[%s7845_s8 + $0x28] sm:$0xff]   ;;  %v5835_v5 = vld [vmem:[%s7838_s1 + $0x18] sm:$0xff]   ;;  %v5836_v8 = vld [vmem:[%s7838_s1 + $0x20] sm:$0xff]  }
 0x2cd   :  { %5530 = vmatprep.subr.bf16.mxu1 %v7853_v1  ;;  %v5803_v7 = vld [vmem:[%s7845_s8 + $0x38] sm:$0xff]  }
 0x2ce   :  { %5515 = vmatmul.mubr.msk.bf16.vlgmr.msra.gmra.mrb[60].mxu0 %vm1758_vm3, %v5790_v6  ;;  %v5802_v6 = vld [vmem:[%s7845_s8 + $0x30] sm:$0xff]   ;;  %s7456_s8 = sld [smem:[#allocation2 + $0x401]] }
 0x2cf   :  { %5521 = vmatmul.mubr.msk.bf16.vlgmr.msra.gmra.mrb[60].mxu1 %vm1758_vm3, %v5791_v9  ;;  %v2076_v11 = vpop.f32.mrb[44].mxu0  ;;  %5526 = vmatprep.mubr.msk.bf16.mxu0 %vm5898_vm0, %v7853_v1  ;;  %v5837_v9 = vld [vmem:[%s7838_s1 + $0x28] sm:$0xff]  }
 0x2d0   :  { %v2226_v12 = vpack.c.bf16 %v2076_v11, %v2076_v11  ;;  %v2122_v15 = vpop.f32.mrb[44].mxu1  ;;  %v5468_v16 = vpop.f32.mrb[45].mxu0  ;;  %5532 = vmatprep.mubr.msk.bf16.mxu1 %vm5898_vm0, %v7853_v1  ;;  %v5838_v11 = vld [vmem:[%s7838_s1 + $0x30] sm:$0xff]  }
 0x2d1   :  { %v2227_v17 = vpack.c.bf16 %v2122_v15, %v2122_v15  ;;  %v5474_v18 = vpop.f32.mrb[45].mxu1  ;;  %v2079_v21 = vpop.f32.mrb[46].mxu0  ;;  %v6531_v15 = vld [vmem:[%s7837_s0 + $0x10] sm:$0xff] }
 0x2d2   :  { %v2551_v23 = vsel %vm1762_vm2, %v2226_v12, 0  ;;  %v2125_v24 = vpop.f32.mrb[46].mxu1  ;;  %v5469_v25 = vpop.f32.mrb[47].mxu0  ;;  %v5839_v12 = vld [vmem:[%s7838_s1 + $0x38] sm:$0xff]   ;;  %v6536_v16 = vld [vmem:[%s7837_s0 + $0x30] sm:$0xff]  ;;  %s5129_s1 = sld [smem:[#allocation2 + $0x81]] }
 0x2d3   :  { %v2603_v27 = vsel %vm1762_vm2, %v2227_v17, 0  ;;  %v5475_v28 = vpop.f32.mrb[47].mxu1  ;;  %5525 = vmatpush3.bf16.msra.mxu0 %v2551_v23  ;;  %v146_v17 = vmul.f32 %v6147_v13, %v6531_v15  ;;  %v150_v18 = vmul.f32 %v6154_v19, %v6536_v16  ;;  %v6545_v21 = vld [vmem:[%s7837_s0 + $0x50] sm:$0xff]  ;;  %v6550_v23 = vld [vmem:[%s7837_s0 + $0x8] sm:$0xff] }
 0x2d4   :  { %5531 = vmatpush3.bf16.msra.mxu1 %v2603_v27  ;;  %5536 = vmatprep.subr.bf16.mxu0 %v7853_v1  ;;  %v6555_v24 = vld [vmem:[%s7837_s0 + $0x28] sm:$0xff]  ;;  %v97_v27 = vmul.f32 %v6147_v13, %v6550_v23 }
 0x2d5   :  { %5542 = vmatprep.subr.bf16.mxu1 %v7853_v1  ;;  %v152_v25 = vadd.f32 %v150_v18, %v146_v17  ;;  %v105_v28 = vmul.f32 %v6154_v19, %v6555_v24 }
 0x2d6   :  { %5527 = vmatmul.mubr.msk.bf16.vlgmr.msra.gmra.mrb[64].mxu0 %vm1758_vm3, %v5792_v26  ;;  %v158_v26 = vmul.f32 %v6184_v60, %v6545_v21 }
 0x2d7   :  { %5533 = vmatmul.mubr.msk.bf16.vlgmr.msra.gmra.mrb[64].mxu1 %vm1758_vm3, %v5793_v29  ;;  %v2168_v30 = vpop.f32.mrb[48].mxu0  ;;  %5538 = vmatprep.mubr.msk.bf16.mxu0 %vm5898_vm0, %v7853_v1  ;;  %v6566_v29 = vld [vmem:[%s7837_s0 + $0x18] sm:$0xff] }
 0x2d8   :  { %v2228_v32 = vpack.c.bf16 %v2168_v30, %v2168_v30  ;;  %v2214_v33 = vpop.f32.mrb[48].mxu1  ;;  %v5480_v38 = vpop.f32.mrb[49].mxu0  ;;  %5544 = vmatprep.mubr.msk.bf16.mxu1 %vm5898_vm0, %v7853_v1  ;;  %v6571_v30 = vld [vmem:[%s7837_s0 + $0x38] sm:$0xff]  ;;  %v231_v17 = vmul.f32 %v6149_v14, %v6566_v29 }
 0x2d9   :  { %v2229_v39 = vpack.c.bf16 %v2214_v33, %v2214_v33  ;;  %v5486_v40 = vpop.f32.mrb[49].mxu1  ;;  %v2171_v41 = vpop.f32.mrb[50].mxu0  ;;  %v6581_v33 = vld [vmem:[%s7837_s0 + $0x48] sm:$0xff]  ;;  %v6586_v38 = vld [vmem:[%s7837_s0 + $0x58] sm:$0xff] }
 0x2da   :  { %v2655_v43 = vsel %vm1762_vm2, %v2228_v32, 0  ;;  %v2217_v44 = vpop.f32.mrb[50].mxu1  ;;  %v5481_v46 = vpop.f32.mrb[51].mxu0  ;;  %v6576_v32 = vld [vmem:[%s7837_s0 + $0x70] sm:$0xff]  ;;  %v151_v40 = vmul.f32 %v6154_v19, %v6571_v30  ;;  %v160_v41 = vadd.f32 %v158_v26, %v152_v25  ;;  %v159_v19 = vmul.f32 %v6184_v60, %v6586_v38 }
 0x2db   :  { %v2707_v48 = vsel %vm1762_vm2, %v2229_v39, 0  ;;  %v5487_v49 = vpop.f32.mrb[51].mxu1  ;;  %5537 = vmatpush3.bf16.msra.mxu0 %v2655_v43  ;;  %v147_v39 = vmul.f32 %v6147_v13, %v6566_v29  ;;  %v166_v43 = vmul.f32 %v6209_v34, %v6576_v32  ;;  %v107_v44 = vadd.f32 %v105_v28, %v97_v27  ;;  %v6604_v13 = vld [vmem:[%s7837_s0 + $0x78] sm:$0xff] }
 0x2dc   :  { %5543 = vmatpush3.bf16.msra.mxu1 %v2707_v48  ;;  %5548 = vmatprep.subr.bf16.mxu0 %v7853_v1  ;;  %v117_v46 = vmul.f32 %v6184_v60, %v6581_v33  ;;  %v201_v26 = vmul.f32 %v6187_v61, %v6581_v33  ;;  %v235_v27 = vmul.f32 %v6160_v20, %v6571_v30 }
 0x2dd   :  { %5554 = vmatprep.subr.bf16.mxu1 %v7853_v1  ;;  %v153_v48 = vadd.f32 %v151_v40, %v147_v39  ;;  %v168_v49 = vadd.f32 %v166_v43, %v160_v41  ;;  %v243_v28 = vmul.f32 %v6187_v61, %v6586_v38  ;;  %v251_v43 = vmul.f32 %v6212_v35, %v6604_v13 }
 0x2de   :  { %5539 = vmatmul.mubr.msk.bf16.vlgmr.msra.gmra.mrb[68].mxu0 %vm1758_vm3, %v5794_v47  ;;  %v6599_v47 = vld [vmem:[%s7837_s0 + $0x68] sm:$0xff] }
 0x2df   :  { %5545 = vmatmul.mubr.msk.bf16.vlgmr.msra.gmra.mrb[68].mxu1 %vm1758_vm3, %v5795_v50  ;;  %5549 = vmatpush3.bf16.msra.mxu0 %v5796_v51  ;;  %v119_v50 = vadd.f32 %v117_v46, %v107_v44  ;;  %v129_v51 = vmul.f32 %v6209_v34, %v6599_v47  ;;  %v213_v41 = vmul.f32 %v6212_v35, %v6599_v47 }
 0x2e0   :  { %5555 = vmatpush3.bf16.msra.mxu1 %v5797_v52  ;;  %5550 = vmatprep.mubr.msk.bf16.mxu0 %vm5898_vm0, %v7853_v1  ;;  %v167_v52 = vmul.f32 %v6209_v34, %v6604_v13  ;;  %v230_v34 = vmul.f32 %v6149_v14, %v6531_v15  ;;  %v237_v46 = vadd.f32 %v235_v27, %v231_v17 }
 0x2e1   :  { %5556 = vmatprep.mubr.msk.bf16.mxu1 %vm5898_vm0, %v7853_v1  ;;  %5560 = vmatprep.subr.bf16.mxu0 %v7853_v1 }
 0x2e2   :  { %5566 = vmatprep.subr.bf16.mxu1 %v7853_v1 }
 0x2e6   :  { %5551 = vmatmul.mubr.msk.bf16.vlgmr.msra.gmra.mrb[72].mxu0 %vm514_vm1, %v5832_v56  ;;  %v131_v56 = vadd.f32 %v129_v51, %v119_v50 }
 0x2e7   :  { %5557 = vmatmul.mubr.msk.bf16.vlgmr.msra.gmra.mrb[72].mxu1 %vm514_vm1, %v5833_v57  ;;  %5561 = vmatpush3.bf16.msra.mxu0 %v5798_v53  ;;  %v161_v53 = vadd.f32 %v159_v19, %v153_v48  ;;  %v180_v57 = vmul.f32 %v6149_v14, %v6335_v59  ;;  %v6668_v48 = vstv %s4976_s18  ;;  %v6670_v19 = vstv %s4978_s19  ;;  %s6774_s19 = sld [smem:[#allocation2 + $0x202]]  ;;  %s5128_s18 = sld [smem:[#allocation2 + $0x80]] }
 0x2e8   :  { %5567 = vmatpush3.bf16.msra.mxu1 %v5799_v55  ;;  %5562 = vmatprep.mubr.msk.bf16.mxu0 %vm5898_vm0, %v7853_v1  ;;  %v6613_v55 = vadd.f32 %v6222_v42, %v168_v49  ;;  %v272_v50 = vmul.f32 %v6670_v19, %v6340_v63 }
 0x2e9   :  { %5568 = vmatprep.mubr.msk.bf16.mxu1 %vm5898_vm0, %v7853_v1  ;;  %5572 = vmatprep.subr.bf16.mxu0 %v7853_v1  ;;  %v169_v60 = vadd.f32 %v167_v52, %v161_v53  ;;  %v245_v52 = vadd.f32 %v243_v28, %v237_v46  ;;  %v296_v53 = vmul.f32 %v6215_v36, %v6350_v2 }
 0x2ea   :  { %5578 = vmatprep.subr.bf16.mxu1 %v7853_v1  ;;  %7897 = vst [vmem:[#allocation9_spill] sm:$0xff] %v6613_v55  ;;  %517 = vst.msk [vmem:[%s7850_s13 + $0x10] sm:$0xff] %vm514_vm1, %v6613_v55  ;;  %v297_v28 = vmul.f32 %v6215_v36, %v6599_v47 }
 0x2ee   :  { %5563 = vmatmul.mubr.msk.bf16.vlgmr.msra.gmra.mrb[76].mxu0 %vm514_vm1, %v5834_v4  ;;  %v212_v4 = vmul.f32 %v6212_v35, %v6350_v2 }
 0x2ef   :  { %5569 = vmatmul.mubr.msk.bf16.vlgmr.msra.gmra.mrb[76].mxu1 %vm514_vm1, %v5835_v5  ;;  %5573 = vmatpush3.bf16.msra.mxu0 %v5800_v58  ;;  %v188_v58 = vmul.f32 %v6160_v20, %v6340_v63  ;;  %v6631_v5 = vadd.f32 %v6222_v42, %v131_v56 }
 0x2f0   :  { %5579 = vmatpush3.bf16.msra.mxu1 %v5801_v3  ;;  %5574 = vmatprep.mubr.msk.bf16.mxu0 %vm5898_vm0, %v7853_v1  ;;  %v200_v3 = vmul.f32 %v6187_v61, %v6345_v0 }
 0x2f1   :  { %5580 = vmatprep.mubr.msk.bf16.mxu1 %vm5898_vm0, %v7853_v1  ;;  %5584 = vmatprep.subr.bf16.mxu0 %v7853_v1  ;;  %7898 = vst [vmem:[#allocation10_spill] sm:$0xff] %v6631_v5  ;;  %516 = vst.msk [vmem:[%s7850_s13 + $0x8] sm:$0xff] %vm514_vm1, %v6631_v5 }
 0x2f2   :  { %5590 = vmatprep.subr.bf16.mxu1 %v7853_v1 }
 0x2f6   :  { %5575 = vmatmul.mubr.msk.bf16.vlgmr.msra.gmra.mrb[80].mxu0 %vm514_vm1, %v5836_v8  ;;  %v242_v8 = vmul.f32 %v6187_v61, %v6545_v21  ;;  %v264_v61 = vmul.f32 %v6668_v48, %v6335_v59 }
 0x2f7   :  { %5581 = vmatmul.mubr.msk.bf16.vlgmr.msra.gmra.mrb[80].mxu1 %vm514_vm1, %v5837_v9  ;;  %5585 = vmatpush3.bf16.msra.mxu0 %v5802_v6  ;;  %v190_v6 = vadd.f32 %v188_v58, %v180_v57  ;;  %v6638_v9 = vadd.f32 %v6222_v42, %v169_v60  ;;  %v250_v42 = vmul.f32 %v6212_v35, %v6576_v32 }
 0x2f8   :  { %5591 = vmatpush3.bf16.msra.mxu1 %v5803_v7  ;;  %5586 = vmatprep.mubr.msk.bf16.mxu0 %vm5898_vm0, %v7853_v1  ;;  %v234_v7 = vmul.f32 %v6160_v20, %v6536_v16  ;;  %v284_v35 = vmul.f32 %v6190_v62, %v6345_v0  ;;  %v274_v57 = vadd.f32 %v272_v50, %v264_v61  ;;  %v6746_v50 = vstv %s6683_s5  ;;  %s5141_s5 = sld [smem:[#allocation2 + $0x183]] }
 0x2f9   :  { %5592 = vmatprep.mubr.msk.bf16.mxu1 %vm5898_vm0, %v7853_v1  ;;  %5596 = vmatprep.subr.bf16.mxu0 %v7853_v1  ;;  %7899 = vst [vmem:[#allocation11_spill] sm:$0xff] %v6638_v9  ;;  %v202_v18 = vadd.f32 %v200_v3, %v190_v6  ;;  %518 = vst.msk [vmem:[%s7850_s13 + $0x18] sm:$0xff] %vm514_vm1, %v6638_v9  ;;  %v314_v58 = vmul.f32 %v6668_v48, %v6531_v15 }
 0x2fa   :  { %5602 = vmatprep.subr.bf16.mxu1 %v7853_v1  ;;  %v236_v25 = vadd.f32 %v234_v7, %v230_v34  ;;  %v318_v60 = vmul.f32 %v6670_v19, %v6536_v16  ;;  %v326_v34 = vmul.f32 %v6190_v62, %v6545_v21  ;;  %v265_v6 = vmul.f32 %v6668_v48, %v6550_v23 }
 0x2fb   :  { %v214_v39 = vadd.f32 %v212_v4, %v202_v18  ;;  %v253_v4 = vadd.f32 %v251_v43, %v245_v52  ;;  %v286_v7 = vadd.f32 %v284_v35, %v274_v57  ;;  %v285_v18 = vmul.f32 %v6190_v62, %v6581_v33 }
 0x2fc   :  { %v244_v40 = vadd.f32 %v242_v8, %v236_v25  ;;  %v320_v8 = vadd.f32 %v318_v60, %v314_v58  ;;  %v315_v25 = vmul.f32 %v6668_v48, %v6566_v29  ;;  %v356_v35 = vmul.f32 %v6746_v50, %v6340_v63 }
 0x2fd   :  { %v6673_v49 = vadd.f32 %v6251_v22, %v214_v39  ;;  %v6719_v17 = vadd.f32 %v6251_v22, %v253_v4  ;;  %v327_v39 = vmul.f32 %v6190_v62, %v6586_v38  ;;  %v380_v62 = vmul.f32 %v6218_v37, %v6350_v2 }
 0x2fe   :  { %5587 = vmatmul.mubr.msk.bf16.vlgmr.msra.gmra.mrb[84].mxu0 %vm514_vm1, %v5838_v11  ;;  %v181_v11 = vmul.f32 %v6149_v14, %v6550_v23  ;;  %v402_v60 = vmul.f32 %v6746_v50, %v6536_v16 }
 0x2ff   :  { %5593 = vmatmul.mubr.msk.bf16.vlgmr.msra.gmra.mrb[84].mxu1 %vm514_vm1, %v5839_v12  ;;  %5598 = vmatprep.mubr.msk.bf16.mxu0 %vm5898_vm0, %v7853_v1  ;;  %v189_v12 = vmul.f32 %v6160_v20, %v6555_v24  ;;  %7900 = vst [vmem:[#allocation12_spill] sm:$0xff] %v6673_v49  ;;  %v252_v20 = vadd.f32 %v250_v42, %v244_v40  ;;  %519 = vst.msk [vmem:[%s7850_s13 + $0x20] sm:$0xff] %vm514_vm1, %v6673_v49 }
 0x300   :  { %5604 = vmatprep.mubr.msk.bf16.mxu1 %vm5898_vm0, %v7853_v1  ;;  %7903 = vst [vmem:[#allocation15_spill] sm:$0xff] %v6719_v17  ;;  %v319_v42 = vmul.f32 %v6670_v19, %v6571_v30  ;;  %522 = vst.msk [vmem:[%s7850_s13 + $0x38] sm:$0xff] %vm514_vm1, %v6719_v17  ;;  %v335_v40 = vmul.f32 %v6215_v36, %v6604_v13 }
 0x301   :  { %v191_v14 = vadd.f32 %v189_v12, %v181_v11  ;;  %v6691_v56 = vadd.f32 %v6251_v22, %v252_v20  ;;  %v334_v11 = vmul.f32 %v6215_v36, %v6576_v32  ;;  %v273_v12 = vmul.f32 %v6670_v19, %v6555_v24 }
 0x303   :  { %v203_v44 = vadd.f32 %v201_v26, %v191_v14  ;;  %7901 = vst [vmem:[#allocation13_spill] sm:$0xff] %v6691_v56  ;;  %521 = vst.msk [vmem:[%s7850_s13 + $0x30] sm:$0xff] %vm514_vm1, %v6691_v56  ;;  %v298_v26 = vadd.f32 %v296_v53, %v286_v7  ;;  %v328_v14 = vadd.f32 %v326_v34, %v320_v8 }
 0x304   :  { %v275_v27 = vadd.f32 %v273_v12, %v265_v6  ;;  %v418_v7 = vmul.f32 %v6218_v37, %v6576_v32 }
 0x305   :  { %v215_v51 = vadd.f32 %v213_v41, %v203_v44  ;;  %v6738_v41 = vstv %s4986_s4  ;;  %v6741_v43 = vadd.f32 %v6271_v31, %v298_v26  ;;  %v336_v44 = vadd.f32 %v334_v11, %v328_v14  ;;  %s5127_s4 = sld [smem:[#allocation2 + $0x4]] }
 0x306   :  { %v287_v46 = vadd.f32 %v285_v18, %v275_v27  ;;  %v348_v20 = vmul.f32 %v6738_v41, %v6335_v59  ;;  %v398_v58 = vmul.f32 %v6738_v41, %v6531_v15  ;;  %v349_v8 = vmul.f32 %v6738_v41, %v6550_v23 }
 0x307   :  { %v6698_v3 = vadd.f32 %v6251_v22, %v215_v51  ;;  %v321_v22 = vadd.f32 %v319_v42, %v315_v25  ;;  %7904 = vst [vmem:[#allocation16_spill] sm:$0xff] %v6741_v43  ;;  %v6748_v51 = vstv %s4990_s7  ;;  %523 = vst.msk [vmem:[%s7850_s13 + $0x40] sm:$0xff] %vm514_vm1, %v6741_v43  ;;  %v6762_v36 = vadd.f32 %v6271_v31, %v336_v44  ;;  %s5142_s7 = sld [smem:[#allocation2 + $0x184]] }
 0x308   :  { %v299_v52 = vadd.f32 %v297_v28, %v287_v46  ;;  %v368_v53 = vmul.f32 %v6748_v51, %v6345_v0  ;;  %v410_v4 = vmul.f32 %v6748_v51, %v6545_v21  ;;  %v358_v6 = vadd.f32 %v356_v35, %v348_v20 }
 0x309   :  { %7902 = vst [vmem:[#allocation14_spill] sm:$0xff] %v6698_v3  ;;  %520 = vst.msk [vmem:[%s7850_s13 + $0x28] sm:$0xff] %vm514_vm1, %v6698_v3  ;;  %v329_v61 = vadd.f32 %v327_v39, %v321_v22  ;;  %v404_v12 = vadd.f32 %v402_v60, %v398_v58  ;;  %v357_v18 = vmul.f32 %v6746_v50, %v6555_v24  ;;  %v6816_v46 = vstv %s6752_s30  ;;  %s7458_s30 = sld [smem:[#allocation2 + $0x402]] }
 0x30a   :  { %7905 = vst [vmem:[#allocation17_spill] sm:$0xff] %v6762_v36  ;;  %525 = vst.msk [vmem:[%s7850_s13 + $0x50] sm:$0xff] %vm514_vm1, %v6762_v36  ;;  %v6782_v34 = vadd.f32 %v6271_v31, %v299_v52  ;;  %v369_v25 = vmul.f32 %v6748_v51, %v6581_v33  ;;  %v370_v42 = vadd.f32 %v368_v53, %v358_v6  ;;  %v6819_v20 = vstv %s6754_s16  ;;  %s7466_s16 = sld [smem:[#allocation2 + $0x404]] }
 0x30b   :  { %v337_v57 = vadd.f32 %v335_v40, %v329_v61  ;;  %v399_v26 = vmul.f32 %v6738_v41, %v6566_v29  ;;  %v403_v14 = vmul.f32 %v6746_v50, %v6571_v30  ;;  %v412_v27 = vadd.f32 %v410_v4, %v404_v12 }
 0x30c   :  { %7906 = vst [vmem:[#allocation18_spill] sm:$0xff] %v6782_v34  ;;  %524 = vst.msk [vmem:[%s7850_s13 + $0x48] sm:$0xff] %vm514_vm1, %v6782_v34  ;;  %v359_v28 = vadd.f32 %v357_v18, %v349_v8  ;;  %v411_v22 = vmul.f32 %v6748_v51, %v6586_v38  ;;  %v419_v39 = vmul.f32 %v6218_v37, %v6604_v13  ;;  %v6829_v60 = vstv %s6774_s19  ;;  %s5124_s19 = sld [smem:[#allocation2 + $0x1]] }
 0x30d   :  { %v6789_v11 = vadd.f32 %v6271_v31, %v337_v57  ;;  %v381_v31 = vmul.f32 %v6218_v37, %v6599_v47  ;;  %v382_v40 = vadd.f32 %v380_v62, %v370_v42  ;;  %v405_v44 = vadd.f32 %v403_v14, %v399_v26 }
 0x30e   :  { %v420_v61 = vadd.f32 %v418_v7, %v412_v27  ;;  %v371_v52 = vadd.f32 %v369_v25, %v359_v28  ;;  %v432_v35 = vmul.f32 %v6816_v46, %v6335_v59  ;;  %v440_v53 = vmul.f32 %v6819_v20, %v6340_v63 }
 0x30f   :  { %7907 = vst [vmem:[#allocation19_spill] sm:$0xff] %v6789_v11  ;;  %526 = vst.msk [vmem:[%s7850_s13 + $0x58] sm:$0xff] %vm514_vm1, %v6789_v11  ;;  %v6826_v57 = vadd.f32 %v6291_v45, %v382_v40  ;;  %v413_v58 = vadd.f32 %v411_v22, %v405_v44  ;;  %v482_v37 = vmul.f32 %v6816_v46, %v6531_v15  ;;  %v6843_v7 = vstv %s5002_s21  ;;  %s5135_s21 = sld [smem:[#allocation2 + $0x102]] }
 0x310   :  { %v6834_v62 = vadd.f32 %v6291_v45, %v420_v61  ;;  %v383_v4 = vadd.f32 %v381_v31, %v371_v52  ;;  %v442_v6 = vadd.f32 %v440_v53, %v432_v35  ;;  %v452_v59 = vmul.f32 %v6829_v60, %v6345_v0 }
 0x311   :  { %7908 = vst [vmem:[#allocation20_spill] sm:$0xff] %v6826_v57  ;;  %527 = vst.msk [vmem:[%s7850_s13 + $0x60] sm:$0xff] %vm514_vm1, %v6826_v57  ;;  %v421_v63 = vadd.f32 %v419_v39, %v413_v58  ;;  %v486_v15 = vmul.f32 %v6819_v20, %v6536_v16  ;;  %v494_v8 = vmul.f32 %v6829_v60, %v6545_v21 }
 0x312   :  { %7909 = vst [vmem:[#allocation21_spill] sm:$0xff] %v6834_v62  ;;  %529 = vst.msk [vmem:[%s7850_s13 + $0x70] sm:$0xff] %vm514_vm1, %v6834_v62  ;;  %v6855_v0 = vadd.f32 %v6291_v45, %v383_v4  ;;  %v454_v12 = vadd.f32 %v452_v59, %v442_v6  ;;  %v464_v18 = vmul.f32 %v6843_v7, %v6350_v2 }
 0x313   :  { %v502_v25 = vmul.f32 %v6843_v7, %v6576_v32  ;;  %v6862_v16 = vadd.f32 %v6291_v45, %v421_v63  ;;  %v488_v21 = vadd.f32 %v486_v15, %v482_v37  ;;  %v433_v42 = vmul.f32 %v6816_v46, %v6550_v23 }
 0x314   :  { %7910 = vst [vmem:[#allocation22_spill] sm:$0xff] %v6855_v0  ;;  %v441_v31 = vmul.f32 %v6819_v20, %v6555_v24  ;;  %528 = vst.msk [vmem:[%s7850_s13 + $0x68] sm:$0xff] %vm514_vm1, %v6855_v0  ;;  %v466_v2 = vadd.f32 %v464_v18, %v454_v12  ;;  %v453_v32 = vmul.f32 %v6829_v60, %v6581_v33 }
 0x315   :  { %7911 = vst [vmem:[#allocation23_spill] sm:$0xff] %v6862_v16  ;;  %v465_v45 = vmul.f32 %v6843_v7, %v6599_v47  ;;  %v483_v26 = vmul.f32 %v6816_v46, %v6566_v29  ;;  %530 = vst.msk [vmem:[%s7850_s13 + $0x78] sm:$0xff] %vm514_vm1, %v6862_v16  ;;  %v496_v23 = vadd.f32 %v494_v8, %v488_v21 }
 0x316   :  { %v443_v24 = vadd.f32 %v441_v31, %v433_v42  ;;  %v487_v14 = vmul.f32 %v6819_v20, %v6571_v30  ;;  %v495_v33 = vmul.f32 %v6829_v60, %v6586_v38  ;;  %v6889_v27 = vadd.f32 %v6312_v54, %v466_v2 }
 0x317   :  { %v504_v47 = vadd.f32 %v502_v25, %v496_v23  ;;  %v503_v22 = vmul.f32 %v6843_v7, %v6604_v13 }
 0x318   :  { %7912 = vst [vmem:[#allocation24_spill] sm:$0xff] %v6889_v27  ;;  %v455_v28 = vadd.f32 %v453_v32, %v443_v24  ;;  %v489_v29 = vadd.f32 %v487_v14, %v483_v26  ;;  %531 = vst.msk [vmem:[%s7850_s13 + $0x80] sm:$0xff] %vm514_vm1, %v6889_v27 }
 0x319   :  { %v6899_v30 = vadd.f32 %v6312_v54, %v504_v47 }
 0x31a   :  { %v467_v39 = vadd.f32 %v465_v45, %v455_v28  ;;  %v497_v38 = vadd.f32 %v495_v33, %v489_v29 }
 0x31b   :  { %7913 = vst [vmem:[#allocation25_spill] sm:$0xff] %v6899_v30  ;;  %533 = vst.msk [vmem:[%s7850_s13 + $0x90] sm:$0xff] %vm514_vm1, %v6899_v30 }
 0x31c   :  { %v6907_v40 = vadd.f32 %v6312_v54, %v467_v39  ;;  %v505_v13 = vadd.f32 %v503_v22, %v497_v38 }
 0x31e   :  { %7914 = vst [vmem:[#allocation26_spill] sm:$0xff] %v6907_v40  ;;  %532 = vst.msk [vmem:[%s7850_s13 + $0x88] sm:$0xff] %vm514_vm1, %v6907_v40  ;;  %v6915_v44 = vadd.f32 %v6312_v54, %v505_v13 }
 0x320   :  { %7915 = vst [vmem:[#allocation27_spill] sm:$0xff] %v6915_v44  ;;  %534 = vst.msk [vmem:[%s7850_s13 + $0x98] sm:$0xff] %vm514_vm1, %v6915_v44  ;;  %s5125_s13 = sld [smem:[#allocation2 + $0x2]] }
 0x391   :  { %v6922_v61 = vpop.f32.mrb[52].mxu0 }
 0x392   :  { %7916 = vst [vmem:[#allocation28_spill] sm:$0xff] %v6922_v61  ;;  %v6924_v52 = vpop.f32.mrb[52].mxu1  ;;  %v5492_v35 = vpop.f32.mrb[53].mxu0 }
 0x393   :  { %7917 = vst [vmem:[#allocation29_spill] sm:$0xff] %v6924_v52  ;;  %v5498_v53 = vpop.f32.mrb[53].mxu1  ;;  %v6926_v58 = vpop.f32.mrb[54].mxu0 }
 0x394   :  { %7918 = vst [vmem:[#allocation30_spill] sm:$0xff] %v6926_v58  ;;  %v6928_v37 = vpop.f32.mrb[54].mxu1  ;;  %v5493_v4 = vpop.f32.mrb[55].mxu0 }
 0x395   :  { %7919 = vst [vmem:[#allocation31_spill] sm:$0xff] %v6928_v37  ;;  %v5499_v6 = vpop.f32.mrb[55].mxu1 }
 0x399   :  { %v6930_v54 = vpop.f32.mrb[56].mxu0 }
 0x39a   :  { %7920 = vst [vmem:[#allocation32_spill] sm:$0xff] %v6930_v54  ;;  %v6932_v59 = vpop.f32.mrb[56].mxu1  ;;  %v5504_v63 = vpop.f32.mrb[57].mxu0 }
 0x39b   :  { %7921 = vst [vmem:[#allocation33_spill] sm:$0xff] %v6932_v59  ;;  %v5510_v15 = vpop.f32.mrb[57].mxu1  ;;  %v6934_v8 = vpop.f32.mrb[58].mxu0 }
 0x39c   :  { %7922 = vst [vmem:[#allocation34_spill] sm:$0xff] %v6934_v8  ;;  %v6936_v12 = vpop.f32.mrb[58].mxu1  ;;  %v5505_v18 = vpop.f32.mrb[59].mxu0 }
 0x39d   :  { %7923 = vst [vmem:[#allocation35_spill] sm:$0xff] %v6936_v12  ;;  %v5511_v25 = vpop.f32.mrb[59].mxu1 }
 0x3a1   :  { %v6938_v21 = vpop.f32.mrb[60].mxu0 }
 0x3a2   :  { %7924 = vst [vmem:[#allocation36_spill] sm:$0xff] %v6938_v21  ;;  %v6940_v42 = vpop.f32.mrb[60].mxu1  ;;  %v5516_v31 = vpop.f32.mrb[61].mxu0 }
 0x3a3   :  { %7925 = vst [vmem:[#allocation37_spill] sm:$0xff] %v6940_v42  ;;  %v5522_v2 = vpop.f32.mrb[61].mxu1  ;;  %v6942_v32 = vpop.f32.mrb[62].mxu0 }
 0x3a4   :  { %7926 = vst [vmem:[#allocation38_spill] sm:$0xff] %v6942_v32  ;;  %v6944_v45 = vpop.f32.mrb[62].mxu1  ;;  %v5517_v26 = vpop.f32.mrb[63].mxu0 }
 0x3a5   :  { %7927 = vst [vmem:[#allocation39_spill] sm:$0xff] %v6944_v45  ;;  %v5523_v23 = vpop.f32.mrb[63].mxu1 }
 0x3a9   :  { %v6946_v24 = vpop.f32.mrb[64].mxu0 }
 0x3aa   :  { %7928 = vst [vmem:[#allocation40_spill] sm:$0xff] %v6946_v24  ;;  %v6948_v14 = vpop.f32.mrb[64].mxu1  ;;  %v5528_v33 = vpop.f32.mrb[65].mxu0 }
 0x3ab   :  { %7929 = vst [vmem:[#allocation41_spill] sm:$0xff] %v6948_v14  ;;  %v5534_v47 = vpop.f32.mrb[65].mxu1  ;;  %v6950_v28 = vpop.f32.mrb[66].mxu0  ;;  %v7054_v14 = vstv %s5147_s3  ;;  %s7445_s3 = sld [smem:[#allocation2 + $0x400]] }
 0x3ac   :  { %7930 = vst [vmem:[#allocation42_spill] sm:$0xff] %v6950_v28  ;;  %v6952_v29 = vpop.f32.mrb[66].mxu1  ;;  %v5529_v22 = vpop.f32.mrb[67].mxu0  ;;  %v7052_v28 = vstv %s5142_s7  ;;  %7936 = vst [vmem:[#allocation48_spill] sm:$0xff] %v7054_v14  ;;  %s7340_s7 = sld [smem:[#allocation2 + $0x303]] }
 0x3ad   :  { %7931 = vst [vmem:[#allocation43_spill] sm:$0xff] %v6952_v29  ;;  %v5535_v39 = vpop.f32.mrb[67].mxu1  ;;  %v7050_v29 = vstv %s5137_s26 }
 0x3b1   :  { %v6954_v38 = vpop.f32.mrb[68].mxu0 }
 0x3b2   :  { %7932 = vst [vmem:[#allocation44_spill] sm:$0xff] %v6954_v38  ;;  %v6956_v13 = vpop.f32.mrb[68].mxu1  ;;  %v5540_v35 = vpop.f32.mrb[69].mxu0  ;;  %v7048_v38 = vstv %s5132_s25 }
 0x3b3   :  { %7933 = vst [vmem:[#allocation45_spill] sm:$0xff] %v6956_v13  ;;  %v5546_v53 = vpop.f32.mrb[69].mxu1  ;;  %v6958_v4 = vpop.f32.mrb[70].mxu0  ;;  %v5804_v35 = vld [vmem:[%s7846_s9] sm:$0x3f]  }
 0x3b4   :  { %7934 = vst [vmem:[#allocation46_spill] sm:$0xff] %v6958_v4  ;;  %v6960_v6 = vpop.f32.mrb[70].mxu1  ;;  %v5541_v63 = vpop.f32.mrb[71].mxu0  ;;  %v5805_v53 = vld [vmem:[%s7846_s9 + $0x8] sm:$0x3f]   ;;  %v7046_v4 = vstv %s5141_s5 }
 0x3b5   :  { %7935 = vst [vmem:[#allocation47_spill] sm:$0xff] %v6960_v6  ;;  %v5547_v15 = vpop.f32.mrb[71].mxu1  ;;  %v7044_v6 = vstv %s5136_s24  ;;  %s4961_s24 = sld [smem:[#allocation2 + $0x282]] }
 0x3b9   :  { %v2882_v18 = vpop.f32.mrb[72].mxu0 }
 0x3ba   :  { %v2929_v25 = vpop.f32.mrb[72].mxu1  ;;  %v5552_v31 = vpop.f32.mrb[73].mxu0 }
 0x3bb   :  { %v5558_v2 = vpop.f32.mrb[73].mxu1  ;;  %v2885_v26 = vpop.f32.mrb[74].mxu0 }
 0x3bc   :  { %v3218_v23 = vpack.c.bf16 %v2885_v26, %v2882_v18  ;;  %v2932_v33 = vpop.f32.mrb[74].mxu1  ;;  %v5553_v47 = vpop.f32.mrb[75].mxu0 }
 0x3bd   :  { %v3219_v22 = vpack.c.bf16 %v2932_v33, %v2929_v25  ;;  %v5559_v39 = vpop.f32.mrb[75].mxu1 }
 0x3be   :  { %5597 = vmatpush3.bf16.msra.mxu0 %v3218_v23  ;;  %v5807_v39 = vld [vmem:[%s7846_s9 + $0x18] sm:$0x3f]  }
 0x3bf   :  { %5603 = vmatpush3.bf16.msra.mxu1 %v3219_v22  ;;  %5608 = vmatprep.subr.bf16.mxu0 %v7853_v1  ;;  %v5806_v22 = vld [vmem:[%s7846_s9 + $0x10] sm:$0x3f]  }
 0x3c0   :  { %5614 = vmatprep.subr.bf16.mxu1 %v7853_v1 }
 0x3c1   :  { %v2976_v63 = vpop.f32.mrb[76].mxu0  ;;  %5599 = vmatmul.mubr.msk.bf16.vlgmr.msra.gmra.mrb[88].mxu0 %vm514_vm1, %v5804_v35 }
 0x3c2   :  { %v3023_v15 = vpop.f32.mrb[76].mxu1  ;;  %5605 = vmatmul.mubr.msk.bf16.vlgmr.msra.gmra.mrb[88].mxu1 %vm514_vm1, %v5805_v53  ;;  %v5564_v18 = vpop.f32.mrb[77].mxu0  ;;  %5610 = vmatprep.mubr.msk.bf16.mxu0 %vm5898_vm0, %v7853_v1 }
 0x3c3   :  { %v5570_v25 = vpop.f32.mrb[77].mxu1  ;;  %v2979_v31 = vpop.f32.mrb[78].mxu0  ;;  %5616 = vmatprep.mubr.msk.bf16.mxu1 %vm5898_vm0, %v7853_v1 }
 0x3c4   :  { %v3220_v2 = vpack.c.bf16 %v2979_v31, %v2976_v63  ;;  %v3026_v26 = vpop.f32.mrb[78].mxu1  ;;  %v5565_v23 = vpop.f32.mrb[79].mxu0 }
 0x3c5   :  { %v3221_v33 = vpack.c.bf16 %v3026_v26, %v3023_v15  ;;  %v5571_v47 = vpop.f32.mrb[79].mxu1 }
 0x3c6   :  { %5609 = vmatpush3.bf16.msra.mxu0 %v3220_v2  ;;  %v5809_v47 = vld [vmem:[%s7846_s9 + $0x28] sm:$0x3f]  }
 0x3c7   :  { %5615 = vmatpush3.bf16.msra.mxu1 %v3221_v33  ;;  %5620 = vmatprep.subr.bf16.mxu0 %v7853_v1  ;;  %v5808_v33 = vld [vmem:[%s7846_s9 + $0x20] sm:$0x3f]  }
 0x3c8   :  { %5626 = vmatprep.subr.bf16.mxu1 %v7853_v1 }
 0x3c9   :  { %v3070_v35 = vpop.f32.mrb[80].mxu0  ;;  %5611 = vmatmul.mubr.msk.bf16.vlgmr.msra.gmra.mrb[92].mxu0 %vm514_vm1, %v5806_v22 }
 0x3ca   :  { %v3117_v53 = vpop.f32.mrb[80].mxu1  ;;  %5617 = vmatmul.mubr.msk.bf16.vlgmr.msra.gmra.mrb[92].mxu1 %vm514_vm1, %v5807_v39  ;;  %v5576_v63 = vpop.f32.mrb[81].mxu0  ;;  %5622 = vmatprep.mubr.msk.bf16.mxu0 %vm5898_vm0, %v7853_v1 }
 0x3cb   :  { %v5582_v15 = vpop.f32.mrb[81].mxu1  ;;  %v3073_v18 = vpop.f32.mrb[82].mxu0  ;;  %5628 = vmatprep.mubr.msk.bf16.mxu1 %vm5898_vm0, %v7853_v1 }
 0x3cc   :  { %v3222_v25 = vpack.c.bf16 %v3073_v18, %v3070_v35  ;;  %v3120_v31 = vpop.f32.mrb[82].mxu1  ;;  %v5577_v2 = vpop.f32.mrb[83].mxu0 }
 0x3cd   :  { %v3223_v26 = vpack.c.bf16 %v3120_v31, %v3117_v53  ;;  %v5583_v23 = vpop.f32.mrb[83].mxu1 }
 0x3ce   :  { %5621 = vmatpush3.bf16.msra.mxu0 %v3222_v25  ;;  %v5811_v23 = vld [vmem:[%s7846_s9 + $0x38] sm:$0x3f]  }
 0x3cf   :  { %5627 = vmatpush3.bf16.msra.mxu1 %v3223_v26  ;;  %5632 = vmatprep.subr.bf16.mxu0 %v7853_v1  ;;  %v5810_v26 = vld [vmem:[%s7846_s9 + $0x30] sm:$0x3f]   ;;  %s7464_s9 = sld [smem:[#allocation2 + $0x403]] }
 0x3d0   :  { %5638 = vmatprep.subr.bf16.mxu1 %v7853_v1 }
 0x3d1   :  { %v3164_v22 = vpop.f32.mrb[84].mxu0  ;;  %5623 = vmatmul.mubr.msk.bf16.vlgmr.msra.gmra.mrb[96].mxu0 %vm514_vm1, %v5808_v33  ;;  %v5812_v33 = vld [vmem:[%s7847_s10] sm:$0x3f]  }
 0x3d2   :  { %v3211_v39 = vpop.f32.mrb[84].mxu1  ;;  %5629 = vmatmul.mubr.msk.bf16.vlgmr.msra.gmra.mrb[96].mxu1 %vm514_vm1, %v5809_v47  ;;  %v5588_v35 = vpop.f32.mrb[85].mxu0  ;;  %5634 = vmatprep.mubr.msk.bf16.mxu0 %vm5898_vm0, %v7853_v1  ;;  %v5813_v47 = vld [vmem:[%s7847_s10 + $0x8] sm:$0x3f]  }
 0x3d3   :  { %v5594_v53 = vpop.f32.mrb[85].mxu1  ;;  %v3167_v63 = vpop.f32.mrb[86].mxu0  ;;  %5640 = vmatprep.mubr.msk.bf16.mxu1 %vm5898_vm0, %v7853_v1 }
 0x3d4   :  { %v3224_v15 = vpack.c.bf16 %v3167_v63, %v3164_v22  ;;  %v3214_v18 = vpop.f32.mrb[86].mxu1  ;;  %v5589_v25 = vpop.f32.mrb[87].mxu0  ;;  %v3849_v22 = vsel %vm3847_vm4, %v5812_v33, 0  ;;  %v3619_v53 = vstv %s3618_s17  ;;  %v3661_v63 = vstv %s5128_s18  ;;  %s7300_s18 = sld [smem:[#allocation2 + $0x301]] }
 0x3d5   :  { %v3225_v31 = vpack.c.bf16 %v3214_v18, %v3211_v39  ;;  %v5595_v2 = vpop.f32.mrb[87].mxu1  ;;  %v3901_v39 = vsel %vm3847_vm4, %v5813_v47, 0  ;;  %v7030_v18 = vstv %s5129_s1  ;;  %v7038_v33 = vstv %s5126_s22  ;;  %s7517_s22 = sld [smem:[#allocation2 + $0x482]] }
 0x3d6   :  { %5633 = vmatpush3.bf16.msra.mxu0 %v3224_v15  ;;  %v7028_v15 = vstv %s5124_s19  ;;  %v7032_v2 = vstv %s5125_s13  ;;  %s7302_s19 = sld [smem:[#allocation2 + $0x302]] }
 0x3d7   :  { %5639 = vmatpush3.bf16.msra.mxu1 %v3225_v31  ;;  %5644 = vmatprep.subr.bf16.mxu0 %v7853_v1 }
 0x3d8   :  { %5650 = vmatprep.subr.bf16.mxu1 %v7853_v1 }
 0x3d9   :  { %5635 = vmatmul.mubr.msk.bf16.vlgmr.msra.gmra.mrb[100].mxu0 %vm514_vm1, %v5810_v26  ;;  %v7034_v26 = vstv %s5130_s20  ;;  %s7396_s20 = sld [smem:[#allocation2 + $0x382]] }
 0x3da   :  { %5641 = vmatmul.mubr.msk.bf16.vlgmr.msra.gmra.mrb[100].mxu1 %vm514_vm1, %v5811_v23  ;;  %5646 = vmatprep.mubr.msk.bf16.mxu0 %vm5898_vm0, %v7853_v1  ;;  %v7036_v23 = vstv %s5135_s21  ;;  %s7515_s21 = sld [smem:[#allocation2 + $0x481]] }
 0x3db   :  { %5652 = vmatprep.mubr.msk.bf16.mxu1 %vm5898_vm0, %v7853_v1  ;;  %5645 = vmatpush3.bf16.msra.mxu0 %v3849_v22 }
 0x3dc   :  { %5651 = vmatpush3.bf16.msra.mxu1 %v3901_v39  ;;  %5656 = vmatprep.subr.bf16.mxu0 %v7853_v1  ;;  %v7040_v39 = vstv %s5127_s4  ;;  %s4963_s4 = sld [smem:[#allocation2 + $0x283]] }
 0x3dd   :  { %5662 = vmatprep.subr.bf16.mxu1 %v7853_v1  ;;  %v7042_v1 = vstv %s5131_s23  ;;  %s4959_s23 = sld [smem:[#allocation2 + $0x281]] }
 0x494   :  { %v3268_v35 = vpop.f32.mrb[88].mxu0 }
 0x495   :  { %v3317_v25 = vpop.f32.mrb[88].mxu1  ;;  %v5600_v31 = vpop.f32.mrb[89].mxu0  ;;  %v3662_v24 = vmul.f32 %v3661_v63, %v3268_v35  ;;  %v3704_v45 = vmul.f32 %v3268_v35, %v6668_v48  ;;  %v3746_v32 = vmul.f32 %v3268_v35, %v6738_v41  ;;  %v3788_v21 = vmul.f32 %v3268_v35, %v6816_v46 }
 0x496   :  { %v5606_v47 = vpop.f32.mrb[89].mxu1  ;;  %v3271_v22 = vpop.f32.mrb[90].mxu0  ;;  %v3644_v12 = vmul.f32 %v3619_v53, %v3317_v25  ;;  %v3686_v8 = vmul.f32 %v3661_v63, %v3317_v25  ;;  %v3770_v59 = vmul.f32 %v3317_v25, %v6738_v41  ;;  %v3812_v54 = vmul.f32 %v3317_v25, %v6816_v46 }
 0x497   :  { %v3320_v13 = vpop.f32.mrb[90].mxu1  ;;  %v5601_v31 = vpop.f32.mrb[91].mxu0  ;;  %v3620_v47 = vmul.f32 %v3619_v53, %v3268_v35  ;;  %v3621_v37 = vmul.f32 %v3619_v53, %v3271_v22  ;;  %v3663_v58 = vmul.f32 %v3661_v63, %v3271_v22  ;;  %v3705_v52 = vmul.f32 %v3271_v22, %v6668_v48 }
 0x498   :  { %v5607_v42 = vpop.f32.mrb[91].mxu1  ;;  %v3728_v31 = vmul.f32 %v3317_v25, %v6668_v48  ;;  %v3747_v61 = vmul.f32 %v3271_v22, %v6738_v41  ;;  %v3789_v30 = vmul.f32 %v3271_v22, %v6816_v46  ;;  %v3645_v44 = vmul.f32 %v3619_v53, %v3320_v13 }
 0x499   :  { %v3687_v42 = vmul.f32 %v3661_v63, %v3320_v13  ;;  %v3729_v35 = vmul.f32 %v3320_v13, %v6668_v48  ;;  %v3771_v27 = vmul.f32 %v3320_v13, %v6738_v41  ;;  %v3813_v40 = vmul.f32 %v3320_v13, %v6816_v46 }
 0x49c   :  { %v3366_v62 = vpop.f32.mrb[92].mxu0 }
 0x49d   :  { %v3624_v16 = vmul.f32 %v7028_v15, %v3366_v62  ;;  %v3666_v25 = vmul.f32 %v7030_v18, %v3366_v62  ;;  %v3708_v57 = vmul.f32 %v3366_v62, %v6670_v19  ;;  %v3750_v0 = vmul.f32 %v3366_v62, %v6746_v50  ;;  %v3415_v36 = vpop.f32.mrb[92].mxu1  ;;  %v5612_v11 = vpop.f32.mrb[93].mxu0 }
 0x49e   :  { %v3792_v53 = vmul.f32 %v3366_v62, %v6819_v20  ;;  %v3646_v63 = vmul.f32 %v7028_v15, %v3415_v36  ;;  %v3688_v48 = vmul.f32 %v7030_v18, %v3415_v36  ;;  %v3730_v41 = vmul.f32 %v3415_v36, %v6670_v19  ;;  %v5618_v46 = vpop.f32.mrb[93].mxu1  ;;  %v3369_v13 = vpop.f32.mrb[94].mxu0 }
 0x49f   :  { %v3626_v22 = vadd.f32 %v3624_v16, %v3620_v47  ;;  %v3668_v43 = vadd.f32 %v3666_v25, %v3662_v24  ;;  %v3710_v34 = vadd.f32 %v3708_v57, %v3704_v45  ;;  %v3752_v56 = vadd.f32 %v3750_v0, %v3746_v32  ;;  %v3418_v17 = vpop.f32.mrb[94].mxu1  ;;  %v5613_v49 = vpop.f32.mrb[95].mxu0 }
 0x4a0   :  { %v3794_v3 = vadd.f32 %v3792_v53, %v3788_v21  ;;  %v3648_v5 = vadd.f32 %v3646_v63, %v3644_v12  ;;  %v3690_v9 = vadd.f32 %v3688_v48, %v3686_v8  ;;  %v3732_v11 = vadd.f32 %v3730_v41, %v3728_v31  ;;  %v5619_v10 = vpop.f32.mrb[95].mxu1 }
 0x4a1   :  { %v3772_v62 = vmul.f32 %v3415_v36, %v6746_v50  ;;  %v3814_v55 = vmul.f32 %v3415_v36, %v6819_v20  ;;  %v3625_v14 = vmul.f32 %v7028_v15, %v3369_v13  ;;  %v3667_v46 = vmul.f32 %v7030_v18, %v3369_v13 }
 0x4a2   :  { %v3709_v16 = vmul.f32 %v3369_v13, %v6670_v19  ;;  %v3751_v57 = vmul.f32 %v3369_v13, %v6746_v50  ;;  %v3793_v0 = vmul.f32 %v3369_v13, %v6819_v20  ;;  %v3647_v49 = vmul.f32 %v7028_v15, %v3418_v17 }
 0x4a3   :  { %v3774_v12 = vadd.f32 %v3772_v62, %v3770_v59  ;;  %v3816_v8 = vadd.f32 %v3814_v55, %v3812_v54  ;;  %v3627_v21 = vadd.f32 %v3625_v14, %v3621_v37  ;;  %v3669_v10 = vadd.f32 %v3667_v46, %v3663_v58 }
 0x4a4   :  { %v3711_v32 = vadd.f32 %v3709_v16, %v3705_v52  ;;  %v3753_v45 = vadd.f32 %v3751_v57, %v3747_v61  ;;  %v3795_v24 = vadd.f32 %v3793_v0, %v3789_v30  ;;  %v3649_v36 = vadd.f32 %v3647_v49, %v3645_v44  ;;  %v3464_v47 = vpop.f32.mrb[96].mxu0 }
 0x4a5   :  { %v3689_v31 = vmul.f32 %v7030_v18, %v3418_v17  ;;  %v3731_v25 = vmul.f32 %v3418_v17, %v6670_v19  ;;  %v3773_v53 = vmul.f32 %v3418_v17, %v6746_v50  ;;  %v3815_v63 = vmul.f32 %v3418_v17, %v6819_v20  ;;  %v3513_v48 = vpop.f32.mrb[96].mxu1  ;;  %v5624_v41 = vpop.f32.mrb[97].mxu0 }
 0x4a6   :  { %v3630_v59 = vmul.f32 %v7032_v2, %v3464_v47  ;;  %v3672_v55 = vmul.f32 %v7034_v26, %v3464_v47  ;;  %v3714_v52 = vmul.f32 %v7036_v23, %v3464_v47  ;;  %v3756_v30 = vmul.f32 %v3464_v47, %v6748_v51  ;;  %v5630_v44 = vpop.f32.mrb[97].mxu1  ;;  %v3467_v61 = vpop.f32.mrb[98].mxu0 }
 0x4a7   :  { %v3691_v58 = vadd.f32 %v3689_v31, %v3687_v42  ;;  %v3733_v37 = vadd.f32 %v3731_v25, %v3729_v35  ;;  %v3775_v54 = vadd.f32 %v3773_v53, %v3771_v27  ;;  %v3817_v19 = vadd.f32 %v3815_v63, %v3813_v40  ;;  %v3516_v14 = vpop.f32.mrb[98].mxu1  ;;  %v5625_v50 = vpop.f32.mrb[99].mxu0 }
 0x4a8   :  { %v3632_v15 = vadd.f32 %v3630_v59, %v3626_v22  ;;  %v3674_v17 = vadd.f32 %v3672_v55, %v3668_v43  ;;  %v3716_v20 = vadd.f32 %v3714_v52, %v3710_v34  ;;  %v3758_v18 = vadd.f32 %v3756_v30, %v3752_v56  ;;  %v5631_v13 = vpop.f32.mrb[99].mxu1 }
 0x4a9   :  { %v3798_v62 = vmul.f32 %v3464_v47, %v6829_v60  ;;  %v3650_v46 = vmul.f32 %v7032_v2, %v3513_v48  ;;  %v3692_v16 = vmul.f32 %v7034_v26, %v3513_v48  ;;  %v3734_v57 = vmul.f32 %v7036_v23, %v3513_v48 }
 0x4aa   :  { %v3776_v42 = vmul.f32 %v3513_v48, %v6748_v51  ;;  %v3818_v27 = vmul.f32 %v3513_v48, %v6829_v60  ;;  %v3631_v40 = vmul.f32 %v7032_v2, %v3467_v61  ;;  %v3673_v35 = vmul.f32 %v7034_v26, %v3467_v61 }
 0x4ab   :  { %v3800_v43 = vadd.f32 %v3798_v62, %v3794_v3  ;;  %v3652_v34 = vadd.f32 %v3650_v46, %v3648_v5  ;;  %v3694_v56 = vadd.f32 %v3692_v16, %v3690_v9  ;;  %v3736_v22 = vadd.f32 %v3734_v57, %v3732_v11 }
 0x4ac   :  { %v7100_v0 = vadd.f32 %v3776_v42, %v3774_v12  ;;  %v7102_v49 = vadd.f32 %v3818_v27, %v3816_v8  ;;  %v7104_v47 = vadd.f32 %v3631_v40, %v3627_v21  ;;  %v7106_v31 = vadd.f32 %v3673_v35, %v3669_v10  ;;  %v3562_v25 = vpop.f32.mrb[100].mxu0 }
 0x4ad   :  { %v3715_v53 = vmul.f32 %v7036_v23, %v3467_v61  ;;  %v3757_v63 = vmul.f32 %v3467_v61, %v6748_v51  ;;  %v3799_v48 = vmul.f32 %v3467_v61, %v6829_v60  ;;  %v3651_v3 = vmul.f32 %v7032_v2, %v3516_v14  ;;  %v3611_v5 = vpop.f32.mrb[100].mxu1  ;;  %v5636_v9 = vpop.f32.mrb[101].mxu0 }
 0x4ae   :  { %v3693_v11 = vmul.f32 %v7034_v26, %v3516_v14  ;;  %v3735_v12 = vmul.f32 %v7036_v23, %v3516_v14  ;;  %v3777_v8 = vmul.f32 %v3516_v14, %v6748_v51  ;;  %v3819_v21 = vmul.f32 %v3516_v14, %v6829_v60  ;;  %v5642_v10 = vpop.f32.mrb[101].mxu1  ;;  %v3565_v41 = vpop.f32.mrb[102].mxu0 }
 0x4af   :  { %v3717_v59 = vadd.f32 %v3715_v53, %v3711_v32  ;;  %v3759_v55 = vadd.f32 %v3757_v63, %v3753_v45  ;;  %v3801_v52 = vadd.f32 %v3799_v48, %v3795_v24  ;;  %v3653_v30 = vadd.f32 %v3651_v3, %v3649_v36  ;;  %v3614_v44 = vpop.f32.mrb[102].mxu1  ;;  %v5637_v61 = vpop.f32.mrb[103].mxu0  ;;  %v5814_v24 = vld [vmem:[%s7847_s10 + $0x10] sm:$0x3f]   ;;  %v5815_v36 = vld [vmem:[%s7847_s10 + $0x18] sm:$0x3f]  }
 0x4b0   :  { %v7116_v50 = vadd.f32 %v3693_v11, %v3691_v58  ;;  %v7118_v2 = vadd.f32 %v3735_v12, %v3733_v37  ;;  %v7120_v13 = vadd.f32 %v3777_v8, %v3775_v54  ;;  %v7122_v26 = vadd.f32 %v3819_v21, %v3817_v19  ;;  %v5643_v23 = vpop.f32.mrb[103].mxu1 }
 0x4b1   :  { %v3636_v51 = vmul.f32 %v7038_v33, %v3562_v25  ;;  %v3678_v60 = vmul.f32 %v7042_v1, %v3562_v25  ;;  %v3720_v32 = vmul.f32 %v7044_v6, %v3562_v25  ;;  %v3762_v45 = vmul.f32 %v7046_v4, %v3562_v25 }
 0x4b2   :  { %v3804_v58 = vmul.f32 %v3562_v25, %v6843_v7  ;;  %v3654_v37 = vmul.f32 %v7038_v33, %v3611_v5  ;;  %v3696_v54 = vmul.f32 %v7042_v1, %v3611_v5  ;;  %v3738_v19 = vmul.f32 %v7044_v6, %v3611_v5 }
 0x4b3   :  { %v3638_v14 = vadd.f32 %v3636_v51, %v3632_v15  ;;  %v3680_v62 = vadd.f32 %v3678_v60, %v3674_v17  ;;  %v3722_v46 = vadd.f32 %v3720_v32, %v3716_v20  ;;  %v3764_v16 = vadd.f32 %v3762_v45, %v3758_v18  ;;  %v7937_v17 = vld [vmem:[#allocation48_spill] sm:$0xff] }
 0x4b4   :  { %v3806_v57 = vadd.f32 %v3804_v58, %v3800_v43  ;;  %v3656_v42 = vadd.f32 %v3654_v37, %v3652_v34  ;;  %v3698_v27 = vadd.f32 %v3696_v54, %v3694_v56  ;;  %v3740_v40 = vadd.f32 %v3738_v19, %v3736_v22 }
 0x4b5   :  { %v3642_v35 = vadd.f32 %v7040_v39, %v3638_v14  ;;  %v7140_v53 = vadd.f32 %v7048_v38, %v3680_v62  ;;  %v3953_v25 = vsel %vm3847_vm4, %v5814_v24, 0  ;;  %v4005_v63 = vsel %vm3847_vm4, %v5815_v36, 0  ;;  %v5816_v62 = vld [vmem:[%s7847_s10 + $0x20] sm:$0x3f]  }
 0x4b6   :  { %v7145_v48 = vadd.f32 %v7050_v29, %v3722_v46  ;;  %v7148_v15 = vadd.f32 %v7052_v28, %v3764_v16  ;;  %v7151_v20 = vadd.f32 %v7937_v17, %v3806_v57  ;;  %v3658_v18 = vadd.f32 %v3656_v42, %v7040_v39 }
 0x4b7   :  { %v3780_v43 = vmul.f32 %v7046_v4, %v3611_v5  ;;  %v3822_v34 = vmul.f32 %v3611_v5, %v6843_v7  ;;  %v3637_v56 = vmul.f32 %v7038_v33, %v3565_v41  ;;  %v3679_v22 = vmul.f32 %v7042_v1, %v3565_v41 }
 0x4b8   :  { %v3721_v3 = vmul.f32 %v7044_v6, %v3565_v41  ;;  %v3763_v9 = vmul.f32 %v7046_v4, %v3565_v41  ;;  %v3805_v11 = vmul.f32 %v3565_v41, %v6843_v7  ;;  %v3655_v12 = vmul.f32 %v7038_v33, %v3614_v44 }
 0x4b9   :  { %v3782_v8 = vadd.f32 %v3780_v43, %v7100_v0  ;;  %v3824_v21 = vadd.f32 %v3822_v34, %v7102_v49  ;;  %v3639_v10 = vadd.f32 %v3637_v56, %v7104_v47  ;;  %v3681_v5 = vadd.f32 %v3679_v22, %v7106_v31  ;;  %v7269_v34 = vld [vmem:[%s7837_s0 + $0x30] sm:$0xff]  ;;  %v7275_v22 = vld [vmem:[%s7837_s0] sm:$0xff] }
 0x4ba   :  { %v3723_v61 = vadd.f32 %v3721_v3, %v3717_v59  ;;  %v3765_v23 = vadd.f32 %v3763_v9, %v3759_v55  ;;  %v3807_v51 = vadd.f32 %v3805_v11, %v3801_v52  ;;  %v3657_v60 = vadd.f32 %v3655_v12, %v3653_v30  ;;  %v7281_v9 = vld [vmem:[%s7837_s0 + $0x20] sm:$0xff] }
 0x4bb   :  { %v3700_v32 = vadd.f32 %v3698_v27, %v7048_v38  ;;  %v3742_v45 = vadd.f32 %v3740_v40, %v7050_v29  ;;  %v3643_v41 = vadd.f32 %v7040_v39, %v3639_v10  ;;  %v3685_v33 = vadd.f32 %v7048_v38, %v3681_v5  ;;  %v5818_v27 = vld [vmem:[%s7847_s10 + $0x30] sm:$0x3f]   ;;  %v5819_v40 = vld [vmem:[%s7847_s10 + $0x38] sm:$0x3f]  }
 0x4bc   :  { %v3727_v0 = vadd.f32 %v7050_v29, %v3723_v61  ;;  %v7172_v49 = vadd.f32 %v7052_v28, %v3765_v23  ;;  %v7175_v47 = vadd.f32 %v7937_v17, %v3807_v51  ;;  %v3659_v31 = vadd.f32 %v3657_v60, %v7040_v39  ;;  %v7297_v61 = vld [vmem:[%s7837_s0 + $0x40] sm:$0xff] }
 0x4bd   :  { %v3697_v59 = vmul.f32 %v7042_v1, %v3614_v44  ;;  %v3739_v55 = vmul.f32 %v7044_v6, %v3614_v44  ;;  %v3781_v52 = vmul.f32 %v7046_v4, %v3614_v44  ;;  %v3823_v30 = vmul.f32 %v3614_v44, %v6843_v7 }
 0x4be   :  { %v3828_v24 = vpack.c.bf16 %v3643_v41, %v3642_v35  ;;  %v3829_v36 = vpack.c.bf16 %v3659_v31, %v3658_v18  ;;  %v3830_v58 = vpack.c.bf16 %v3685_v33, %v7140_v53  ;;  %v3832_v37 = vpack.c.bf16 %v3727_v0, %v7145_v48  ;;  %v7263_v18 = vld [vmem:[%s7837_s0 + $0x10] sm:$0xff]  ;;  %v7313_v33 = vld [vmem:[%s7837_s0 + $0x60] sm:$0xff]  ;;  %v7325_v31 = vld [vmem:[%s7837_s0 + $0x38] sm:$0xff] }
 0x4bf   :  { %v3699_v54 = vadd.f32 %v3697_v59, %v7116_v50  ;;  %v3741_v19 = vadd.f32 %v3739_v55, %v7118_v2  ;;  %v3783_v39 = vadd.f32 %v3781_v52, %v7120_v13  ;;  %v3825_v1 = vadd.f32 %v3823_v30, %v7122_v26  ;;  %v7331_v55 = vld [vmem:[%s7837_s0 + $0x8] sm:$0xff] }
 0x4c0   :  { %v3784_v6 = vadd.f32 %v3782_v8, %v7052_v28  ;;  %5647 = vmatmul.mubr.msk.bf16.vlgmr.msra.gmra.mrb[104].mxu0 %vm3843_vm5, %v3828_v24  ;;  %5653 = vmatmul.mubr.msk.bf16.vlgmr.msra.gmra.mrb[104].mxu1 %vm3843_vm5, %v3829_v36  ;;  %v3834_v7 = vpack.c.bf16 %v7172_v49, %v7148_v15  ;;  %v3836_v4 = vpack.c.bf16 %v7175_v47, %v7151_v20  ;;  %v7938_v14 = vmov 0.0   ;;  %v7319_v49 = vld [vmem:[%s7837_s0 + $0x18] sm:$0xff]  ;;  %v7337_v30 = vld [vmem:[%s7837_s0 + $0x28] sm:$0xff] }
 0x4c1   :  { %v3701_v44 = vadd.f32 %v3699_v54, %v7048_v38  ;;  %v3743_v50 = vadd.f32 %v3741_v19, %v7050_v29  ;;  %v3785_v2 = vadd.f32 %v3783_v39, %v7052_v28  ;;  %v3827_v13 = vadd.f32 %v3825_v1, %v7937_v17  ;;  %5657 = vmatpush3.bf16.msra.mxu0 %v3953_v25  ;;  %v5817_v38 = vld [vmem:[%s7847_s10 + $0x28] sm:$0x3f]   ;;  %v5820_v25 = vld [vmem:[%s7847_s10 + $0x40] sm:$0x3f]  }
 0x4c2   :  { %v3826_v26 = vadd.f32 %v3824_v21, %v7937_v17  ;;  %5663 = vmatpush3.bf16.msra.mxu1 %v4005_v63  ;;  %5658 = vmatprep.mubr.msk.bf16.mxu0 %vm5898_vm0, %v7938_v14  ;;  %v4057_v57 = vsel %vm3847_vm4, %v5816_v62, 0  ;;  %v4109_v42 = vsel %vm3847_vm4, %v5817_v38, 0  ;;  %v4161_v35 = vsel %vm3847_vm4, %v5818_v27, 0  ;;  %v5821_v63 = vld [vmem:[%s7847_s10 + $0x48] sm:$0x3f]   ;;  %s4957_s10 = sld [smem:[#allocation2 + $0x280]] }
 0x4c3   :  { %5664 = vmatprep.mubr.msk.bf16.mxu1 %vm5898_vm0, %v7938_v14  ;;  %v3831_v28 = vpack.c.bf16 %v3701_v44, %v3700_v32  ;;  %5668 = vmatprep.subr.bf16.mxu0 %v7938_v14  ;;  %v3833_v29 = vpack.c.bf16 %v3743_v50, %v3742_v45  ;;  %v3835_v46 = vpack.c.bf16 %v3785_v2, %v3784_v6  ;;  %v4213_v53 = vsel %vm3847_vm4, %v5819_v40, 0  ;;  %v7291_v21 = vld [vmem:[%s7837_s0 + $0x50] sm:$0xff]  ;;  %v7351_v19 = vld [vmem:[%s7837_s0 + $0x48] sm:$0xff]  ;;  %v7359_v2 = vld [vmem:[%s7837_s0 + $0x78] sm:$0xff] }
 0x4c4   :  { %5674 = vmatprep.subr.bf16.mxu1 %v7938_v14  ;;  %v3837_v16 = vpack.c.bf16 %v3827_v13, %v3826_v26  ;;  %v4265_v48 = vsel %vm3847_vm4, %v5820_v25, 0  ;;  %v4317_v15 = vsel %vm3847_vm4, %v5821_v63, 0  ;;  %v109_v20 = vstv %s4959_s23  ;;  %v7307_v32 = vld [vmem:[%s7837_s0 + $0x70] sm:$0xff]  ;;  %v7365_v26 = vld [vmem:[%s7837_s0 + $0x68] sm:$0xff]  ;;  %s7526_s23 = sld [smem:[#allocation2 + $0x484]] }
 0x4c5   :  { %v154_v56 = vmul.f32 %v7269_v34, %v109_v20  ;;  %v110_v11 = vmul.f32 %v7281_v9, %v109_v20  ;;  %v121_v12 = vstv %s4961_s24  ;;  %v133_v51 = vstv %s4963_s4  ;;  %s7412_s24 = sld [smem:[#allocation2 + $0x383]]  ;;  %s7415_s4 = sld [smem:[#allocation2 + $0x384]] }
 0x4c6   :  { %v162_v10 = vmul.f32 %v7291_v21, %v121_v12  ;;  %v122_v23 = vmul.f32 %v7297_v61, %v121_v12  ;;  %v170_v45 = vmul.f32 %v7307_v32, %v133_v51  ;;  %v134_v0 = vmul.f32 %v7313_v33, %v133_v51 }
 0x4c7   :  { %v155_v59 = vmul.f32 %v7325_v31, %v109_v20  ;;  %v111_v24 = vmul.f32 %v7337_v30, %v109_v20  ;;  %v123_v39 = vmul.f32 %v7351_v19, %v121_v12  ;;  %v143_v1 = vstv %s7284_s29  ;;  %s7370_s29 = sld [smem:[#allocation2 + $0x304]] }
 0x4c8   :  { %5659 = vmatmul.mubr.msk.bf16.vlgmr.msra.gmra.mrb[108].mxu0 %vm3843_vm5, %v3830_v58  ;;  %5665 = vmatmul.mubr.msk.bf16.vlgmr.msra.gmra.mrb[108].mxu1 %vm3843_vm5, %v3831_v28  ;;  %v99_v17 = vstv %s4957_s10  ;;  %v171_v13 = vmul.f32 %v7359_v2, %v133_v51  ;;  %v135_v62 = vmul.f32 %v7365_v26, %v133_v51  ;;  %v7941_v51 = vld [vmem:[#allocation11_spill] sm:$0xff]  ;;  %s7524_s10 = sld [smem:[#allocation2 + $0x483]] }
 0x4c9   :  { %5669 = vmatpush3.bf16.msra.mxu0 %v4057_v57  ;;  %5675 = vmatpush3.bf16.msra.mxu1 %v4109_v42  ;;  %v148_v43 = vmul.f32 %v7263_v18, %v99_v17  ;;  %v100_v3 = vmul.f32 %v7275_v22, %v99_v17  ;;  %v149_v47 = vmul.f32 %v7319_v49, %v99_v17  ;;  %v7940_v42 = vld [vmem:[#allocation8_spill] sm:$0xff] }
 0x4ca   :  { %5670 = vmatprep.mubr.msk.bf16.mxu0 %vm5898_vm0, %v7938_v14  ;;  %5676 = vmatprep.mubr.msk.bf16.mxu1 %vm5898_vm0, %v7938_v14  ;;  %v101_v52 = vmul.f32 %v7331_v55, %v99_v17 }
 0x4cb   :  { %5680 = vmatprep.subr.bf16.mxu0 %v7938_v14  ;;  %5686 = vmatprep.subr.bf16.mxu1 %v7938_v14  ;;  %v156_v8 = vadd.f32 %v154_v56, %v148_v43  ;;  %v112_v5 = vadd.f32 %v110_v11, %v100_v3  ;;  %v157_v6 = vadd.f32 %v155_v59, %v149_v47 }
 0x4cd   :  { %v164_v60 = vadd.f32 %v162_v10, %v156_v8  ;;  %v124_v41 = vadd.f32 %v122_v23, %v112_v5 }
 0x4cf   :  { %v172_v36 = vadd.f32 %v170_v45, %v164_v60  ;;  %v136_v58 = vadd.f32 %v134_v0, %v124_v41  ;;  %v7942_v45 = vld [vmem:[#allocation10_spill] sm:$0xff]  ;;  %v227_v0 = vstv %s7370_s29 }
 0x4d0   :  { %5671 = vmatmul.mubr.msk.bf16.vlgmr.msra.gmra.mrb[112].mxu0 %vm3843_vm5, %v3832_v37  ;;  %5677 = vmatmul.mubr.msk.bf16.vlgmr.msra.gmra.mrb[112].mxu1 %vm3843_vm5, %v3833_v29  ;;  %v7345_v37 = vld [vmem:[%s7837_s0 + $0x58] sm:$0xff] }
 0x4d1   :  { %5681 = vmatpush3.bf16.msra.mxu0 %v4161_v35  ;;  %5687 = vmatpush3.bf16.msra.mxu1 %v4213_v53  ;;  %v163_v54 = vmul.f32 %v7345_v37, %v121_v12  ;;  %v176_v44 = vadd.f32 %v172_v36, %v143_v1  ;;  %v144_v50 = vadd.f32 %v143_v1, %v136_v58  ;;  %v205_v35 = vstv %s7302_s19  ;;  %s7394_s19 = sld [smem:[#allocation2 + $0x381]] }
 0x4d2   :  { %5682 = vmatprep.mubr.msk.bf16.mxu0 %vm5898_vm0, %v7938_v14  ;;  %5688 = vmatprep.mubr.msk.bf16.mxu1 %vm5898_vm0, %v7938_v14  ;;  %v207_v63 = vmul.f32 %v7351_v19, %v205_v35  ;;  %v206_v23 = vmul.f32 %v7297_v61, %v205_v35 }
 0x4d3   :  { %5692 = vmatprep.subr.bf16.mxu0 %v7938_v14  ;;  %5698 = vmatprep.subr.bf16.mxu1 %v7938_v14  ;;  %v165_v38 = vadd.f32 %v163_v54, %v157_v6  ;;  %537 = vst.msk [vmem:[%s7851_s14 + $0x10] sm:$0xff] %vm514_vm1, %v176_v44  ;;  %535 = vst.msk [vmem:[%s7851_s14] sm:$0xff] %vm514_vm1, %v144_v50  ;;  %v555_v27 = vsub.f32 %v7940_v42, %v144_v50 }
 0x4d5   :  { %v173_v53 = vadd.f32 %v171_v13, %v165_v38  ;;  %v575_v17 = vmul.f32 %v555_v27, %v555_v27 }
 0x4d7   :  { %v177_v56 = vadd.f32 %v173_v53, %v143_v1  ;;  %v595_v10 = vsel %vm514_vm1, %v575_v17, 0.0 }
 0x4d8   :  { %5683 = vmatmul.mubr.msk.bf16.vlgmr.msra.gmra.mrb[116].mxu0 %vm3843_vm5, %v3834_v7  ;;  %5689 = vmatmul.mubr.msk.bf16.vlgmr.msra.gmra.mrb[116].mxu1 %vm3843_vm5, %v3835_v46  ;;  %v113_v7 = vadd.f32 %v111_v24, %v101_v52  ;;  %v193_v46 = vstv %s7300_s18  ;;  %s7387_s18 = sld [smem:[#allocation2 + $0x380]] }
 0x4d9   :  { %5693 = vmatpush3.bf16.msra.mxu0 %v4265_v48  ;;  %5699 = vmatpush3.bf16.msra.mxu1 %v4317_v15  ;;  %v195_v40 = vmul.f32 %v7337_v30, %v193_v46  ;;  %v217_v48 = vstv %s7340_s7  ;;  %v194_v12 = vmul.f32 %v7281_v9, %v193_v46  ;;  %538 = vst.msk [vmem:[%s7851_s14 + $0x18] sm:$0xff] %vm514_vm1, %v177_v56 }
 0x4da   :  { %5694 = vmatprep.mubr.msk.bf16.mxu0 %vm5898_vm0, %v7938_v14  ;;  %5700 = vmatprep.mubr.msk.bf16.mxu1 %vm5898_vm0, %v7938_v14  ;;  %v125_v28 = vadd.f32 %v123_v39, %v113_v7  ;;  %v219_v43 = vmul.f32 %v7365_v26, %v217_v48  ;;  %v558_v60 = vsub.f32 %v7941_v51, %v177_v56  ;;  %v7944_v56 = vld [vmem:[#allocation12_spill] sm:$0xff] }
 0x4db   :  { %5704 = vmatprep.subr.bf16.mxu0 %v7938_v14  ;;  %5710 = vmatprep.subr.bf16.mxu1 %v7938_v14  ;;  %v218_v52 = vmul.f32 %v7313_v33, %v217_v48  ;;  %v239_v36 = vmul.f32 %v7325_v31, %v193_v46 }
 0x4dc   :  { %v137_v25 = vadd.f32 %v135_v62, %v125_v28  ;;  %596 = vadd.xlane.f32.xlu0 %v595_v10  ;;  %v578_v58 = vmul.f32 %v558_v60, %v558_v60  ;;  %v238_v28 = vmul.f32 %v7269_v34, %v193_v46  ;;  %v301_v10 = vstv %s7412_s24 }
 0x4de   :  { %v145_v3 = vadd.f32 %v143_v1, %v137_v25  ;;  %v247_v1 = vmul.f32 %v7345_v37, %v205_v35  ;;  %v604_v13 = vsel %vm514_vm1, %v578_v58, 0.0 }
 0x4e0   :  { %5695 = vmatmul.mubr.msk.bf16.vlgmr.msra.gmra.mrb[120].mxu0 %vm3843_vm5, %v3836_v4  ;;  %5701 = vmatmul.mubr.msk.bf16.vlgmr.msra.gmra.mrb[120].mxu1 %vm3843_vm5, %v3837_v16  ;;  %v183_v4 = vstv %s7286_s6  ;;  %v7939_v16 = vld [vmem:[#allocation9_spill] sm:$0xff]  ;;  %536 = vst.msk [vmem:[%s7851_s14 + $0x8] sm:$0xff] %vm514_vm1, %v145_v3  ;;  %v556_v41 = vsub.f32 %v7942_v45, %v145_v3 }
 0x4e1   :  { %5706 = vmatprep.mubr.msk.bf16.mxu0 %vm5898_vm0, %v7938_v14  ;;  %5712 = vmatprep.mubr.msk.bf16.mxu1 %vm5898_vm0, %v7938_v14  ;;  %v185_v29 = vmul.f32 %v7331_v55, %v183_v4  ;;  %v557_v57 = vsub.f32 %v7939_v16, %v176_v44  ;;  %v184_v11 = vmul.f32 %v7275_v22, %v183_v4 }
 0x4e2   :  { %v233_v24 = vmul.f32 %v7319_v49, %v183_v4  ;;  %v576_v54 = vmul.f32 %v556_v41, %v556_v41  ;;  %v255_v44 = vmul.f32 %v7359_v2, %v217_v48  ;;  %v232_v50 = vmul.f32 %v7263_v18, %v183_v4 }
 0x4e3   :  { %v577_v15 = vmul.f32 %v557_v57, %v557_v57  ;;  %v197_v20 = vadd.f32 %v195_v40, %v185_v29  ;;  %v196_v47 = vadd.f32 %v194_v12, %v184_v11  ;;  %v7943_v29 = vld [vmem:[#allocation14_spill] sm:$0xff]  ;;  %v246_v4 = vmul.f32 %v7291_v21, %v205_v35 }
 0x4e4   :  { %v241_v7 = vadd.f32 %v239_v36, %v233_v24  ;;  %v598_v62 = vsel %vm514_vm1, %v576_v54, 0.0  ;;  %v267_v40 = vstv %s7387_s18  ;;  %v240_v25 = vadd.f32 %v238_v28, %v232_v50  ;;  %s7504_s18 = sld [smem:[#allocation2 + $0x480]] }
 0x4e5   :  { %v601_v8 = vsel %vm514_vm1, %v577_v15, 0.0  ;;  %v209_v5 = vadd.f32 %v207_v63, %v197_v20  ;;  %v208_v39 = vadd.f32 %v206_v23, %v196_v47  ;;  %599 = vadd.xlane.f32.xlu0 %v598_v62  ;;  %v254_v63 = vmul.f32 %v7307_v32, %v217_v48 }
 0x4e6   :  { %602 = vadd.xlane.f32.xlu1 %v601_v8  ;;  %v249_v27 = vadd.f32 %v247_v1, %v241_v7  ;;  %v269_v46 = vmul.f32 %v7331_v55, %v267_v40  ;;  %v277_v20 = vstv %s7394_s19  ;;  %v248_v3 = vadd.f32 %v246_v4, %v240_v25 }
 0x4e7   :  { %v221_v59 = vadd.f32 %v219_v43, %v209_v5  ;;  %v220_v38 = vadd.f32 %v218_v52, %v208_v39  ;;  %v289_v43 = vstv %s7396_s20  ;;  %v279_v11 = vmul.f32 %v7337_v30, %v277_v20 }
 0x4e8   :  { %v257_v17 = vadd.f32 %v255_v44, %v249_v27  ;;  %v291_v12 = vmul.f32 %v7351_v19, %v289_v43  ;;  %v7443_v5 = vstv %s7415_s4  ;;  %v256_v60 = vadd.f32 %v254_v63, %v248_v3 }
 0x4e9   :  { %v229_v6 = vadd.f32 %v227_v0, %v221_v59  ;;  %v228_v53 = vadd.f32 %v227_v0, %v220_v38  ;;  %v281_v41 = vadd.f32 %v279_v11, %v269_v46  ;;  %v303_v47 = vmul.f32 %v7365_v26, %v301_v10  ;;  %v7945_v59 = vld [vmem:[#allocation15_spill] sm:$0xff] }
 0x4ea   :  { %605 = vadd.xlane.f32.xlu1 %v604_v13  ;;  %v261_v8 = vadd.f32 %v257_v17, %v227_v0  ;;  %v268_v24 = vmul.f32 %v7275_v22, %v267_v40  ;;  %v278_v36 = vmul.f32 %v7281_v9, %v277_v20  ;;  %v290_v58 = vmul.f32 %v7297_v61, %v289_v43 }
 0x4eb   :  { %540 = vst.msk [vmem:[%s7851_s14 + $0x28] sm:$0xff] %vm514_vm1, %v229_v6  ;;  %v560_v57 = vsub.f32 %v7943_v29, %v229_v6  ;;  %539 = vst.msk [vmem:[%s7851_s14 + $0x20] sm:$0xff] %vm514_vm1, %v228_v53  ;;  %v559_v35 = vsub.f32 %v7944_v56, %v228_v53  ;;  %v260_v39 = vadd.f32 %v256_v60, %v227_v0  ;;  %v7946_v0 = vld [vmem:[#allocation13_spill] sm:$0xff] }
 0x4ec   :  { %542 = vst.msk [vmem:[%s7851_s14 + $0x38] sm:$0xff] %vm514_vm1, %v261_v8  ;;  %v562_v52 = vsub.f32 %v7945_v59, %v261_v8  ;;  %v293_v1 = vadd.f32 %v291_v12, %v281_v41  ;;  %v302_v6 = vmul.f32 %v7313_v33, %v301_v10  ;;  %v280_v44 = vadd.f32 %v278_v36, %v268_v24 }
 0x4ed   :  { %v580_v15 = vmul.f32 %v560_v57, %v560_v57  ;;  %v579_v23 = vmul.f32 %v559_v35, %v559_v35  ;;  %v317_v50 = vmul.f32 %v7319_v49, %v267_v40  ;;  %v323_v13 = vmul.f32 %v7325_v31, %v277_v20  ;;  %541 = vst.msk [vmem:[%s7851_s14 + $0x30] sm:$0xff] %vm514_vm1, %v260_v39 }
 0x4ee   :  { %v582_v7 = vmul.f32 %v562_v52, %v562_v52  ;;  %v561_v62 = vsub.f32 %v7946_v0, %v260_v39  ;;  %v305_v38 = vadd.f32 %v303_v47, %v293_v1  ;;  %v331_v28 = vmul.f32 %v7345_v37, %v289_v43 }
 0x4ef   :  { %v610_v48 = vsel %vm514_vm1, %v580_v15, 0.0  ;;  %v607_v54 = vsel %vm514_vm1, %v579_v23, 0.0  ;;  %v339_v57 = vmul.f32 %v7359_v2, %v301_v10  ;;  %v292_v4 = vadd.f32 %v290_v58, %v280_v44  ;;  %v7948_v58 = vld [vmem:[#allocation16_spill] sm:$0xff] }
 0x4f0   :  { %611 = vadd.xlane.f32.xlu1 %v610_v48  ;;  %608 = vadd.xlane.f32.xlu0 %v607_v54  ;;  %v616_v27 = vsel %vm514_vm1, %v582_v7, 0.0  ;;  %v325_v53 = vadd.f32 %v323_v13, %v317_v50  ;;  %v316_v25 = vmul.f32 %v7263_v18, %v267_v40  ;;  %v581_v63 = vmul.f32 %v561_v62, %v561_v62  ;;  %v7947_v40 = vld [vmem:[#allocation18_spill] sm:$0xff] }
 0x4f1   :  { %v313_v46 = vadd.f32 %v7443_v5, %v305_v38  ;;  %v322_v15 = vmul.f32 %v7269_v34, %v277_v20  ;;  %v330_v17 = vmul.f32 %v7291_v21, %v289_v43  ;;  %v304_v35 = vadd.f32 %v302_v6, %v292_v4  ;;  %v7949_v38 = vld [vmem:[#allocation19_spill] sm:$0xff] }
 0x4f2   :  { %v333_v3 = vadd.f32 %v331_v28, %v325_v53  ;;  %v338_v11 = vmul.f32 %v7307_v32, %v301_v10  ;;  %v351_v12 = vstv %s7445_s3  ;;  %v613_v48 = vsel %vm514_vm1, %v581_v63, 0.0 }
 0x4f3   :  { %544 = vst.msk [vmem:[%s7851_s14 + $0x48] sm:$0xff] %vm514_vm1, %v313_v46  ;;  %v564_v8 = vsub.f32 %v7947_v40, %v313_v46  ;;  %v324_v23 = vadd.f32 %v322_v15, %v316_v25  ;;  %v353_v20 = vmul.f32 %v7331_v55, %v351_v12  ;;  %v312_v43 = vadd.f32 %v7443_v5, %v304_v35 }
 0x4f4   :  { %617 = vadd.xlane.f32.xlu1 %v616_v27  ;;  %614 = vadd.xlane.f32.xlu0 %v613_v48  ;;  %v341_v60 = vadd.f32 %v339_v57, %v333_v3  ;;  %v361_v10 = vstv %s7456_s8  ;;  %v373_v41 = vstv %s7458_s30  ;;  %v385_v1 = vstv %s7464_s9 }
 0x4f5   :  { %v584_v47 = vmul.f32 %v564_v8, %v564_v8  ;;  %v332_v52 = vadd.f32 %v330_v17, %v324_v23  ;;  %v363_v24 = vmul.f32 %v7337_v30, %v361_v10  ;;  %v375_v36 = vmul.f32 %v7351_v19, %v373_v41  ;;  %543 = vst.msk [vmem:[%s7851_s14 + $0x40] sm:$0xff] %vm514_vm1, %v312_v43 }
 0x4f6   :  { %v563_v54 = vsub.f32 %v7948_v58, %v312_v43  ;;  %v345_v39 = vadd.f32 %v341_v60, %v7443_v5  ;;  %v7502_v6 = vstv %s7466_s16  ;;  %v387_v13 = vmul.f32 %v7365_v26, %v385_v1 }
 0x4f7   :  { %v622_v7 = vsel %vm514_vm1, %v584_v47, 0.0  ;;  %v340_v44 = vadd.f32 %v338_v11, %v332_v52  ;;  %v365_v50 = vadd.f32 %v363_v24, %v353_v20  ;;  %v352_v57 = vmul.f32 %v7275_v22, %v351_v12 }
 0x4f8   :  { %623 = vadd.xlane.f32.xlu1 %v622_v7  ;;  %v583_v62 = vmul.f32 %v563_v54, %v563_v54  ;;  %546 = vst.msk [vmem:[%s7851_s14 + $0x58] sm:$0xff] %vm514_vm1, %v345_v39  ;;  %v566_v28 = vsub.f32 %v7949_v38, %v345_v39  ;;  %v362_v27 = vmul.f32 %v7281_v9, %v361_v10 }
 0x4f9   :  { %v344_v4 = vadd.f32 %v340_v44, %v7443_v5  ;;  %v377_v53 = vadd.f32 %v375_v36, %v365_v50  ;;  %v374_v25 = vmul.f32 %v7297_v61, %v373_v41  ;;  %v386_v63 = vmul.f32 %v7313_v33, %v385_v1  ;;  %v7950_v5 = vld [vmem:[#allocation17_spill] sm:$0xff] }
 0x4fa   :  { %v619_v46 = vsel %vm514_vm1, %v583_v62, 0.0  ;;  %v586_v15 = vmul.f32 %v566_v28, %v566_v28  ;;  %v364_v17 = vadd.f32 %v362_v27, %v352_v57  ;;  %v401_v35 = vmul.f32 %v7319_v49, %v351_v12 }
 0x4fb   :  { %620 = vadd.xlane.f32.xlu0 %v619_v46  ;;  %545 = vst.msk [vmem:[%s7851_s14 + $0x50] sm:$0xff] %vm514_vm1, %v344_v4  ;;  %v565_v3 = vsub.f32 %v7950_v5, %v344_v4  ;;  %v389_v11 = vadd.f32 %v387_v13, %v377_v53  ;;  %v407_v48 = vmul.f32 %v7325_v31, %v361_v10  ;;  %v435_v44 = vstv %s7504_s18 }
 0x4fc   :  { %v415_v8 = vmul.f32 %v7345_v37, %v373_v41  ;;  %v628_v23 = vsel %vm514_vm1, %v586_v15, 0.0  ;;  %v376_v20 = vadd.f32 %v374_v25, %v364_v17  ;;  %v423_v43 = vmul.f32 %v7359_v2, %v385_v1 }
 0x4fd   :  { %v400_v60 = vmul.f32 %v7263_v18, %v351_v12  ;;  %629 = vadd.xlane.f32.xlu1 %v628_v23  ;;  %v585_v47 = vmul.f32 %v565_v3, %v565_v3  ;;  %v397_v52 = vadd.f32 %v7502_v6, %v389_v11  ;;  %v409_v24 = vadd.f32 %v407_v48, %v401_v35  ;;  %v7951_v12 = vld [vmem:[#allocation22_spill] sm:$0xff] }
 0x4fe   :  { %v406_v36 = vmul.f32 %v7269_v34, %v361_v10  ;;  %v388_v54 = vadd.f32 %v386_v63, %v376_v20  ;;  %v414_v39 = vmul.f32 %v7291_v21, %v373_v41  ;;  %v422_v7 = vmul.f32 %v7307_v32, %v385_v1  ;;  %v7952_v63 = vld [vmem:[#allocation20_spill] sm:$0xff] }
 0x4ff   :  { %v625_v50 = vsel %vm514_vm1, %v585_v47, 0.0  ;;  %548 = vst.msk [vmem:[%s7851_s14 + $0x68] sm:$0xff] %vm514_vm1, %v397_v52  ;;  %v568_v13 = vsub.f32 %v7951_v12, %v397_v52  ;;  %v417_v62 = vadd.f32 %v415_v8, %v409_v24  ;;  %v437_v41 = vmul.f32 %v7331_v55, %v435_v44 }
 0x500   :  { %v408_v28 = vadd.f32 %v406_v36, %v400_v60  ;;  %626 = vadd.xlane.f32.xlu0 %v625_v50  ;;  %v396_v10 = vadd.f32 %v7502_v6, %v388_v54  ;;  %v445_v1 = vstv %s7515_s21  ;;  %v457_v57 = vstv %s7517_s22  ;;  %v7954_v54 = vld [vmem:[#allocation21_spill] sm:$0xff] }
 0x501   :  { %v588_v27 = vmul.f32 %v568_v13, %v568_v13  ;;  %v425_v4 = vadd.f32 %v423_v43, %v417_v62  ;;  %v447_v25 = vmul.f32 %v7337_v30, %v445_v1  ;;  %v459_v15 = vmul.f32 %v7351_v19, %v457_v57  ;;  %v7953_v19 = vld [vmem:[#allocation23_spill] sm:$0xff] }
 0x502   :  { %v416_v53 = vadd.f32 %v414_v39, %v408_v28  ;;  %547 = vst.msk [vmem:[%s7851_s14 + $0x60] sm:$0xff] %vm514_vm1, %v396_v10  ;;  %v567_v46 = vsub.f32 %v7952_v63, %v396_v10  ;;  %v469_v17 = vstv %s7524_s10  ;;  %v479_v35 = vstv %s7526_s23 }
 0x503   :  { %v634_v55 = vsel %vm514_vm1, %v588_v27, 0.0  ;;  %v429_v3 = vadd.f32 %v425_v4, %v7502_v6  ;;  %v449_v48 = vadd.f32 %v447_v25, %v437_v41  ;;  %v471_v30 = vmul.f32 %v7365_v26, %v469_v17 }
 0x504   :  { %v424_v11 = vadd.f32 %v422_v7, %v416_v53  ;;  %635 = vadd.xlane.f32.xlu1 %v634_v55  ;;  %v587_v8 = vmul.f32 %v567_v46, %v567_v46  ;;  %v436_v23 = vmul.f32 %v7275_v22, %v435_v44  ;;  %v446_v20 = vmul.f32 %v7281_v9, %v445_v1 }
 0x505   :  { %550 = vst.msk [vmem:[%s7851_s14 + $0x78] sm:$0xff] %vm514_vm1, %v429_v3  ;;  %v570_v43 = vsub.f32 %v7953_v19, %v429_v3  ;;  %v461_v47 = vadd.f32 %v459_v15, %v449_v48  ;;  %v458_v52 = vmul.f32 %v7297_v61, %v457_v57  ;;  %v470_v26 = vmul.f32 %v7313_v33, %v469_v17 }
 0x506   :  { %v428_v60 = vadd.f32 %v424_v11, %v7502_v6  ;;  %v631_v24 = vsel %vm514_vm1, %v587_v8, 0.0  ;;  %v448_v36 = vadd.f32 %v446_v20, %v436_v23  ;;  %v485_v22 = vmul.f32 %v7319_v49, %v435_v44  ;;  %v7958_v23 = vld [vmem:[#allocation25_spill] sm:$0xff] }
 0x507   :  { %632 = vadd.xlane.f32.xlu0 %v631_v24  ;;  %v590_v9 = vmul.f32 %v570_v43, %v570_v43  ;;  %v473_v6 = vadd.f32 %v471_v30, %v461_v47  ;;  %v491_v7 = vmul.f32 %v7325_v31, %v445_v1  ;;  %v499_v50 = vmul.f32 %v7345_v37, %v457_v57  ;;  %v7955_v37 = vld [vmem:[#allocation26_spill] sm:$0xff]  ;;  %v737_v43 = vld [vmem:[%s7839_s2 + $0x8] sm:$0xff] }
 0x508   :  { %549 = vst.msk [vmem:[%s7851_s14 + $0x70] sm:$0xff] %vm514_vm1, %v428_v60  ;;  %v569_v39 = vsub.f32 %v7954_v54, %v428_v60  ;;  %v460_v61 = vadd.f32 %v458_v52, %v448_v36  ;;  %v507_v13 = vmul.f32 %v7359_v2, %v469_v17  ;;  %v484_v33 = vmul.f32 %v7263_v18, %v435_v44  ;;  %v739_v36 = vld [vmem:[%s7839_s2 + $0x18] sm:$0xff] }
 0x509   :  { %v640_v49 = vsel %vm514_vm1, %v590_v9, 0.0  ;;  %v481_v28 = vadd.f32 %v479_v35, %v473_v6  ;;  %v493_v10 = vadd.f32 %v491_v7, %v485_v22  ;;  %v490_v27 = vmul.f32 %v7269_v34, %v445_v1  ;;  %v7956_v34 = vld [vmem:[#allocation24_spill] sm:$0xff]  ;;  %v738_v9 = vld [vmem:[%s7839_s2 + $0x10] sm:$0xff] }
 0x50a   :  { %v589_v62 = vmul.f32 %v569_v39, %v569_v39  ;;  %641 = vadd.xlane.f32.xlu1 %v640_v49  ;;  %v472_v41 = vadd.f32 %v470_v26, %v460_v61  ;;  %v498_v4 = vmul.f32 %v7291_v21, %v457_v57  ;;  %v506_v25 = vmul.f32 %v7307_v32, %v469_v17  ;;  %v7957_v32 = vld [vmem:[#allocation27_spill] sm:$0xff] }
 0x50b   :  { %552 = vst.msk [vmem:[%s7851_s14 + $0x88] sm:$0xff] %vm514_vm1, %v481_v28  ;;  %v572_v18 = vsub.f32 %v7955_v37, %v481_v28  ;;  %v501_v2 = vadd.f32 %v499_v50, %v493_v10  ;;  %v492_v53 = vadd.f32 %v490_v27, %v484_v33  ;;  %v743_v52 = vsel %vm514_vm1, %v737_v43, 0.0 }
 0x50c   :  { %v637_v31 = vsel %vm514_vm1, %v589_v62, 0.0  ;;  %v480_v44 = vadd.f32 %v479_v35, %v472_v41  ;;  %v749_v22 = vsel %vm514_vm1, %v739_v36, 0.0  ;;  %v746_v39 = vsel %vm514_vm1, %v738_v9, 0.0  ;;  %v5827_v9 = vld [vmem:[%s7848_s11 + $0x28] sm:$0xff]  }
 0x50d   :  { %638 = vadd.xlane.f32.xlu0 %v637_v31  ;;  %v592_v46 = vmul.f32 %v572_v18, %v572_v18  ;;  %v509_v15 = vadd.f32 %v507_v13, %v501_v2  ;;  %v500_v1 = vadd.f32 %v498_v4, %v492_v53  ;;  %v5822_v4 = vld [vmem:[%s7848_s11] sm:$0xff]   ;;  %v5823_v31 = vld [vmem:[%s7848_s11 + $0x8] sm:$0xff]  }
 0x50e   :  { %551 = vst.msk [vmem:[%s7851_s14 + $0x80] sm:$0xff] %vm514_vm1, %v480_v44  ;;  %v571_v21 = vsub.f32 %v7956_v34, %v480_v44 }
 0x50f   :  { %v646_v57 = vsel %vm514_vm1, %v592_v46, 0.0  ;;  %v513_v55 = vadd.f32 %v509_v15, %v479_v35  ;;  %v508_v11 = vadd.f32 %v506_v25, %v500_v1 }
 0x510   :  { %647 = vadd.xlane.f32.xlu1 %v646_v57  ;;  %v591_v3 = vmul.f32 %v571_v21, %v571_v21 }
 0x511   :  { %554 = vst.msk [vmem:[%s7851_s14 + $0x98] sm:$0xff] %vm514_vm1, %v513_v55  ;;  %v574_v17 = vsub.f32 %v7957_v32, %v513_v55  ;;  %v512_v8 = vadd.f32 %v508_v11, %v479_v35  ;;  %v736_v35 = vld [vmem:[%s7839_s2] sm:$0xff]  ;;  %v5824_v11 = vld [vmem:[%s7848_s11 + $0x10] sm:$0xff]  }
 0x512   :  { %v643_v48 = vsel %vm514_vm1, %v591_v3, 0.0  ;;  %v740_v26 = vsel %vm514_vm1, %v736_v35, 0.0 }
 0x513   :  { %644 = vadd.xlane.f32.xlu0 %v643_v48  ;;  %v594_v30 = vmul.f32 %v574_v17, %v574_v17  ;;  %553 = vst.msk [vmem:[%s7851_s14 + $0x90] sm:$0xff] %vm514_vm1, %v512_v8  ;;  %v573_v20 = vsub.f32 %v7958_v23, %v512_v8  ;;  %v5825_v17 = vld [vmem:[%s7848_s11 + $0x18] sm:$0xff]  }
 0x515   :  { %v652_v60 = vsel %vm514_vm1, %v594_v30, 0.0  ;;  %v593_v47 = vmul.f32 %v573_v20, %v573_v20 }
 0x516   :  { %653 = vadd.xlane.f32.xlu1 %v652_v60 }
 0x517   :  { %v649_v24 = vsel %vm514_vm1, %v593_v47, 0.0 }
 0x518   :  { %650 = vadd.xlane.f32.xlu0 %v649_v24 }
 0x51a   :  { %744 = vadd.xlane.f32.xlu1 %v743_v52 }
 0x51c   :  { %741 = vadd.xlane.f32.xlu0 %v740_v26 }
 0x51e   :  { %750 = vadd.xlane.f32.xlu1 %v749_v22  ;;  %v5826_v22 = vld [vmem:[%s7848_s11 + $0x20] sm:$0xff]  }
 0x520   :  { %747 = vadd.xlane.f32.xlu0 %v746_v39 }
 0x593   :  { %v3885_v6 = vpop.f32.mrb[104].mxu0  ;;  %v3937_v7 = vpop.f32.mrb[104].mxu1 }
 0x594   :  { %v5648_v61 = vpop.f32.mrb[105].mxu0  ;;  %v5654_v50 = vpop.f32.mrb[105].mxu1 }
 0x595   :  { %v3888_v13 = vpop.f32.mrb[106].mxu0  ;;  %v3940_v33 = vpop.f32.mrb[106].mxu1 }
 0x596   :  { %v4360_v49 = vpack.c.bf16 %v3888_v13, %v3885_v6  ;;  %v4361_v62 = vpack.c.bf16 %v3940_v33, %v3937_v7  ;;  %v5649_v28 = vpop.f32.mrb[107].mxu0  ;;  %v5655_v10 = vpop.f32.mrb[107].mxu1 }
 0x598   :  { %v4379_v41 = vsel %vm3847_vm4, %v4360_v49, 0  ;;  %v4431_v27 = vsel %vm3847_vm4, %v4361_v62, 0 }
 0x599   :  { %5705 = vmatpush3.bf16.msra.mxu0 %v4379_v41  ;;  %5711 = vmatpush3.bf16.msra.mxu1 %v4431_v27  ;;  %v5828_v27 = vld [vmem:[%s7848_s11 + $0x30] sm:$0xff]  }
 0x59a   :  { %5716 = vmatprep.subr.bf16.mxu0 %v7938_v14  ;;  %5722 = vmatprep.subr.bf16.mxu1 %v7938_v14 }
 0x59b   :  { %v3989_v18 = vpop.f32.mrb[108].mxu0  ;;  %v4041_v2 = vpop.f32.mrb[108].mxu1 }
 0x59c   :  { %v5660_v44 = vpop.f32.mrb[109].mxu0  ;;  %v5666_v53 = vpop.f32.mrb[109].mxu1  ;;  %5707 = vmatmul.mubr.msk.bf16.vlgmr.msra.gmra.mrb[124].mxu0 %vm3843_vm5, %v5822_v4  ;;  %5713 = vmatmul.mubr.msk.bf16.vlgmr.msra.gmra.mrb[124].mxu1 %vm3843_vm5, %v5823_v31  ;;  %v5829_v4 = vld [vmem:[%s7848_s11 + $0x38] sm:$0xff]  }
 0x59d   :  { %v3992_v25 = vpop.f32.mrb[110].mxu0  ;;  %v4044_v46 = vpop.f32.mrb[110].mxu1  ;;  %5718 = vmatprep.mubr.msk.bf16.mxu0 %vm5898_vm0, %v7938_v14  ;;  %5724 = vmatprep.mubr.msk.bf16.mxu1 %vm5898_vm0, %v7938_v14 }
 0x59e   :  { %v4362_v15 = vpack.c.bf16 %v3992_v25, %v3989_v18  ;;  %v4363_v21 = vpack.c.bf16 %v4044_v46, %v4041_v2  ;;  %v5661_v1 = vpop.f32.mrb[111].mxu0  ;;  %v5667_v57 = vpop.f32.mrb[111].mxu1 }
 0x59f   :  { %v603_v57 = vpop.xlane.xlu1 %602 }
 0x5a0   :  { %v4483_v55 = vsel %vm3847_vm4, %v4362_v15, 0  ;;  %v4535_v3 = vsel %vm3847_vm4, %v4363_v21, 0 }
 0x5a1   :  { %5717 = vmatpush3.bf16.msra.mxu0 %v4483_v55  ;;  %5723 = vmatpush3.bf16.msra.mxu1 %v4535_v3 }
 0x5a2   :  { %5728 = vmatprep.subr.bf16.mxu0 %v7938_v14  ;;  %5734 = vmatprep.subr.bf16.mxu1 %v7938_v14 }
 0x5a3   :  { %v4093_v48 = vpop.f32.mrb[112].mxu0  ;;  %v4145_v8 = vpop.f32.mrb[112].mxu1 }
 0x5a4   :  { %v5672_v30 = vpop.f32.mrb[113].mxu0  ;;  %v5678_v20 = vpop.f32.mrb[113].mxu1  ;;  %5719 = vmatmul.mubr.msk.bf16.vlgmr.msra.gmra.mrb[128].mxu0 %vm3843_vm5, %v5824_v11  ;;  %5725 = vmatmul.mubr.msk.bf16.vlgmr.msra.gmra.mrb[128].mxu1 %vm3843_vm5, %v5825_v17  ;;  %v5830_v11 = vld [vmem:[%s7848_s11 + $0x40] sm:$0xff]   ;;  %v5831_v17 = vld [vmem:[%s7848_s11 + $0x48] sm:$0xff]   ;;  %s5899_s11 = smov [#allocation5]  }
 0x5a5   :  { %v4096_v43 = vpop.f32.mrb[114].mxu0  ;;  %v4148_v60 = vpop.f32.mrb[114].mxu1  ;;  %5730 = vmatprep.mubr.msk.bf16.mxu0 %vm5898_vm0, %v7938_v14  ;;  %5736 = vmatprep.mubr.msk.bf16.mxu1 %vm5898_vm0, %v7938_v14  ;;  %s4936_s13 = sshll.u32 %s5899_s11, 4  ;;  %s4937_s13 = int_to_ptr.vmem [resolvable:$true] %s4936_s13 }
 0x5a6   :  { %v4364_v47 = vpack.c.bf16 %v4096_v43, %v4093_v48  ;;  %v4365_v52 = vpack.c.bf16 %v4148_v60, %v4145_v8  ;;  %v5673_v35 = vpop.f32.mrb[115].mxu0  ;;  %v5679_v24 = vpop.f32.mrb[115].mxu1  ;;  %s5868_s18 = scalar_lea.vmem %s4937_s13, 16  ;;  %s5872_s19 = scalar_lea.vmem %s4937_s13, 32 }
 0x5a7   :  { %v597_v48 = vpop.xlane.xlu0 %596  ;;  %p5869_p5 = scmp.ne.s32.totalorder %s4937_s13, %s5868_s18  ;;  %p5873_p6 = scmp.lt.s32.totalorder %s4937_s13, %s4937_s13 }
 0x5a8   :  { %v4587_v36 = vsel %vm3847_vm4, %v4364_v47, 0  ;;  %v4639_v26 = vsel %vm3847_vm4, %v4365_v52, 0  ;;  %p5874_p7 = scmp.lt.s32.totalorder %s5872_s19, %s5868_s18 }
 0x5a9   :  { %5729 = vmatpush3.bf16.msra.mxu0 %v4587_v36  ;;  %5735 = vmatpush3.bf16.msra.mxu1 %v4639_v26 }
 0x5aa   :  { %5740 = vmatprep.subr.bf16.mxu0 %v7938_v14  ;;  %5746 = vmatprep.subr.bf16.mxu1 %v7938_v14  ;;  %p5875_p8 = por %p5874_p7, %p5873_p6 }
 0x5ab   :  { %v4197_v39 = vpop.f32.mrb[116].mxu0  ;;  %v4249_v6 = vpop.f32.mrb[116].mxu1 }
 0x5ac   :  { %v5684_v7 = vpop.f32.mrb[117].mxu0  ;;  %v5690_v61 = vpop.f32.mrb[117].mxu1  ;;  %5731 = vmatmul.mubr.msk.bf16.vlgmr.msra.gmra.mrb[132].mxu0 %vm3843_vm5, %v5826_v22  ;;  %5737 = vmatmul.mubr.msk.bf16.vlgmr.msra.gmra.mrb[132].mxu1 %vm3843_vm5, %v5827_v9  ;;  %p5876_p9 = pnand %p5875_p8, %p5869_p5 }
 0x5ad   :  { %v4200_v50 = vpop.f32.mrb[118].mxu0  ;;  %v4252_v13 = vpop.f32.mrb[118].mxu1  ;;  %5742 = vmatprep.mubr.msk.bf16.mxu0 %vm5898_vm0, %v7938_v14  ;;  %5748 = vmatprep.mubr.msk.bf16.mxu1 %vm5898_vm0, %v7938_v14 }
 0x5ae   :  { %v4366_v33 = vpack.c.bf16 %v4200_v50, %v4197_v39  ;;  %v4367_v49 = vpack.c.bf16 %v4252_v13, %v4249_v6  ;;  %v5685_v62 = vpop.f32.mrb[119].mxu0  ;;  %v5691_v28 = vpop.f32.mrb[119].mxu1 }
 0x5af   :  { %v600_v8 = vpop.xlane.xlu0 %599 }
 0x5b0   :  { %v4691_v10 = vsel %vm3847_vm4, %v4366_v33, 0  ;;  %v4743_v41 = vsel %vm3847_vm4, %v4367_v49, 0  ;;  %v655_v43 = vadd.f32 %v600_v8, %v597_v48 }
 0x5b1   :  { %5741 = vmatpush3.bf16.msra.mxu0 %v4691_v10  ;;  %5747 = vmatpush3.bf16.msra.mxu1 %v4743_v41 }
 0x5b2   :  { %5752 = vmatprep.subr.bf16.mxu0 %v7938_v14  ;;  %5758 = vmatprep.subr.bf16.mxu1 %v7938_v14  ;;  %v656_v52 = vrot.slane %v655_v43, 4 }
 0x5b3   :  { %v4301_v31 = vpop.f32.mrb[120].mxu0  ;;  %v4353_v18 = vpop.f32.mrb[120].mxu1 }
 0x5b4   :  { %v5696_v2 = vpop.f32.mrb[121].mxu0  ;;  %v5702_v44 = vpop.f32.mrb[121].mxu1  ;;  %5743 = vmatmul.mubr.msk.bf16.vlgmr.msra.gmra.mrb[136].mxu0 %vm3843_vm5, %v5828_v27  ;;  %5749 = vmatmul.mubr.msk.bf16.vlgmr.msra.gmra.mrb[136].mxu1 %vm3843_vm5, %v5829_v4  ;;  %v657_v22 = vadd.f32 %v656_v52, %v655_v43 }
 0x5b5   :  { %v4304_v53 = vpop.f32.mrb[122].mxu0  ;;  %v4356_v25 = vpop.f32.mrb[122].mxu1  ;;  %5754 = vmatprep.mubr.msk.bf16.mxu0 %vm5898_vm0, %v7938_v14  ;;  %5760 = vmatprep.mubr.msk.bf16.mxu1 %vm5898_vm0, %v7938_v14 }
 0x5b6   :  { %v4368_v46 = vpack.c.bf16 %v4304_v53, %v4301_v31  ;;  %v4369_v15 = vpack.c.bf16 %v4356_v25, %v4353_v18  ;;  %v5697_v21 = vpop.f32.mrb[123].mxu0  ;;  %v5703_v1 = vpop.f32.mrb[123].mxu1  ;;  %v658_v61 = vrot.slane %v657_v22, 2 }
 0x5b7   :  { %v606_v14 = vpop.xlane.xlu1 %605  ;;  %v609_v60 = vpop.xlane.xlu0 %608 }
 0x5b8   :  { %v4795_v55 = vsel %vm3847_vm4, %v4368_v46, 0  ;;  %v4847_v3 = vsel %vm3847_vm4, %v4369_v15, 0  ;;  %v662_v20 = vadd.f32 %v606_v14, %v603_v57  ;;  %v659_v28 = vadd.f32 %v658_v61, %v657_v22 }
 0x5b9   :  { %5753 = vmatpush3.bf16.msra.mxu0 %v4795_v55  ;;  %5759 = vmatpush3.bf16.msra.mxu1 %v4847_v3 }
 0x5ba   :  { %v663_v47 = vrot.slane %v662_v20, 4  ;;  %v660_v44 = vrot.slane %v659_v28, 1 }
 0x5bb   :  { %v612_v30 = vpop.xlane.xlu1 %611  ;;  %v615_v36 = vpop.xlane.xlu0 %614 }
 0x5bc   :  { %5755 = vmatmul.mubr.msk.bf16.vlgmr.msra.gmra.mrb[140].mxu0 %vm3843_vm5, %v5830_v11  ;;  %5761 = vmatmul.mubr.msk.bf16.vlgmr.msra.gmra.mrb[140].mxu1 %vm3843_vm5, %v5831_v17  ;;  %v669_v35 = vadd.f32 %v612_v30, %v609_v60  ;;  %v664_v26 = vadd.f32 %v663_v47, %v662_v20  ;;  %v661_v57 = vadd.f32 %v660_v44, %v659_v28 }
 0x5be   :  { %v670_v9 = vrot.slane %v669_v35, 4  ;;  %v665_v7 = vrot.slane %v664_v26, 2 }
 0x5bf   :  { %v618_v24 = vpop.xlane.xlu1 %617  ;;  %v621_v33 = vpop.xlane.xlu0 %620 }
 0x5c0   :  { %v676_v39 = vadd.f32 %v618_v24, %v615_v36  ;;  %v671_v50 = vadd.f32 %v670_v9, %v669_v35  ;;  %v666_v62 = vadd.f32 %v665_v7, %v664_v26 }
 0x5c2   :  { %v677_v13 = vrot.slane %v676_v39, 4  ;;  %v672_v10 = vrot.slane %v671_v50, 2  ;;  %v667_v2 = vrot.slane %v666_v62, 1 }
 0x5c3   :  { %v624_v6 = vpop.xlane.xlu1 %623  ;;  %v627_v31 = vpop.xlane.xlu0 %626 }
 0x5c4   :  { %v683_v49 = vadd.f32 %v624_v6, %v621_v33  ;;  %v678_v41 = vadd.f32 %v677_v13, %v676_v39  ;;  %v673_v53 = vadd.f32 %v672_v10, %v671_v50  ;;  %v668_v1 = vadd.f32 %v667_v2, %v666_v62 }
 0x5c6   :  { %v684_v4 = vrot.slane %v683_v49, 4  ;;  %v679_v25 = vrot.slane %v678_v41, 2  ;;  %v674_v55 = vrot.slane %v673_v53, 1  ;;  %v725_v8 = vadd.f32 %v668_v1, %v661_v57 }
 0x5c7   :  { %v630_v27 = vpop.xlane.xlu1 %629  ;;  %v633_v48 = vpop.xlane.xlu0 %632 }
 0x5c8   :  { %v690_v18 = vadd.f32 %v630_v27, %v627_v31  ;;  %v685_v46 = vadd.f32 %v684_v4, %v683_v49  ;;  %v680_v3 = vadd.f32 %v679_v25, %v678_v41  ;;  %v675_v30 = vadd.f32 %v674_v55, %v673_v53 }
 0x5ca   :  { %v691_v15 = vrot.slane %v690_v18, 4  ;;  %v686_v11 = vrot.slane %v685_v46, 2  ;;  %v681_v20 = vrot.slane %v680_v3, 1  ;;  %v726_v26 = vadd.f32 %v725_v8, %v675_v30 }
 0x5cb   :  { %v636_v21 = vpop.xlane.xlu1 %635  ;;  %v639_v24 = vpop.xlane.xlu0 %638 }
 0x5cc   :  { %v692_v17 = vadd.f32 %v691_v15, %v690_v18  ;;  %v697_v14 = vadd.f32 %v636_v21, %v633_v48  ;;  %v687_v47 = vadd.f32 %v686_v11, %v685_v46  ;;  %v682_v22 = vadd.f32 %v681_v20, %v680_v3 }
 0x5ce   :  { %v698_v43 = vrot.slane %v697_v14, 4  ;;  %v693_v52 = vrot.slane %v692_v17, 2  ;;  %v688_v9 = vrot.slane %v687_v47, 1  ;;  %v727_v13 = vadd.f32 %v726_v26, %v682_v22 }
 0x5cf   :  { %v642_v60 = vpop.xlane.xlu1 %641  ;;  %v645_v10 = vpop.xlane.xlu0 %644 }
 0x5d0   :  { %v699_v35 = vadd.f32 %v698_v43, %v697_v14  ;;  %v704_v36 = vadd.f32 %v642_v60, %v639_v24  ;;  %v694_v39 = vadd.f32 %v693_v52, %v692_v17  ;;  %v689_v33 = vadd.f32 %v688_v9, %v687_v47 }
 0x5d2   :  { %v700_v6 = vrot.slane %v699_v35, 2  ;;  %v705_v7 = vrot.slane %v704_v36, 4  ;;  %v695_v49 = vrot.slane %v694_v39, 1  ;;  %v728_v31 = vadd.f32 %v727_v13, %v689_v33 }
 0x5d3   :  { %v648_v61 = vpop.xlane.xlu1 %647  ;;  %v651_v25 = vpop.xlane.xlu0 %650 }
 0x5d4   :  { %v706_v50 = vadd.f32 %v705_v7, %v704_v36  ;;  %v701_v62 = vadd.f32 %v700_v6, %v699_v35  ;;  %v711_v41 = vadd.f32 %v648_v61, %v645_v10  ;;  %v696_v18 = vadd.f32 %v695_v49, %v694_v39 }
 0x5d6   :  { %v707_v28 = vrot.slane %v706_v50, 2  ;;  %v712_v27 = vrot.slane %v711_v41, 4  ;;  %v702_v2 = vrot.slane %v701_v62, 1  ;;  %v729_v1 = vadd.f32 %v728_v31, %v696_v18 }
 0x5d7   :  { %v654_v4 = vpop.xlane.xlu1 %653  ;;  %v742_v17 = vpop.xlane.xlu0 %741 }
 0x5d8   :  { %v708_v44 = vadd.f32 %v707_v28, %v706_v50  ;;  %v713_v53 = vadd.f32 %v712_v27, %v711_v41  ;;  %v718_v15 = vadd.f32 %v654_v4, %v651_v25  ;;  %v703_v57 = vadd.f32 %v702_v2, %v701_v62 }
 0x5da   :  { %v714_v46 = vrot.slane %v713_v53, 2  ;;  %v709_v55 = vrot.slane %v708_v44, 1  ;;  %v719_v11 = vrot.slane %v718_v15, 4  ;;  %v730_v8 = vadd.f32 %v729_v1, %v703_v57 }
 0x5db   :  { %v745_v21 = vpop.xlane.xlu1 %744  ;;  %v748_v52 = vpop.xlane.xlu0 %747 }
 0x5dc   :  { %v715_v3 = vadd.f32 %v714_v46, %v713_v53  ;;  %v720_v48 = vadd.f32 %v719_v11, %v718_v15  ;;  %v752_v14 = vadd.f32 %v745_v21, %v742_v17  ;;  %v710_v30 = vadd.f32 %v709_v55, %v708_v44 }
 0x5de   :  { %v716_v43 = vrot.slane %v715_v3, 1  ;;  %v721_v60 = vrot.slane %v720_v48, 2  ;;  %v753_v47 = vrot.slane %v752_v14, 4  ;;  %v731_v26 = vadd.f32 %v730_v8, %v710_v30 }
 0x5df   :  { %v751_v20 = vpop.xlane.xlu1 %750 }
 0x5e0   :  { %v722_v35 = vadd.f32 %v721_v60, %v720_v48  ;;  %v754_v24 = vadd.f32 %v753_v47, %v752_v14  ;;  %v759_v36 = vadd.f32 %v751_v20, %v748_v52  ;;  %v717_v22 = vadd.f32 %v716_v43, %v715_v3 }
 0x5e2   :  { %v723_v9 = vrot.slane %v722_v35, 1  ;;  %v755_v39 = vrot.slane %v754_v24, 2  ;;  %v760_v6 = vrot.slane %v759_v36, 4  ;;  %v732_v49 = vadd.f32 %v731_v26, %v717_v22 }
 0x5e4   :  { %v756_v7 = vadd.f32 %v755_v39, %v754_v24  ;;  %v761_v61 = vadd.f32 %v760_v6, %v759_v36  ;;  %v724_v50 = vadd.f32 %v723_v9, %v722_v35 }
 0x5e6   :  { %v757_v13 = vrot.slane %v756_v7, 1  ;;  %v762_v33 = vrot.slane %v761_v61, 2  ;;  %v733_v41 = vadd.f32 %v732_v49, %v724_v50 }
 0x5e8   :  { %v763_v62 = vadd.f32 %v762_v33, %v761_v61  ;;  %v758_v28 = vadd.f32 %v757_v13, %v756_v7  ;;  %v735_v4 = vmul.f32 0.000390625, %v733_v41 }
 0x5ea   :  { %v764_v10 = vrot.slane %v763_v62, 1 }
 0x5ec   :  { %v765_v27 = vadd.f32 %v764_v10, %v763_v62 }
 0x5ee   :  { %v766_v31 = vadd.f32 %v765_v27, %v758_v28 }
 0x5f0   :  { %v768_v18 = vmul.f32 0.001953125, %v766_v31 }
 0x5f2   :  { %v769_v2 = vmul.f32 %v768_v18, %v735_v4 }
 0x5f4   :  { %771 = vst.msk [vmem:[#allocation5] sm:$0x1] %vm770_vm6, %v769_v2 }
 0x5f5   :  { %5879 = shalt.err (!%p5876_p9)
}
 0x5f6   :  { %s5880_s14 = scalar_lea.hbm %s7849_s12, 16 }
 0x5f7   :  { %p5881_p10 = scmp.ne.s32.totalorder %s7849_s12, %s5880_s14  ;;  %p5884_p11 = scmp.lt.u32.totalorder %s5880_s14, %s7849_s12 }
 0x5f9   :  { %p5886_p12 = pnand %p5884_p11, %p5881_p10 }
 0x5fb   :  { %5889 = shalt.err (!%p5886_p12)
}
 0x5fc   :  { %4939 = dma.vmem_to_hbm [thread:$0]  %s4937_s13, 16, %s7849_s12, [#allocation3]   ;;  %v7959_v44 = vld [vmem:[#allocation28_spill] sm:$0xff]  ;;  %v7960_v25 = vld [vmem:[#allocation29_spill] sm:$0xff]  ;;  %v7961_v1 = vld [vmem:[#allocation30_spill] sm:$0xff] }
 0x5fd   :  { %v2750_v53 = vmax.f32 %v7940_v42, %v7959_v44  ;;  %v2752_v46 = vmax.f32 %v7939_v16, %v7960_v25  ;;  %v2751_v57 = vmax.f32 %v7942_v45, %v7961_v1  ;;  %v7962_v55 = vld [vmem:[#allocation31_spill] sm:$0xff]  ;;  %v7963_v20 = vld [vmem:[#allocation32_spill] sm:$0xff]  ;;  %v7964_v60 = vld [vmem:[#allocation33_spill] sm:$0xff] }
 0x5fe   :  { %v2753_v3 = vmax.f32 %v7941_v51, %v7962_v55  ;;  %v2754_v43 = vmax.f32 %v7944_v56, %v7963_v20  ;;  %v2756_v47 = vmax.f32 %v7946_v0, %v7964_v60  ;;  %v7965_v24 = vld [vmem:[#allocation34_spill] sm:$0xff]  ;;  %v7966_v26 = vld [vmem:[#allocation35_spill] sm:$0xff]  ;;  %v7967_v13 = vld [vmem:[#allocation36_spill] sm:$0xff] }
 0x5ff   :  { %v2755_v36 = vmax.f32 %v7943_v29, %v7965_v24  ;;  %v2757_v22 = vmax.f32 %v7945_v59, %v7966_v26  ;;  %v2758_v33 = vmax.f32 %v7948_v58, %v7967_v13  ;;  %v7968_v49 = vld [vmem:[#allocation37_spill] sm:$0xff]  ;;  %v7969_v41 = vld [vmem:[#allocation38_spill] sm:$0xff]  ;;  %v7970_v4 = vld [vmem:[#allocation39_spill] sm:$0xff] }
 0x600   :  { %v2760_v62 = vmax.f32 %v7950_v5, %v7968_v49  ;;  %v2759_v27 = vmax.f32 %v7947_v40, %v7969_v41  ;;  %v2761_v31 = vmax.f32 %v7949_v38, %v7970_v4  ;;  %v7972_v1 = vld [vmem:[#allocation41_spill] sm:$0xff]  ;;  %v7975_v20 = vld [vmem:[#allocation44_spill] sm:$0xff]  ;;  %v7977_v24 = vld [vmem:[#allocation46_spill] sm:$0xff] }
 0x601   :  { %v7976_v60 = vld [vmem:[#allocation45_spill] sm:$0xff]  ;;  %v7978_v26 = vld [vmem:[#allocation47_spill] sm:$0xff] }
 0x66f   :  { %v4415_v15 = vpop.f32.mrb[124].mxu0  ;;  %v4467_v21 = vpop.f32.mrb[124].mxu1 }
 0x670   :  { %v4890_v11 = vmax.f32 %v2750_v53, %v4415_v15  ;;  %v4892_v17 = vmax.f32 %v2752_v46, %v4467_v21  ;;  %v5708_v48 = vpop.f32.mrb[125].mxu0  ;;  %v5714_v14 = vpop.f32.mrb[125].mxu1  ;;  %v7971_v15 = vld [vmem:[#allocation40_spill] sm:$0xff] }
 0x671   :  { %v4418_v8 = vpop.f32.mrb[126].mxu0  ;;  %v4470_v30 = vpop.f32.mrb[126].mxu1  ;;  %v2762_v21 = vmax.f32 %v7952_v63, %v7971_v15  ;;  %v7974_v48 = vld [vmem:[#allocation43_spill] sm:$0xff] }
 0x672   :  { %4910 = vst.msk [vmem:[%s7852_s15] sm:$0xff] %vm514_vm1, %v4890_v11  ;;  %4912 = vst.msk [vmem:[%s7852_s15 + $0x10] sm:$0xff] %vm514_vm1, %v4892_v17  ;;  %v4891_v16 = vmax.f32 %v2751_v57, %v4418_v8  ;;  %v4893_v42 = vmax.f32 %v2753_v3, %v4470_v30  ;;  %v5709_v45 = vpop.f32.mrb[127].mxu0  ;;  %v5715_v51 = vpop.f32.mrb[127].mxu1  ;;  %v2764_v57 = vmax.f32 %v7954_v54, %v7972_v1  ;;  %v7973_v11 = vld [vmem:[#allocation42_spill] sm:$0xff] }
 0x673   :  { %v2763_v17 = vmax.f32 %v7951_v12, %v7973_v11  ;;  %v2765_v14 = vmax.f32 %v7953_v19, %v7974_v48 }
 0x674   :  { %4911 = vst.msk [vmem:[%s7852_s15 + $0x8] sm:$0xff] %vm514_vm1, %v4891_v16  ;;  %4913 = vst.msk [vmem:[%s7852_s15 + $0x18] sm:$0xff] %vm514_vm1, %v4893_v42 }
 0x677   :  { %v4519_v52 = vpop.f32.mrb[128].mxu0  ;;  %v4571_v35 = vpop.f32.mrb[128].mxu1 }
 0x678   :  { %v4894_v9 = vmax.f32 %v2754_v43, %v4519_v52  ;;  %v4896_v39 = vmax.f32 %v2756_v47, %v4571_v35  ;;  %v5720_v6 = vpop.f32.mrb[129].mxu0  ;;  %v5726_v7 = vpop.f32.mrb[129].mxu1  ;;  %v2766_v43 = vmax.f32 %v7956_v34, %v7975_v20  ;;  %v2768_v47 = vmax.f32 %v7958_v23, %v7976_v60 }
 0x679   :  { %v4522_v61 = vpop.f32.mrb[130].mxu0  ;;  %v4574_v50 = vpop.f32.mrb[130].mxu1 }
 0x67a   :  { %4914 = vst.msk [vmem:[%s7852_s15 + $0x20] sm:$0xff] %vm514_vm1, %v4894_v9  ;;  %4916 = vst.msk [vmem:[%s7852_s15 + $0x30] sm:$0xff] %vm514_vm1, %v4896_v39  ;;  %v4895_v29 = vmax.f32 %v2755_v36, %v4522_v61  ;;  %v4897_v56 = vmax.f32 %v2757_v22, %v4574_v50  ;;  %v5721_v0 = vpop.f32.mrb[131].mxu0  ;;  %v5727_v59 = vpop.f32.mrb[131].mxu1  ;;  %v2767_v36 = vmax.f32 %v7955_v37, %v7977_v24 }
 0x67b   :  { %v2769_v22 = vmax.f32 %v7957_v32, %v7978_v26 }
 0x67c   :  { %4915 = vst.msk [vmem:[%s7852_s15 + $0x28] sm:$0xff] %vm514_vm1, %v4895_v29  ;;  %4917 = vst.msk [vmem:[%s7852_s15 + $0x38] sm:$0xff] %vm514_vm1, %v4897_v56 }
 0x67f   :  { %v4623_v28 = vpop.f32.mrb[132].mxu0  ;;  %v4675_v10 = vpop.f32.mrb[132].mxu1 }
 0x680   :  { %v4898_v18 = vmax.f32 %v2758_v33, %v4623_v28  ;;  %v4900_v2 = vmax.f32 %v2760_v62, %v4675_v10  ;;  %v5732_v44 = vpop.f32.mrb[133].mxu0  ;;  %v5738_v53 = vpop.f32.mrb[133].mxu1 }
 0x681   :  { %v4626_v25 = vpop.f32.mrb[134].mxu0  ;;  %v4678_v46 = vpop.f32.mrb[134].mxu1 }
 0x682   :  { %4918 = vst.msk [vmem:[%s7852_s15 + $0x40] sm:$0xff] %vm514_vm1, %v4898_v18  ;;  %4920 = vst.msk [vmem:[%s7852_s15 + $0x50] sm:$0xff] %vm514_vm1, %v4900_v2  ;;  %v4899_v40 = vmax.f32 %v2759_v27, %v4626_v25  ;;  %v4901_v58 = vmax.f32 %v2761_v31, %v4678_v46  ;;  %v5733_v5 = vpop.f32.mrb[135].mxu0  ;;  %v5739_v38 = vpop.f32.mrb[135].mxu1 }
 0x684   :  { %4919 = vst.msk [vmem:[%s7852_s15 + $0x48] sm:$0xff] %vm514_vm1, %v4899_v40  ;;  %4921 = vst.msk [vmem:[%s7852_s15 + $0x58] sm:$0xff] %vm514_vm1, %v4901_v58 }
 0x687   :  { %v4727_v55 = vpop.f32.mrb[136].mxu0  ;;  %v4779_v3 = vpop.f32.mrb[136].mxu1 }
 0x688   :  { %v4902_v8 = vmax.f32 %v2762_v21, %v4727_v55  ;;  %v4904_v30 = vmax.f32 %v2764_v57, %v4779_v3  ;;  %v5744_v16 = vpop.f32.mrb[137].mxu0  ;;  %v5750_v42 = vpop.f32.mrb[137].mxu1 }
 0x689   :  { %v4730_v45 = vpop.f32.mrb[138].mxu0  ;;  %v4782_v51 = vpop.f32.mrb[138].mxu1 }
 0x68a   :  { %4922 = vst.msk [vmem:[%s7852_s15 + $0x60] sm:$0xff] %vm514_vm1, %v4902_v8  ;;  %4924 = vst.msk [vmem:[%s7852_s15 + $0x70] sm:$0xff] %vm514_vm1, %v4904_v30  ;;  %v4903_v12 = vmax.f32 %v2763_v17, %v4730_v45  ;;  %v4905_v63 = vmax.f32 %v2765_v14, %v4782_v51  ;;  %v5745_v54 = vpop.f32.mrb[139].mxu0  ;;  %v5751_v19 = vpop.f32.mrb[139].mxu1 }
 0x68c   :  { %4923 = vst.msk [vmem:[%s7852_s15 + $0x68] sm:$0xff] %vm514_vm1, %v4903_v12  ;;  %4925 = vst.msk [vmem:[%s7852_s15 + $0x78] sm:$0xff] %vm514_vm1, %v4905_v63 }
 0x68f   :  { %v4831_v52 = vpop.f32.mrb[140].mxu0  ;;  %v4883_v35 = vpop.f32.mrb[140].mxu1 }
 0x690   :  { %v4906_v9 = vmax.f32 %v2766_v43, %v4831_v52  ;;  %v4908_v39 = vmax.f32 %v2768_v47, %v4883_v35  ;;  %v5756_v6 = vpop.f32.mrb[141].mxu0  ;;  %v5762_v7 = vpop.f32.mrb[141].mxu1 }
 0x691   :  { %v4834_v61 = vpop.f32.mrb[142].mxu0  ;;  %v4886_v50 = vpop.f32.mrb[142].mxu1 }
 0x692   :  { %4926 = vst.msk [vmem:[%s7852_s15 + $0x80] sm:$0xff] %vm514_vm1, %v4906_v9  ;;  %4928 = vst.msk [vmem:[%s7852_s15 + $0x90] sm:$0xff] %vm514_vm1, %v4908_v39  ;;  %v4907_v37 = vmax.f32 %v2767_v36, %v4834_v61  ;;  %v4909_v34 = vmax.f32 %v2769_v22, %v4886_v50  ;;  %v5757_v23 = vpop.f32.mrb[143].mxu0  ;;  %v5763_v32 = vpop.f32.mrb[143].mxu1 }
 0x694   :  { %4927 = vst.msk [vmem:[%s7852_s15 + $0x88] sm:$0xff] %vm514_vm1, %v4907_v37  ;;  %4929 = vst.msk [vmem:[%s7852_s15 + $0x98] sm:$0xff] %vm514_vm1, %v4909_v34 }
 0x695   :  { %5892 = dma.done.wait [#allocation3], 16  }
 0x696   :  { %5893 = vsyncadd [#allocation3], 4294967280 }
 0x697   :  { %4955 = vsyncpa [#allocation3], 1 }
 0x698   :  { %4956 = vsyncpa [#allocation4], 1 }

</bundles_post_ra>
